<compile_context>
chip_gen: v7x
topology: tpu7x:2x2x1
jax: 0.10.0
libtpu: 0.0.40
codegen_flags: <defaults>
</compile_context>

<pallas_src>
import functools

import numpy as np
import jax
import jax.numpy as jnp
from jax.experimental import pallas as pl
from jax.experimental.pallas import tpu as pltpu

D_IN, D_H1, D_H2, D_OUT = 768, 768, 512, 128
_ROW_ALIGN = 128  # MXU M-dim quantum / lane-friendly row tile


def _round_up(n, m):
    return ((n + m - 1) // m) * m


def _pick_tile(bp, tb_max):
    """Largest multiple-of-128 divisor of bp that is <= tb_max, capped at
    bp // 2 whenever bp >= 256 so the grid has >= 2 steps (v7x megacore)."""
    cap = min(tb_max, bp if bp < 2 * _ROW_ALIGN else bp // 2)
    best = _ROW_ALIGN
    t = _ROW_ALIGN
    while t <= cap:
        if bp % t == 0:
            best = t
        t += _ROW_ALIGN
    return best


def hash_kernel(x_ref, w1_ref, b1_ref, w2_ref, b2_ref, w3_ref, b3_ref, o_ref):
    # bf16 MXU operands, f32 accumulation; no extra reshapes/slices on h1/h2
    # so the kernel stays MXU-bound (vld/vst slots stay free).
    x = x_ref[...]
    if x.dtype != jnp.bfloat16:
        x = x.astype(jnp.bfloat16)
    h1 = jnp.dot(x, w1_ref[...],
                 preferred_element_type=jnp.float32) + b1_ref[...]
    h2 = jnp.dot(h1.astype(jnp.bfloat16), w2_ref[...],
                 preferred_element_type=jnp.float32) + b2_ref[...]
    h3 = jnp.dot(h2.astype(jnp.bfloat16), w3_ref[...],
                 preferred_element_type=jnp.float32) + b3_ref[...]
    o_ref[...] = jnp.tanh(h3).astype(o_ref.dtype)


def prepare_params(w1, b1, w2, b2, w3, b3):
    """One-time (OUTSIDE the jitted forward) parameter prep: weights -> bf16
    MXU operands, biases -> f32 [1, out] rows for broadcast."""
    def prep(w, b):
        return w.astype(jnp.bfloat16), jnp.reshape(b, (1, -1)).astype(jnp.float32)
    (w1, b1), (w2, b2), (w3, b3) = prep(w1, b1), prep(w2, b2), prep(w3, b3)
    return w1, b1, w2, b2, w3, b3


@functools.partial(jax.jit, static_argnames=("tb", "out_dtype"))
def hash_forward(x, w1, b1, w2, b2, w3, b3, tb=1024, out_dtype=jnp.float32):
    """x: [B, 768] (f32 or bf16); weights [in, out] (ideally bf16 via
    prepare_params); biases [1, out] f32."""
    B = x.shape[0]
    Bp = _round_up(max(B, 1), _ROW_ALIGN)           # pad only to 128 rows
    tb_eff = _pick_tile(Bp, tb)                     # divisor of Bp, >= 2 steps if possible
    if Bp != B:
        x = jnp.pad(x, ((0, Bp - B), (0, 0)))
    grid = (Bp // tb_eff,)

    # Grid-invariant params: whole array pinned in VMEM, single-buffered.
    resident = pl.BlockSpec(memory_space=pltpu.MemorySpace.VMEM)

    n_wt = D_IN * D_H1 + D_H1 * D_H2 + D_H2 * D_OUT
    cost = pl.CostEstimate(
        flops=2 * Bp * n_wt,
        transcendentals=Bp * D_OUT,
        bytes_accessed=(Bp * D_IN * x.dtype.itemsize              # streamed x
                        + n_wt * np.dtype(w1.dtype).itemsize      # weights
                        + 4 * (D_H1 + D_H2 + D_OUT)               # f32 biases
                        + Bp * D_OUT * np.dtype(out_dtype).itemsize),  # output
    )

    out = pl.pallas_call(
        hash_kernel,
        out_shape=jax.ShapeDtypeStruct((Bp, D_OUT), out_dtype),
        grid_spec=pltpu.PrefetchScalarGridSpec(
            num_scalar_prefetch=0,
            grid=grid,
            in_specs=[
                pl.BlockSpec((tb_eff, D_IN), lambda i: (i, 0)),   # x tile
                resident, resident,                               # w1, b1
                resident, resident,                               # w2, b2
                resident, resident,                               # w3, b3
            ],
            out_specs=pl.BlockSpec((tb_eff, D_OUT), lambda i: (i, 0)),
        ),
        compiler_params=pltpu.CompilerParams(
            dimension_semantics=("parallel",),
            # 32 MiB is enough even at tb=1024 (~18 MiB peak) and stays well
            # under v7x's 64 MiB physical VMEM per TensorCore.
            vmem_limit_bytes=32 * 1024 * 1024,
        ),
        cost_estimate=cost,
    )(x, w1, b1, w2, b2, w3, b3)
    return out[:B]


def init_linear(key, in_f, out_f):
    """Deterministic init mimicking torch.nn.Linear default (uniform +-1/sqrt(in)).

    Returns (W_t, b) with W_t of shape [in_f, out_f] (already transposed for x @ W_t).
    """
    kw, kb = jax.random.split(key)
    bound = 1.0 / (in_f ** 0.5)
    w = jax.random.uniform(kw, (out_f, in_f), jnp.float32, -bound, bound)
    b = jax.random.uniform(kb, (1, out_f), jnp.float32, -bound, bound)
    return w.T, b


def reference_forward(x, w1, b1, w2, b2, w3, b3):
    h = x @ w1 + b1
    h = h @ w2 + b2
    h = h @ w3 + b3
    return jnp.tanh(h)


if __name__ == "__main__":
    root = jax.random.PRNGKey(0)
    kx, k1, k2, k3 = jax.random.split(root, 4)

    B = 10  # deliberately NOT a multiple of 128 -> exercises the padding path
    x = jax.random.normal(kx, (B, D_IN), jnp.float32)

    w1, b1 = init_linear(k1, D_IN, D_H1)
    w2, b2 = init_linear(k2, D_H1, D_H2)
    w3, b3 = init_linear(k3, D_H2, D_OUT)

    # One-time bf16 weight preparation (kept outside the jitted forward so no
    # per-call f32->bf16 convert is emitted).
    params = prepare_params(w1, b1, w2, b2, w3, b3)

    out = jax.block_until_ready(hash_forward(x, *params))
    ref = reference_forward(x, w1, b1, w2, b2, w3, b3)

    assert out.shape == (B, D_OUT)
    # bf16 MXU operands + f32 accumulation: allow a few 1e-2 of absolute slack
    # vs the pure-f32 reference (tanh output is bounded in [-1, 1]).
    assert jnp.allclose(out, ref, atol=3e-2, rtol=0.0), "mismatch vs JAX reference"

    print("KERNEL_OK")
</pallas_src>

<mosaic_0001>
module attributes {stable_mosaic.version = 11 : i64} {
  func.func @hash_kernel(%arg0: i32, %arg1: memref<128x768xf32, #tpu.memory_space<vmem>>, %arg2: memref<768x768xbf16, #tpu.memory_space<vmem>>, %arg3: memref<1x768xf32, #tpu.memory_space<vmem>>, %arg4: memref<768x512xbf16, #tpu.memory_space<vmem>>, %arg5: memref<1x512xf32, #tpu.memory_space<vmem>>, %arg6: memref<512x128xbf16, #tpu.memory_space<vmem>>, %arg7: memref<1x128xf32, #tpu.memory_space<vmem>>, %arg8: memref<128x128xf32, #tpu.memory_space<vmem>>) attributes {dimension_semantics = [#tpu.dimension_semantics<parallel>], iteration_bounds = array<i64: 1>, scalar_prefetch = 0 : i64, scratch_operands = 0 : i64, tpu.core_type = #tpu.core_type<tc>, window_params = [{transform_indices = @transform_0, window_bounds = array<i64: 128, 768>}, {pipeline_mode = #tpu.pipeline_mode<synchronous>, transform_indices = @transform_1, window_bounds = array<i64: 768, 768>}, {pipeline_mode = #tpu.pipeline_mode<synchronous>, transform_indices = @transform_2, window_bounds = array<i64: 1, 768>}, {pipeline_mode = #tpu.pipeline_mode<synchronous>, transform_indices = @transform_3, window_bounds = array<i64: 768, 512>}, {pipeline_mode = #tpu.pipeline_mode<synchronous>, transform_indices = @transform_4, window_bounds = array<i64: 1, 512>}, {pipeline_mode = #tpu.pipeline_mode<synchronous>, transform_indices = @transform_5, window_bounds = array<i64: 512, 128>}, {pipeline_mode = #tpu.pipeline_mode<synchronous>, transform_indices = @transform_6, window_bounds = array<i64: 1, 128>}, {transform_indices = @transform_7, window_bounds = array<i64: 128, 128>}]} {
    %c0 = arith.constant 0 : index
    %c0_0 = arith.constant 0 : index
    %0 = vector.load %arg1[%c0, %c0_0] : memref<128x768xf32, #tpu.memory_space<vmem>>, vector<128x768xf32>
    %1 = arith.truncf %0 : vector<128x768xf32> to vector<128x768xbf16>
    %c0_1 = arith.constant 0 : index
    %c0_2 = arith.constant 0 : index
    %2 = vector.load %arg2[%c0_1, %c0_2] : memref<768x768xbf16, #tpu.memory_space<vmem>>, vector<768x768xbf16>
    %cst = arith.constant dense<0.000000e+00> : vector<128x768xf32>
    %3 = tpu.matmul %1, %2, %cst {dimension_numbers = #tpu.dot_dimension_numbers<[1], [0], [0], [1], [0, 0, 1, 1], [], []>} : vector<128x768xbf16>, vector<768x768xbf16>, vector<128x768xf32> -> vector<128x768xf32>
    %c0_3 = arith.constant 0 : index
    %c0_4 = arith.constant 0 : index
    %4 = vector.load %arg3[%c0_3, %c0_4] : memref<1x768xf32, #tpu.memory_space<vmem>>, vector<1x768xf32>
    %5 = vector.broadcast %4 : vector<1x768xf32> to vector<128x768xf32>
    %6 = arith.addf %3, %5 : vector<128x768xf32>
    %7 = arith.truncf %6 : vector<128x768xf32> to vector<128x768xbf16>
    %c0_5 = arith.constant 0 : index
    %c0_6 = arith.constant 0 : index
    %8 = vector.load %arg4[%c0_5, %c0_6] : memref<768x512xbf16, #tpu.memory_space<vmem>>, vector<768x512xbf16>
    %cst_7 = arith.constant dense<0.000000e+00> : vector<128x512xf32>
    %9 = tpu.matmul %7, %8, %cst_7 {dimension_numbers = #tpu.dot_dimension_numbers<[1], [0], [0], [1], [0, 0, 1, 1], [], []>} : vector<128x768xbf16>, vector<768x512xbf16>, vector<128x512xf32> -> vector<128x512xf32>
    %c0_8 = arith.constant 0 : index
    %c0_9 = arith.constant 0 : index
    %10 = vector.load %arg5[%c0_8, %c0_9] : memref<1x512xf32, #tpu.memory_space<vmem>>, vector<1x512xf32>
    %11 = vector.broadcast %10 : vector<1x512xf32> to vector<128x512xf32>
    %12 = arith.addf %9, %11 : vector<128x512xf32>
    %13 = arith.truncf %12 : vector<128x512xf32> to vector<128x512xbf16>
    %c0_10 = arith.constant 0 : index
    %c0_11 = arith.constant 0 : index
    %14 = vector.load %arg6[%c0_10, %c0_11] : memref<512x128xbf16, #tpu.memory_space<vmem>>, vector<512x128xbf16>
    %cst_12 = arith.constant dense<0.000000e+00> : vector<128x128xf32>
    %15 = tpu.matmul %13, %14, %cst_12 {dimension_numbers = #tpu.dot_dimension_numbers<[1], [0], [0], [1], [0, 0, 1, 1], [], []>} : vector<128x512xbf16>, vector<512x128xbf16>, vector<128x128xf32> -> vector<128x128xf32>
    %c0_13 = arith.constant 0 : index
    %c0_14 = arith.constant 0 : index
    %16 = vector.load %arg7[%c0_13, %c0_14] : memref<1x128xf32, #tpu.memory_space<vmem>>, vector<1x128xf32>
    %17 = vector.broadcast %16 : vector<1x128xf32> to vector<128x128xf32>
    %18 = arith.addf %15, %17 : vector<128x128xf32>
    %19 = math.tanh %18 : vector<128x128xf32>
    %c0_15 = arith.constant 0 : index
    %c0_16 = arith.constant 0 : index
    %20 = vector.load %arg8[%c0_15, %c0_16] : memref<128x128xf32, #tpu.memory_space<vmem>>, vector<128x128xf32>
    tpu.vector_store %arg8[%c0_15, %c0_16], %19 {strides = array<i32>} : memref<128x128xf32, #tpu.memory_space<vmem>>, vector<128x128xf32>,
    return
  }
  func.func @transform_0(%arg0: i32) -> (i32, i32) {
    %c0_i32 = arith.constant 0 : i32
    %c0_i32_0 = arith.constant 0 : i32
    return %arg0, %c0_i32 : i32, i32
  }
  func.func @transform_1(%arg0: i32) -> (i32, i32) {
    %c0_i32 = arith.constant 0 : i32
    %c0_i32_0 = arith.constant 0 : i32
    %c0_i32_1 = arith.constant 0 : i32
    return %c0_i32, %c0_i32_0 : i32, i32
  }
  func.func @transform_2(%arg0: i32) -> (i32, i32) {
    %c0_i32 = arith.constant 0 : i32
    %c0_i32_0 = arith.constant 0 : i32
    %c0_i32_1 = arith.constant 0 : i32
    return %c0_i32, %c0_i32_0 : i32, i32
  }
  func.func @transform_3(%arg0: i32) -> (i32, i32) {
    %c0_i32 = arith.constant 0 : i32
    %c0_i32_0 = arith.constant 0 : i32
    %c0_i32_1 = arith.constant 0 : i32
    return %c0_i32, %c0_i32_0 : i32, i32
  }
  func.func @transform_4(%arg0: i32) -> (i32, i32) {
    %c0_i32 = arith.constant 0 : i32
    %c0_i32_0 = arith.constant 0 : i32
    %c0_i32_1 = arith.constant 0 : i32
    return %c0_i32, %c0_i32_0 : i32, i32
  }
  func.func @transform_5(%arg0: i32) -> (i32, i32) {
    %c0_i32 = arith.constant 0 : i32
    %c0_i32_0 = arith.constant 0 : i32
    %c0_i32_1 = arith.constant 0 : i32
    return %c0_i32, %c0_i32_0 : i32, i32
  }
  func.func @transform_6(%arg0: i32) -> (i32, i32) {
    %c0_i32 = arith.constant 0 : i32
    %c0_i32_0 = arith.constant 0 : i32
    %c0_i32_1 = arith.constant 0 : i32
    return %c0_i32, %c0_i32_0 : i32, i32
  }
  func.func @transform_7(%arg0: i32) -> (i32, i32) {
    %c0_i32 = arith.constant 0 : i32
    %c0_i32_0 = arith.constant 0 : i32
    return %arg0, %c0_i32 : i32, i32
  }
}

</mosaic_0001>

<bundles_post_ra>
// kernel: hash_forward.1
= control target key start
LH: loop header
LB: loop body
LE: loop exit
PB: predicated region body
PF: predicated region fallthrough
CT: control target
= control target key end

     0   :  { %12 = vsyncpa [#allocation3], 0  ;;  %s8877_s0 = inlined_call_operand.vmem [shape: f32[128,768], index: 0, kind: input, shape index: {}]   ;;  %s8878_s1 = inlined_call_operand.hbm [shape: bf16[768,768], index: 1, kind: input, shape index: {}]   ;;  %s8879_s2 = inlined_call_operand.hbm [shape: f32[1,768], index: 2, kind: input, shape index: {}]   ;;  %s8880_s3 = inlined_call_operand.hbm [shape: bf16[768,512], index: 3, kind: input, shape index: {}]   ;;  %s8881_s4 = inlined_call_operand.hbm [shape: f32[1,512], index: 4, kind: input, shape index: {}]   ;;  %s8882_s5 = inlined_call_operand.hbm [shape: bf16[512,128], index: 5, kind: input, shape index: {}]   ;;  %s8883_s6 = inlined_call_operand.hbm [shape: f32[1,128], index: 6, kind: input, shape index: {}]   ;;  %s8884_s7 = inlined_call_operand.vmem [shape: f32[128,128], index: 7, kind: output, shape index: {}]  }
   0x1   :  { %13 = vsyncpa [#allocation5], 0 }
   0x2   :  { %14 = vsyncpa [#allocation8], 0 }
   0x3   :  { %15 = vsyncpa [#allocation11], 0  ;;  %s7543_s24 = smov [#allocation4]   ;;  %s7544_s26 = smov [#allocation7]  }
   0x4   :  { %s36_s25 = sshll.u32 %s7543_s24, 4  ;;  %s58_s27 = sshll.u32 %s7544_s26, 4  ;;  %s37_s25 = int_to_ptr.vmem [resolvable:$true] %s36_s25  ;;  %s59_s27 = int_to_ptr.vmem [resolvable:$true] %s58_s27 }
   0x5   :  { %s7403_s30 = scalar_lea.hbm %s8879_s2, 96 }
   0x6   :  { %p7404_p0 = scmp.ne.s32.totalorder %s8879_s2, %s7403_s30  ;;  %p7407_p1 = scmp.lt.u32.totalorder %s7403_s30, %s8879_s2 }
   0x8   :  { %p7409_p2 = pnand %p7407_p1, %p7404_p0 }
   0xa   :  { %7412 = shalt.err (!%p7409_p2)
}
   0xb   :  { %s7413_s12 = scalar_lea.vmem %s37_s25, 96  ;;  %p7418_p4 = scmp.lt.s32.totalorder %s37_s25, %s37_s25 }
   0xc   :  { %p7414_p3 = scmp.ne.s32.totalorder %s37_s25, %s7413_s12  ;;  %p7419_p5 = scmp.lt.s32.totalorder %s7413_s12, %s7413_s12 }
   0xe   :  { %p7420_p6 = por %p7419_p5, %p7418_p4 }
  0x10   :  { %p7421_p7 = pnand %p7420_p6, %p7414_p3 }
  0x12   :  { %7424 = shalt.err (!%p7421_p7)
}
  0x13   :  { %39 = dma.hbm_to_vmem [thread:$0]  %s8879_s2, 96, %s37_s25, [#allocation5]  }
  0x14   :  { %s7425_s17 = scalar_lea.hbm %s8881_s4, 64 }
  0x15   :  { %p7426_p8 = scmp.ne.s32.totalorder %s8881_s4, %s7425_s17  ;;  %p7429_p9 = scmp.lt.u32.totalorder %s7425_s17, %s8881_s4 }
  0x17   :  { %p7431_p10 = pnand %p7429_p9, %p7426_p8 }
  0x19   :  { %7434 = shalt.err (!%p7431_p10)
}
  0x1a   :  { %s7435_s22 = scalar_lea.vmem %s59_s27, 64  ;;  %p7440_p12 = scmp.lt.s32.totalorder %s59_s27, %s59_s27 }
  0x1b   :  { %p7436_p11 = scmp.ne.s32.totalorder %s59_s27, %s7435_s22  ;;  %p7441_p13 = scmp.lt.s32.totalorder %s7435_s22, %s7435_s22 }
  0x1d   :  { %p7442_p0 = por %p7441_p13, %p7440_p12 }
  0x1f   :  { %p7443_p1 = pnand %p7442_p0, %p7436_p11 }
  0x21   :  { %7446 = shalt.err (!%p7443_p1)
}
  0x22   :  { %61 = dma.hbm_to_vmem [thread:$0]  %s8881_s4, 64, %s59_s27, [#allocation8]  }
  0x23   :  { %s7545_s24 = smov [#allocation2]   ;;  %s7447_s29 = scalar_lea.hbm %s8878_s1, 36864 }
  0x24   :  { %s23_s25 = sshll.u32 %s7545_s24, 4  ;;  %p7448_p2 = scmp.ne.s32.totalorder %s8878_s1, %s7447_s29  ;;  %s24_s25 = int_to_ptr.vmem [resolvable:$true] %s23_s25 }
  0x25   :  { %p7451_p3 = scmp.lt.u32.totalorder %s7447_s29, %s8878_s1 }
  0x27   :  { %p7453_p4 = pnand %p7451_p3, %p7448_p2 }
  0x29   :  { %7456 = shalt.err (!%p7453_p4)
}
  0x2a   :  { %s7457_s11 = scalar_lea.vmem %s24_s25, 36864  ;;  %p7462_p6 = scmp.lt.s32.totalorder %s24_s25, %s24_s25 }
  0x2b   :  { %p7458_p5 = scmp.ne.s32.totalorder %s24_s25, %s7457_s11  ;;  %p7463_p7 = scmp.lt.s32.totalorder %s7457_s11, %s7457_s11 }
  0x2d   :  { %p7464_p8 = por %p7463_p7, %p7462_p6 }
  0x2f   :  { %p7465_p9 = pnand %p7464_p8, %p7458_p5 }
  0x31   :  { %7468 = shalt.err (!%p7465_p9)
}
  0x32   :  { %s7546_s4 = smov 384   ;;  %s7547_s27 = smov 24  }
  0x33   :  { %29 = dma.hbm_to_vmem [thread:$0]  %s8878_s1, 36864, %s24_s25, [#allocation3], %s7546_s4, %s7546_s4, %s7547_s27  }
  0x34   :  { %s7548_s14 = smov [#allocation6]   ;;  %s7469_s18 = scalar_lea.hbm %s8880_s3, 24576 }
  0x35   :  { %s45_s15 = sshll.u32 %s7548_s14, 4  ;;  %p7470_p10 = scmp.ne.s32.totalorder %s8880_s3, %s7469_s18  ;;  %s46_s15 = int_to_ptr.vmem [resolvable:$true] %s45_s15 }
  0x36   :  { %p7473_p11 = scmp.lt.u32.totalorder %s7469_s18, %s8880_s3 }
  0x38   :  { %p7475_p12 = pnand %p7473_p11, %p7470_p10 }
  0x3a   :  { %7478 = shalt.err (!%p7475_p12)
}
  0x3b   :  { %s7479_s2 = scalar_lea.vmem %s46_s15, 24576  ;;  %p7484_p0 = scmp.lt.s32.totalorder %s46_s15, %s46_s15 }
  0x3c   :  { %p7480_p13 = scmp.ne.s32.totalorder %s46_s15, %s7479_s2  ;;  %p7485_p1 = scmp.lt.s32.totalorder %s7479_s2, %s7479_s2 }
  0x3e   :  { %p7486_p2 = por %p7485_p1, %p7484_p0 }
  0x40   :  { %p7487_p3 = pnand %p7486_p2, %p7480_p13 }
  0x42   :  { %7490 = shalt.err (!%p7487_p3)
}
  0x43   :  { %s7549_s1 = smov 256   ;;  %s7550_s23 = smov 16  }
  0x44   :  { %51 = dma.hbm_to_vmem [thread:$0]  %s8880_s3, 24576, %s46_s15, [#allocation5], %s7549_s1, %s7549_s1, %s7550_s23  }
  0x45   :  { %s7551_s26 = smov [#allocation9]   ;;  %s7491_s8 = scalar_lea.hbm %s8882_s5, 4096 }
  0x46   :  { %s67_s28 = sshll.u32 %s7551_s26, 4  ;;  %p7492_p4 = scmp.ne.s32.totalorder %s8882_s5, %s7491_s8  ;;  %s68_s28 = int_to_ptr.vmem [resolvable:$true] %s67_s28 }
  0x47   :  { %p7495_p5 = scmp.lt.u32.totalorder %s7491_s8, %s8882_s5 }
  0x49   :  { %p7497_p6 = pnand %p7495_p5, %p7492_p4 }
  0x4b   :  { %7500 = shalt.err (!%p7497_p6)
}
  0x4c   :  { %s7501_s27 = scalar_lea.vmem %s68_s28, 4096  ;;  %p7506_p8 = scmp.lt.s32.totalorder %s68_s28, %s68_s28 }
  0x4d   :  { %p7502_p7 = scmp.ne.s32.totalorder %s68_s28, %s7501_s27  ;;  %p7507_p9 = scmp.lt.s32.totalorder %s7501_s27, %s7501_s27 }
  0x4f   :  { %p7508_p10 = por %p7507_p9, %p7506_p8 }
  0x51   :  { %p7509_p11 = pnand %p7508_p10, %p7502_p7 }
  0x53   :  { %7512 = shalt.err (!%p7509_p11)
}
  0x54   :  { %s7552_s3 = smov 64   ;;  %s7553_s12 = smov 4  }
  0x55   :  { %73 = dma.hbm_to_vmem [thread:$0]  %s8882_s5, 4096, %s68_s28, [#allocation8], %s7552_s3, %s7552_s3, %s7553_s12  }
  0x56   :  { %s7554_s15 = smov [#allocation10]   ;;  %s7513_s19 = scalar_lea.hbm %s8883_s6, 16 }
  0x57   :  { %s80_s16 = sshll.u32 %s7554_s15, 4  ;;  %p7514_p12 = scmp.ne.s32.totalorder %s8883_s6, %s7513_s19  ;;  %s81_s16 = int_to_ptr.vmem [resolvable:$true] %s80_s16 }
  0x58   :  { %p7517_p13 = scmp.lt.u32.totalorder %s7513_s19, %s8883_s6 }
  0x5a   :  { %p7519_p0 = pnand %p7517_p13, %p7514_p12 }
  0x5c   :  { %7522 = shalt.err (!%p7519_p0)
}
  0x5d   :  { %s7523_s1 = scalar_lea.vmem %s81_s16, 16  ;;  %s7527_s5 = scalar_lea.vmem %s81_s16, 32 }
  0x5e   :  { %p7524_p1 = scmp.ne.s32.totalorder %s81_s16, %s7523_s1  ;;  %p7528_p2 = scmp.lt.s32.totalorder %s81_s16, %s81_s16 }
  0x5f   :  { %p7529_p3 = scmp.lt.s32.totalorder %s7527_s5, %s7523_s1 }
  0x61   :  { %p7530_p4 = por %p7529_p3, %p7528_p2 }
  0x63   :  { %p7531_p5 = pnand %p7530_p4, %p7524_p1 }
  0x65   :  { %7534 = shalt.err (!%p7531_p5)
}
  0x66   :  { %83 = dma.hbm_to_vmem [thread:$0]  %s8883_s6, 16, %s81_s16, [#allocation11]  }
  0x67   :  { %7535 = dma.done.wait [#allocation3], 36864  }
  0x68   :  { %7536 = vsyncadd [#allocation3], 4294930432 }
  0x69   :  { %7537 = dma.done.wait [#allocation5], 24672  }
  0x6a   :  { %7538 = vsyncadd [#allocation5], 4294942624 }
  0x6b   :  { %7539 = dma.done.wait [#allocation8], 4160  }
  0x6c   :  { %7540 = vsyncadd [#allocation8], 4294963136 }
  0x6d   :  { %7541 = dma.done.wait [#allocation11], 16  }
  0x6e   :  { %7542 = vsyncadd [#allocation11], 4294967280  ;;  %v6618_v0 = vld [vmem:[#allocation2 + $0x4] ss:$24 sps:$4 sm:$0xff]   ;;  %v6622_v2 = vld [vmem:[#allocation2] ss:$24 sps:$4 sm:$0xff]  }
  0x6f   :  { %v6620_v1 = vld [vmem:[#allocation2 + $0xc] ss:$24 sps:$4 sm:$0xff]   ;;  %2007 = vmatprep.subr.bf16.mxu0 %v6618_v0  ;;  %v6623_v3 = vld [vmem:[#allocation2 + $0x8] ss:$24 sps:$4 sm:$0xff]   ;;  %v6626_v5 = vld [vmem:[#allocation2 + $0x3c] ss:$24 sps:$4 sm:$0xff]  }
  0x70   :  { %2346 = vmatprep.subr.bf16.mxu1 %v6620_v1  ;;  %v6624_v4 = vld [vmem:[#allocation2 + $0x34] ss:$24 sps:$4 sm:$0xff]   ;;  %2008 = vmatpush1.bf16.msra.mxu0 %v6622_v2  ;;  %v6628_v6 = vld [vmem:[#allocation2 + $0x30] ss:$24 sps:$4 sm:$0xff]   ;;  %v6630_v8 = vld [vmem:[#allocation2 + $0x64] ss:$24 sps:$4 sm:$0xff]  }
  0x71   :  { %2347 = vmatpush1.bf16.msra.mxu1 %v6623_v3  ;;  %2009 = vmatprep.subr.bf16.mxu0 %v6624_v4  ;;  %v6629_v7 = vld [vmem:[#allocation2 + $0x38] ss:$24 sps:$4 sm:$0xff]   ;;  %v6632_v9 = vld [vmem:[#allocation2 + $0x6c] ss:$24 sps:$4 sm:$0xff]   ;;  %v6635_v11 = vld [vmem:[#allocation2 + $0x68] ss:$24 sps:$4 sm:$0xff]  }
  0x72   :  { %2348 = vmatprep.subr.bf16.mxu1 %v6626_v5  ;;  %v6634_v10 = vld [vmem:[#allocation2 + $0x60] ss:$24 sps:$4 sm:$0xff]   ;;  %v6636_v12 = vld [vmem:[#allocation2 + $0x94] ss:$24 sps:$4 sm:$0xff]   ;;  %v6640_v14 = vld [vmem:[#allocation2 + $0x90] ss:$24 sps:$4 sm:$0xff]  }
  0x73   :  { %v6638_v13 = vld [vmem:[#allocation2 + $0x9c] ss:$24 sps:$4 sm:$0xff]   ;;  %v6641_v15 = vld [vmem:[#allocation2 + $0x98] ss:$24 sps:$4 sm:$0xff]   ;;  %v6644_v17 = vld [vmem:[#allocation2 + $0xcc] ss:$24 sps:$4 sm:$0xff]  }
  0x74   :  { %2010 = vmatpush1.bf16.msra.mxu0 %v6628_v6  ;;  %v6642_v16 = vld [vmem:[#allocation2 + $0xc4] ss:$24 sps:$4 sm:$0xff]   ;;  %v6646_v18 = vld [vmem:[#allocation2 + $0xc0] ss:$24 sps:$4 sm:$0xff]   ;;  %v6648_v20 = vld [vmem:[#allocation2 + $0xf4] ss:$24 sps:$4 sm:$0xff]  }
  0x75   :  { %2349 = vmatpush1.bf16.msra.mxu1 %v6629_v7  ;;  %2011 = vmatprep.subr.bf16.mxu0 %v6630_v8  ;;  %v6647_v19 = vld [vmem:[#allocation2 + $0xc8] ss:$24 sps:$4 sm:$0xff]   ;;  %v6650_v21 = vld [vmem:[#allocation2 + $0xfc] ss:$24 sps:$4 sm:$0xff]   ;;  %v6653_v23 = vld [vmem:[#allocation2 + $0xf8] ss:$24 sps:$4 sm:$0xff]  }
  0x76   :  { %2350 = vmatprep.subr.bf16.mxu1 %v6632_v9  ;;  %v6652_v22 = vld [vmem:[#allocation2 + $0xf0] ss:$24 sps:$4 sm:$0xff]   ;;  %v6654_v24 = vld [vmem:[#allocation2 + $0x124] ss:$24 sps:$4 sm:$0xff]   ;;  %v6658_v26 = vld [vmem:[#allocation2 + $0x120] ss:$24 sps:$4 sm:$0xff]  }
  0x77   :  { %v6656_v25 = vld [vmem:[#allocation2 + $0x12c] ss:$24 sps:$4 sm:$0xff]   ;;  %v6659_v27 = vld [vmem:[#allocation2 + $0x128] ss:$24 sps:$4 sm:$0xff]   ;;  %v6662_v29 = vld [vmem:[#allocation2 + $0x15c] ss:$24 sps:$4 sm:$0xff]  }
  0x78   :  { %2012 = vmatpush1.bf16.msra.mxu0 %v6634_v10  ;;  %v6660_v28 = vld [vmem:[#allocation2 + $0x154] ss:$24 sps:$4 sm:$0xff]   ;;  %v6664_v30 = vld [vmem:[#allocation2 + $0x150] ss:$24 sps:$4 sm:$0xff]   ;;  %v6666_v32 = vld [vmem:[#allocation2 + $0x184] ss:$24 sps:$4 sm:$0xff]  }
  0x79   :  { %2351 = vmatpush1.bf16.msra.mxu1 %v6635_v11  ;;  %2013 = vmatprep.subr.bf16.mxu0 %v6636_v12  ;;  %v6665_v31 = vld [vmem:[#allocation2 + $0x158] ss:$24 sps:$4 sm:$0xff]   ;;  %v6668_v33 = vld [vmem:[#allocation2 + $0x18c] ss:$24 sps:$4 sm:$0xff]   ;;  %v6671_v35 = vld [vmem:[#allocation2 + $0x188] ss:$24 sps:$4 sm:$0xff]  }
  0x7a   :  { %2352 = vmatprep.subr.bf16.mxu1 %v6638_v13  ;;  %v6670_v34 = vld [vmem:[#allocation2 + $0x180] ss:$24 sps:$4 sm:$0xff]   ;;  %v6672_v36 = vld [vmem:[#allocation2 + $0x1b4] ss:$24 sps:$4 sm:$0xff]   ;;  %v6676_v38 = vld [vmem:[#allocation2 + $0x1b0] ss:$24 sps:$4 sm:$0xff]  }
  0x7b   :  { %v6674_v37 = vld [vmem:[#allocation2 + $0x1bc] ss:$24 sps:$4 sm:$0xff]   ;;  %v6677_v39 = vld [vmem:[#allocation2 + $0x1b8] ss:$24 sps:$4 sm:$0xff]   ;;  %v6680_v41 = vld [vmem:[#allocation2 + $0x1ec] ss:$24 sps:$4 sm:$0xff]  }
  0x7c   :  { %2014 = vmatpush1.bf16.msra.mxu0 %v6640_v14  ;;  %v6678_v40 = vld [vmem:[#allocation2 + $0x1e4] ss:$24 sps:$4 sm:$0xff]   ;;  %v6682_v42 = vld [vmem:[#allocation2 + $0x1e0] ss:$24 sps:$4 sm:$0xff]   ;;  %v6684_v44 = vld [vmem:[#allocation2 + $0x214] ss:$24 sps:$4 sm:$0xff]  }
  0x7d   :  { %2353 = vmatpush1.bf16.msra.mxu1 %v6641_v15  ;;  %2015 = vmatprep.subr.bf16.mxu0 %v6642_v16  ;;  %v6683_v43 = vld [vmem:[#allocation2 + $0x1e8] ss:$24 sps:$4 sm:$0xff]   ;;  %v6686_v45 = vld [vmem:[#allocation2 + $0x21c] ss:$24 sps:$4 sm:$0xff]   ;;  %v6689_v48 = vld [vmem:[#allocation2 + $0x218] ss:$24 sps:$4 sm:$0xff]  }
  0x7e   :  { %2354 = vmatprep.subr.bf16.mxu1 %v6644_v17  ;;  %v104_v46 = vld [vmem:[%s8877_s0 + $0x8] sm:$0xff]  ;;  %v110_v49 = vld [vmem:[%s8877_s0 + $0x38] sm:$0xff]  ;;  %v103_v3 = vld [vmem:[%s8877_s0] sm:$0xff] }
  0x7f   :  { %v6688_v47 = vld [vmem:[#allocation2 + $0x210] ss:$24 sps:$4 sm:$0xff]   ;;  %v6690_v50 = vld [vmem:[#allocation2 + $0x244] ss:$24 sps:$4 sm:$0xff]   ;;  %v7673_v51 = vpack.c.bf16 %v110_v49, %v104_v46  ;;  %v6694_v53 = vld [vmem:[#allocation2 + $0x240] ss:$24 sps:$4 sm:$0xff]  }
  0x80   :  { %2016 = vmatpush1.bf16.msra.mxu0 %v6646_v18  ;;  %v6692_v52 = vld [vmem:[#allocation2 + $0x24c] ss:$24 sps:$4 sm:$0xff]   ;;  %v6695_v54 = vld [vmem:[#allocation2 + $0x248] ss:$24 sps:$4 sm:$0xff]   ;;  %v6698_v56 = vld [vmem:[#allocation2 + $0x27c] ss:$24 sps:$4 sm:$0xff]  }
  0x81   :  { %2355 = vmatpush1.bf16.msra.mxu1 %v6647_v19  ;;  %2017 = vmatprep.subr.bf16.mxu0 %v6648_v20  ;;  %v6696_v55 = vld [vmem:[#allocation2 + $0x274] ss:$24 sps:$4 sm:$0xff]   ;;  %v6700_v57 = vld [vmem:[#allocation2 + $0x270] ss:$24 sps:$4 sm:$0xff]   ;;  %v6702_v59 = vld [vmem:[#allocation2 + $0x2a4] ss:$24 sps:$4 sm:$0xff]  }
  0x82   :  { %2356 = vmatprep.subr.bf16.mxu1 %v6650_v21  ;;  %2039 = vmatprep.mubr.bf16.mxu0 %v7673_v51  ;;  %v6701_v58 = vld [vmem:[#allocation2 + $0x278] ss:$24 sps:$4 sm:$0xff]   ;;  %v6704_v60 = vld [vmem:[#allocation2 + $0x2ac] ss:$24 sps:$4 sm:$0xff]   ;;  %v6707_v62 = vld [vmem:[#allocation2 + $0x2a8] ss:$24 sps:$4 sm:$0xff]  }
  0x83   :  { %2378 = vmatprep.mubr.bf16.mxu1 %v7673_v51  ;;  %v6706_v61 = vld [vmem:[#allocation2 + $0x2a0] ss:$24 sps:$4 sm:$0xff]   ;;  %v6708_v63 = vld [vmem:[#allocation2 + $0x2d4] ss:$24 sps:$4 sm:$0xff]   ;;  %v6712_v1 = vld [vmem:[#allocation2 + $0x2d0] ss:$24 sps:$4 sm:$0xff]  }
  0x84   :  { %2018 = vmatpush1.bf16.msra.mxu0 %v6652_v22  ;;  %v6710_v0 = vld [vmem:[#allocation2 + $0x2dc] ss:$24 sps:$4 sm:$0xff]   ;;  %v6713_v2 = vld [vmem:[#allocation2 + $0x2d8] ss:$24 sps:$4 sm:$0xff]   ;;  %v6719_v6 = vld [vmem:[#allocation2 + $0x30c] ss:$24 sps:$4 sm:$0xff]  }
  0x85   :  { %2357 = vmatpush1.bf16.msra.mxu1 %v6653_v23  ;;  %2019 = vmatprep.subr.bf16.mxu0 %v6654_v24  ;;  %v109_v4 = vld [vmem:[%s8877_s0 + $0x30] sm:$0xff]  ;;  %v6716_v5 = vld [vmem:[#allocation2 + $0x304] ss:$24 sps:$4 sm:$0xff]   ;;  %v6714_v7 = vld [vmem:[#allocation2 + $0x300] ss:$24 sps:$4 sm:$0xff]  }
  0x86   :  { %2358 = vmatprep.subr.bf16.mxu1 %v6656_v25  ;;  %v7683_v8 = vpack.c.bf16 %v109_v4, %v103_v3  ;;  %v6717_v9 = vld [vmem:[#allocation2 + $0x308] ss:$24 sps:$4 sm:$0xff]   ;;  %v122_v11 = vld [vmem:[%s8877_s0 + $0x98] sm:$0xff]  ;;  %v6722_v12 = vld [vmem:[#allocation2 + $0x334] ss:$24 sps:$4 sm:$0xff]  }
  0x87   :  { %v116_v10 = vld [vmem:[%s8877_s0 + $0x68] sm:$0xff]  ;;  %v6725_v13 = vld [vmem:[#allocation2 + $0x33c] ss:$24 sps:$4 sm:$0xff]   ;;  %v6723_v16 = vld [vmem:[#allocation2 + $0x338] ss:$24 sps:$4 sm:$0xff]  }
  0x88   :  { %2020 = vmatpush1.bf16.msra.mxu0 %v6658_v26  ;;  %v6720_v14 = vld [vmem:[#allocation2 + $0x330] ss:$24 sps:$4 sm:$0xff]   ;;  %v7691_v15 = vpack.c.bf16 %v122_v11, %v116_v10  ;;  %v115_v17 = vld [vmem:[%s8877_s0 + $0x60] sm:$0xff]  ;;  %v134_v25 = vld [vmem:[%s8877_s0 + $0xf8] sm:$0xff] }
  0x89   :  { %2359 = vmatpush1.bf16.msra.mxu1 %v6659_v27  ;;  %2021 = vmatprep.subr.bf16.mxu0 %v6660_v28  ;;  %v121_v18 = vld [vmem:[%s8877_s0 + $0x90] sm:$0xff]  ;;  %v6728_v19 = vld [vmem:[#allocation2 + $0x364] ss:$24 sps:$4 sm:$0xff]   ;;  %v6726_v21 = vld [vmem:[#allocation2 + $0x360] ss:$24 sps:$4 sm:$0xff]  }
  0x8a   :  { %2360 = vmatprep.subr.bf16.mxu1 %v6662_v29  ;;  %v6731_v20 = vld [vmem:[#allocation2 + $0x36c] ss:$24 sps:$4 sm:$0xff]   ;;  %v6729_v22 = vld [vmem:[#allocation2 + $0x368] ss:$24 sps:$4 sm:$0xff]   ;;  %v7703_v23 = vpack.c.bf16 %v121_v18, %v115_v17  ;;  %v6737_v27 = vld [vmem:[#allocation2 + $0x39c] ss:$24 sps:$4 sm:$0xff]  }
  0x8b   :  { %v128_v24 = vld [vmem:[%s8877_s0 + $0xc8] sm:$0xff]  ;;  %v145_v46 = vld [vmem:[%s8877_s0 + $0x150] sm:$0xff]  ;;  %v6750_v49 = vld [vmem:[#allocation2 + $0x420] ss:$24 sps:$4 sm:$0xff]  }
  0x8c   :  { %2022 = vmatpush1.bf16.msra.mxu0 %v6664_v30  ;;  %v6734_v26 = vld [vmem:[#allocation2 + $0x394] ss:$24 sps:$4 sm:$0xff]   ;;  %v7711_v28 = vpack.c.bf16 %v134_v25, %v128_v24  ;;  %v6732_v29 = vld [vmem:[#allocation2 + $0x390] ss:$24 sps:$4 sm:$0xff]   ;;  %v6762_v3 = vld [vmem:[#allocation2 + $0x480] ss:$24 sps:$4 sm:$0xff]  }
  0x8d   :  { %2361 = vmatpush1.bf16.msra.mxu1 %v6665_v31  ;;  %2023 = vmatprep.subr.bf16.mxu0 %v6666_v32  ;;  %v6735_v30 = vld [vmem:[#allocation2 + $0x398] ss:$24 sps:$4 sm:$0xff]   ;;  %v127_v31 = vld [vmem:[%s8877_s0 + $0xc0] sm:$0xff] }
  0x8e   :  { %2362 = vmatprep.subr.bf16.mxu1 %v6668_v33  ;;  %v133_v32 = vld [vmem:[%s8877_s0 + $0xf0] sm:$0xff]  ;;  %v6740_v33 = vld [vmem:[#allocation2 + $0x3c4] ss:$24 sps:$4 sm:$0xff]   ;;  %v6765_v4 = vld [vmem:[#allocation2 + $0x488] ss:$24 sps:$4 sm:$0xff]  }
  0x8f   :  { %v163_v11 = vld [vmem:[%s8877_s0 + $0x1e0] sm:$0xff]  ;;  %v6780_v24 = vld [vmem:[#allocation2 + $0x510] ss:$24 sps:$4 sm:$0xff]  }
  0x90   :  { %2024 = vmatpush1.bf16.msra.mxu0 %v6670_v34  ;;  %v6743_v34 = vld [vmem:[#allocation2 + $0x3cc] ss:$24 sps:$4 sm:$0xff]   ;;  %v6777_v18 = vld [vmem:[#allocation2 + $0x4e8] ss:$24 sps:$4 sm:$0xff]  }
  0x91   :  { %2363 = vmatpush1.bf16.msra.mxu1 %v6671_v35  ;;  %2025 = vmatprep.subr.bf16.mxu0 %v6672_v36  ;;  %v6738_v35 = vld [vmem:[#allocation2 + $0x3c0] ss:$24 sps:$4 sm:$0xff]  }
  0x92   :  { %2364 = vmatprep.subr.bf16.mxu1 %v6674_v37  ;;  %v6741_v36 = vld [vmem:[#allocation2 + $0x3c8] ss:$24 sps:$4 sm:$0xff]   ;;  %v7723_v37 = vpack.c.bf16 %v133_v32, %v127_v31  ;;  %v6791_v31 = vld [vmem:[#allocation2 + $0x54c] ss:$24 sps:$4 sm:$0xff]  }
  0x93   :  { %v6786_v32 = vld [vmem:[#allocation2 + $0x540] ss:$24 sps:$4 sm:$0xff]  }
  0x94   :  { %2026 = vmatpush1.bf16.msra.mxu0 %v6676_v38  ;;  %v140_v38 = vld [vmem:[%s8877_s0 + $0x128] sm:$0xff] }
  0x95   :  { %2365 = vmatpush1.bf16.msra.mxu1 %v6677_v39  ;;  %2027 = vmatprep.subr.bf16.mxu0 %v6678_v40  ;;  %v146_v39 = vld [vmem:[%s8877_s0 + $0x158] sm:$0xff]  ;;  %v6746_v40 = vld [vmem:[#allocation2 + $0x3f4] ss:$24 sps:$4 sm:$0xff]  }
  0x96   :  { %2366 = vmatprep.subr.bf16.mxu1 %v6680_v41  ;;  %v6749_v41 = vld [vmem:[#allocation2 + $0x3fc] ss:$24 sps:$4 sm:$0xff]  }
  0x98   :  { %2028 = vmatpush1.bf16.msra.mxu0 %v6682_v42  ;;  %v6744_v42 = vld [vmem:[#allocation2 + $0x3f0] ss:$24 sps:$4 sm:$0xff]  }
  0x99   :  { %2367 = vmatpush1.bf16.msra.mxu1 %v6683_v43  ;;  %2029 = vmatprep.subr.bf16.mxu0 %v6684_v44  ;;  %v7731_v43 = vpack.c.bf16 %v146_v39, %v140_v38  ;;  %v6747_v44 = vld [vmem:[#allocation2 + $0x3f8] ss:$24 sps:$4 sm:$0xff]   ;;  %v6794_v38 = vld [vmem:[#allocation2 + $0x574] ss:$24 sps:$4 sm:$0xff]  }
  0x9a   :  { %2368 = vmatprep.subr.bf16.mxu1 %v6686_v45  ;;  %v139_v45 = vld [vmem:[%s8877_s0 + $0x120] sm:$0xff]  ;;  %v6797_v39 = vld [vmem:[#allocation2 + $0x57c] ss:$24 sps:$4 sm:$0xff]  }
  0x9c   :  { %2030 = vmatpush1.bf16.msra.mxu0 %v6688_v47  ;;  %v6752_v47 = vld [vmem:[#allocation2 + $0x424] ss:$24 sps:$4 sm:$0xff]  }
  0x9d   :  { %2369 = vmatpush1.bf16.msra.mxu1 %v6689_v48  ;;  %2031 = vmatprep.subr.bf16.mxu0 %v6690_v50  ;;  %v6755_v48 = vld [vmem:[#allocation2 + $0x42c] ss:$24 sps:$4 sm:$0xff]   ;;  %v7743_v50 = vpack.c.bf16 %v145_v46, %v139_v45  ;;  %v193_v45 = vld [vmem:[%s8877_s0 + $0x2d0] sm:$0xff] }
  0x9e   :  { %2370 = vmatprep.subr.bf16.mxu1 %v6692_v52  ;;  %v152_v52 = vld [vmem:[%s8877_s0 + $0x188] sm:$0xff]  ;;  %v6800_v46 = vld [vmem:[#allocation2 + $0x5a4] ss:$24 sps:$4 sm:$0xff]  }
  0xa0   :  { %2032 = vmatpush1.bf16.msra.mxu0 %v6694_v53  ;;  %v158_v53 = vld [vmem:[%s8877_s0 + $0x1b8] sm:$0xff] }
  0xa1   :  { %2371 = vmatpush1.bf16.msra.mxu1 %v6695_v54  ;;  %2033 = vmatprep.subr.bf16.mxu0 %v6696_v55  ;;  %v6753_v54 = vld [vmem:[#allocation2 + $0x428] ss:$24 sps:$4 sm:$0xff]   ;;  %v6758_v55 = vld [vmem:[#allocation2 + $0x454] ss:$24 sps:$4 sm:$0xff]  }
  0xa2   :  { %2372 = vmatprep.subr.bf16.mxu1 %v6698_v56  ;;  %v6761_v56 = vld [vmem:[#allocation2 + $0x45c] ss:$24 sps:$4 sm:$0xff]  }
  0xa4   :  { %2034 = vmatpush1.bf16.msra.mxu0 %v6700_v57  ;;  %v6756_v57 = vld [vmem:[#allocation2 + $0x450] ss:$24 sps:$4 sm:$0xff]  }
  0xa5   :  { %2373 = vmatpush1.bf16.msra.mxu1 %v6701_v58  ;;  %2035 = vmatprep.subr.bf16.mxu0 %v6702_v59  ;;  %v6759_v58 = vld [vmem:[#allocation2 + $0x458] ss:$24 sps:$4 sm:$0xff]   ;;  %v7751_v59 = vpack.c.bf16 %v158_v53, %v152_v52 }
  0xa6   :  { %2374 = vmatprep.subr.bf16.mxu1 %v6704_v60  ;;  %v151_v60 = vld [vmem:[%s8877_s0 + $0x180] sm:$0xff]  ;;  %v106_v53 = vld [vmem:[%s8877_s0 + $0x18] sm:$0xff] }
  0xa8   :  { %2036 = vmatpush1.bf16.msra.mxu0 %v6706_v61  ;;  %v157_v61 = vld [vmem:[%s8877_s0 + $0x1b0] sm:$0xff] }
  0xa9   :  { %2375 = vmatpush1.bf16.msra.mxu1 %v6707_v62  ;;  %2037 = vmatprep.subr.bf16.mxu0 %v6708_v63  ;;  %v6764_v62 = vld [vmem:[#allocation2 + $0x484] ss:$24 sps:$4 sm:$0xff]  }
  0xaa   :  { %2376 = vmatprep.subr.bf16.mxu1 %v6710_v0  ;;  %v6767_v63 = vld [vmem:[#allocation2 + $0x48c] ss:$24 sps:$4 sm:$0xff]   ;;  %v7763_v0 = vpack.c.bf16 %v157_v61, %v151_v60  ;;  %v6807_v60 = vld [vmem:[#allocation2 + $0x5d8] ss:$24 sps:$4 sm:$0xff]  }
  0xab   :  { %v105_v61 = vld [vmem:[%s8877_s0 + $0x10] sm:$0xff] }
  0xac   :  { %2038 = vmatpush1.bf16.msra.mxu0 %v6712_v1  ;;  %v164_v1 = vld [vmem:[%s8877_s0 + $0x1e8] sm:$0xff] }
  0xad   :  { %2377 = vmatpush1.bf16.msra.mxu1 %v6713_v2  ;;  %2120 = vmatprep.subr.bf16.mxu0 %v6716_v5  ;;  %v170_v2 = vld [vmem:[%s8877_s0 + $0x218] sm:$0xff]  ;;  %v6770_v5 = vld [vmem:[#allocation2 + $0x4b4] ss:$24 sps:$4 sm:$0xff]  }
  0xae   :  { %2459 = vmatprep.subr.bf16.mxu1 %v6719_v6  ;;  %v6773_v6 = vld [vmem:[#allocation2 + $0x4bc] ss:$24 sps:$4 sm:$0xff]   ;;  %v7771_v10 = vpack.c.bf16 %v170_v2, %v164_v1  ;;  %v6815_v1 = vld [vmem:[#allocation2 + $0x60c] ss:$24 sps:$4 sm:$0xff]   ;;  %v6810_v2 = vld [vmem:[#allocation2 + $0x600] ss:$24 sps:$4 sm:$0xff]  }
  0xaf   :  { %2040 = vmatmul.mubr.bf16.vlgmr.msra.gmra.mrb[0].mxu0 %v7683_v8 }
  0xb0   :  { %2379 = vmatmul.mubr.bf16.vlgmr.msra.gmra.mrb[0].mxu1 %v7683_v8  ;;  %2121 = vmatpush1.bf16.msra.mxu0 %v6714_v7  ;;  %v6768_v7 = vld [vmem:[#allocation2 + $0x4b0] ss:$24 sps:$4 sm:$0xff]  }
  0xb1   :  { %2460 = vmatpush1.bf16.msra.mxu1 %v6717_v9  ;;  %2122 = vmatprep.subr.bf16.mxu0 %v6722_v12  ;;  %v6771_v9 = vld [vmem:[#allocation2 + $0x4b8] ss:$24 sps:$4 sm:$0xff]  }
  0xb2   :  { %2461 = vmatprep.subr.bf16.mxu1 %v6725_v13  ;;  %2049 = vmatprep.mubr.bf16.mxu0 %v7691_v15  ;;  %v169_v12 = vld [vmem:[%s8877_s0 + $0x210] sm:$0xff]  ;;  %v6776_v13 = vld [vmem:[#allocation2 + $0x4e4] ss:$24 sps:$4 sm:$0xff]  }
  0xb3   :  { %2388 = vmatprep.mubr.bf16.mxu1 %v7691_v15  ;;  %v7783_v17 = vpack.c.bf16 %v169_v12, %v163_v11  ;;  %v6816_v11 = vld [vmem:[#allocation2 + $0x630] ss:$24 sps:$4 sm:$0xff]  }
  0xb4   :  { %2123 = vmatpush1.bf16.msra.mxu0 %v6720_v14  ;;  %v6779_v14 = vld [vmem:[#allocation2 + $0x4ec] ss:$24 sps:$4 sm:$0xff]   ;;  %v6819_v12 = vld [vmem:[#allocation2 + $0x638] ss:$24 sps:$4 sm:$0xff]  }
  0xb5   :  { %2462 = vmatpush1.bf16.msra.mxu1 %v6723_v16  ;;  %2124 = vmatprep.subr.bf16.mxu0 %v6728_v19  ;;  %v6774_v16 = vld [vmem:[#allocation2 + $0x4e0] ss:$24 sps:$4 sm:$0xff]   ;;  %v176_v19 = vld [vmem:[%s8877_s0 + $0x248] sm:$0xff] }
  0xb6   :  { %2463 = vmatprep.subr.bf16.mxu1 %v6731_v20  ;;  %v182_v20 = vld [vmem:[%s8877_s0 + $0x278] sm:$0xff] }
  0xb7   :  { %2050 = vmatmul.mubr.bf16.gmra.mrb[4].mxu0 %v7703_v23  ;;  %v7791_v25 = vpack.c.bf16 %v182_v20, %v176_v19  ;;  %v6827_v19 = vld [vmem:[#allocation2 + $0x66c] ss:$24 sps:$4 sm:$0xff]  }
  0xb8   :  { %2389 = vmatmul.mubr.bf16.gmra.mrb[4].mxu1 %v7703_v23  ;;  %2125 = vmatpush1.bf16.msra.mxu0 %v6726_v21  ;;  %v6782_v21 = vld [vmem:[#allocation2 + $0x514] ss:$24 sps:$4 sm:$0xff]  }
  0xb9   :  { %2464 = vmatpush1.bf16.msra.mxu1 %v6729_v22  ;;  %2126 = vmatprep.subr.bf16.mxu0 %v6734_v26  ;;  %v6785_v22 = vld [vmem:[#allocation2 + $0x51c] ss:$24 sps:$4 sm:$0xff]   ;;  %v6783_v26 = vld [vmem:[#allocation2 + $0x518] ss:$24 sps:$4 sm:$0xff]  }
  0xba   :  { %2465 = vmatprep.subr.bf16.mxu1 %v6737_v27  ;;  %2059 = vmatprep.mubr.bf16.mxu0 %v7711_v28  ;;  %v175_v27 = vld [vmem:[%s8877_s0 + $0x240] sm:$0xff] }
  0xbb   :  { %2398 = vmatprep.mubr.bf16.mxu1 %v7711_v28 }
  0xbc   :  { %2127 = vmatpush1.bf16.msra.mxu0 %v6732_v29  ;;  %v181_v29 = vld [vmem:[%s8877_s0 + $0x270] sm:$0xff] }
  0xbd   :  { %2466 = vmatpush1.bf16.msra.mxu1 %v6735_v30  ;;  %2128 = vmatprep.subr.bf16.mxu0 %v6740_v33  ;;  %v6788_v30 = vld [vmem:[#allocation2 + $0x544] ss:$24 sps:$4 sm:$0xff]   ;;  %v6789_v33 = vld [vmem:[#allocation2 + $0x548] ss:$24 sps:$4 sm:$0xff]  }
  0xbe   :  { %2467 = vmatprep.subr.bf16.mxu1 %v6743_v34  ;;  %v7803_v34 = vpack.c.bf16 %v181_v29, %v175_v27  ;;  %v6830_v27 = vld [vmem:[#allocation2 + $0x694] ss:$24 sps:$4 sm:$0xff]  }
  0xbf   :  { %2060 = vmatmul.mubr.bf16.gmra.mrb[8].mxu0 %v7723_v37  ;;  %v6833_v29 = vld [vmem:[#allocation2 + $0x69c] ss:$24 sps:$4 sm:$0xff]  }
  0xc0   :  { %2399 = vmatmul.mubr.bf16.gmra.mrb[8].mxu1 %v7723_v37  ;;  %2129 = vmatpush1.bf16.msra.mxu0 %v6738_v35  ;;  %v188_v35 = vld [vmem:[%s8877_s0 + $0x2a8] sm:$0xff] }
  0xc1   :  { %2468 = vmatpush1.bf16.msra.mxu1 %v6741_v36  ;;  %2130 = vmatprep.subr.bf16.mxu0 %v6746_v40  ;;  %v194_v36 = vld [vmem:[%s8877_s0 + $0x2d8] sm:$0xff] }
  0xc2   :  { %2469 = vmatprep.subr.bf16.mxu1 %v6749_v41  ;;  %2069 = vmatprep.mubr.bf16.mxu0 %v7731_v43  ;;  %v7811_v40 = vpack.c.bf16 %v194_v36, %v188_v35  ;;  %v6792_v41 = vld [vmem:[#allocation2 + $0x570] ss:$24 sps:$4 sm:$0xff]   ;;  %v135_v35 = vld [vmem:[%s8877_s0 + $0x100] sm:$0xff] }
  0xc3   :  { %2408 = vmatprep.mubr.bf16.mxu1 %v7731_v43  ;;  %v6836_v36 = vld [vmem:[#allocation2 + $0x6c4] ss:$24 sps:$4 sm:$0xff]  }
  0xc4   :  { %2131 = vmatpush1.bf16.msra.mxu0 %v6744_v42  ;;  %v6795_v42 = vld [vmem:[#allocation2 + $0x578] ss:$24 sps:$4 sm:$0xff]  }
  0xc5   :  { %2470 = vmatpush1.bf16.msra.mxu1 %v6747_v44  ;;  %2132 = vmatprep.subr.bf16.mxu0 %v6752_v47  ;;  %v187_v44 = vld [vmem:[%s8877_s0 + $0x2a0] sm:$0xff] }
  0xc6   :  { %2471 = vmatprep.subr.bf16.mxu1 %v6755_v48  ;;  %v6803_v47 = vld [vmem:[#allocation2 + $0x5ac] ss:$24 sps:$4 sm:$0xff]   ;;  %v6798_v48 = vld [vmem:[#allocation2 + $0x5a0] ss:$24 sps:$4 sm:$0xff]   ;;  %v7823_v52 = vpack.c.bf16 %v193_v45, %v187_v44 }
  0xc7   :  { %2070 = vmatmul.mubr.bf16.gmra.mrb[12].mxu0 %v7743_v50  ;;  %v142_v44 = vld [vmem:[%s8877_s0 + $0x138] sm:$0xff]  ;;  %v148_v45 = vld [vmem:[%s8877_s0 + $0x168] sm:$0xff] }
  0xc8   :  { %2409 = vmatmul.mubr.bf16.gmra.mrb[12].mxu1 %v7743_v50  ;;  %2133 = vmatpush1.bf16.msra.mxu0 %v6750_v49  ;;  %v6801_v49 = vld [vmem:[#allocation2 + $0x5a8] ss:$24 sps:$4 sm:$0xff]  }
  0xc9   :  { %2472 = vmatpush1.bf16.msra.mxu1 %v6753_v54  ;;  %2134 = vmatprep.subr.bf16.mxu0 %v6758_v55  ;;  %v112_v54 = vld [vmem:[%s8877_s0 + $0x48] sm:$0xff] }
  0xca   :  { %2473 = vmatprep.subr.bf16.mxu1 %v6761_v56  ;;  %2079 = vmatprep.mubr.bf16.mxu0 %v7751_v59  ;;  %v6806_v55 = vld [vmem:[#allocation2 + $0x5d4] ss:$24 sps:$4 sm:$0xff]  }
  0xcb   :  { %2418 = vmatprep.mubr.bf16.mxu1 %v7751_v59  ;;  %v6809_v56 = vld [vmem:[#allocation2 + $0x5dc] ss:$24 sps:$4 sm:$0xff]  }
  0xcc   :  { %2135 = vmatpush1.bf16.msra.mxu0 %v6756_v57  ;;  %v6804_v57 = vld [vmem:[#allocation2 + $0x5d0] ss:$24 sps:$4 sm:$0xff]  }
  0xcd   :  { %2474 = vmatpush1.bf16.msra.mxu1 %v6759_v58  ;;  %2136 = vmatprep.subr.bf16.mxu0 %v6764_v62  ;;  %v7831_v58 = vpack.c.bf16 %v112_v54, %v106_v53  ;;  %v111_v62 = vld [vmem:[%s8877_s0 + $0x40] sm:$0xff]  ;;  %v6843_v53 = vld [vmem:[#allocation2 + $0x6f8] ss:$24 sps:$4 sm:$0xff]  }
  0xce   :  { %2475 = vmatprep.subr.bf16.mxu1 %v6767_v63  ;;  %v6812_v63 = vld [vmem:[#allocation2 + $0x604] ss:$24 sps:$4 sm:$0xff]   ;;  %v141_v54 = vld [vmem:[%s8877_s0 + $0x130] sm:$0xff] }
  0xcf   :  { %2080 = vmatmul.mubr.bf16.gmra.mrb[16].mxu0 %v7763_v0 }
  0xd0   :  { %2419 = vmatmul.mubr.bf16.gmra.mrb[16].mxu1 %v7763_v0  ;;  %2137 = vmatpush1.bf16.msra.mxu0 %v6762_v3  ;;  %v7843_v3 = vpack.c.bf16 %v111_v62, %v105_v61  ;;  %v154_v62 = vld [vmem:[%s8877_s0 + $0x198] sm:$0xff] }
  0xd1   :  { %2476 = vmatpush1.bf16.msra.mxu1 %v6765_v4  ;;  %2138 = vmatprep.subr.bf16.mxu0 %v6770_v5  ;;  %v118_v4 = vld [vmem:[%s8877_s0 + $0x78] sm:$0xff]  ;;  %v124_v5 = vld [vmem:[%s8877_s0 + $0xa8] sm:$0xff] }
  0xd2   :  { %2477 = vmatprep.subr.bf16.mxu1 %v6773_v6  ;;  %2089 = vmatprep.mubr.bf16.mxu0 %v7771_v10  ;;  %v6813_v6 = vld [vmem:[#allocation2 + $0x608] ss:$24 sps:$4 sm:$0xff]  }
  0xd3   :  { %2428 = vmatprep.mubr.bf16.mxu1 %v7771_v10 }
  0xd4   :  { %2139 = vmatpush1.bf16.msra.mxu0 %v6768_v7  ;;  %v6818_v7 = vld [vmem:[#allocation2 + $0x634] ss:$24 sps:$4 sm:$0xff]  }
  0xd5   :  { %2478 = vmatpush1.bf16.msra.mxu1 %v6771_v9  ;;  %2140 = vmatprep.subr.bf16.mxu0 %v6776_v13  ;;  %v6821_v9 = vld [vmem:[#allocation2 + $0x63c] ss:$24 sps:$4 sm:$0xff]   ;;  %v7851_v13 = vpack.c.bf16 %v124_v5, %v118_v4  ;;  %v6852_v5 = vld [vmem:[#allocation2 + $0x750] ss:$24 sps:$4 sm:$0xff]  }
  0xd6   :  { %2479 = vmatprep.subr.bf16.mxu1 %v6779_v14  ;;  %v117_v14 = vld [vmem:[%s8877_s0 + $0x70] sm:$0xff] }
  0xd7   :  { %2090 = vmatmul.mubr.bf16.gmra.mrb[20].mxu0 %v7783_v17  ;;  %v6857_v4 = vld [vmem:[#allocation2 + $0x75c] ss:$24 sps:$4 sm:$0xff]  }
  0xd8   :  { %2429 = vmatmul.mubr.bf16.gmra.mrb[20].mxu1 %v7783_v17  ;;  %2141 = vmatpush1.bf16.msra.mxu0 %v6774_v16  ;;  %v123_v16 = vld [vmem:[%s8877_s0 + $0xa0] sm:$0xff] }
  0xd9   :  { %2480 = vmatpush1.bf16.msra.mxu1 %v6777_v18  ;;  %2142 = vmatprep.subr.bf16.mxu0 %v6782_v21  ;;  %v6824_v18 = vld [vmem:[#allocation2 + $0x664] ss:$24 sps:$4 sm:$0xff]   ;;  %v7863_v20 = vpack.c.bf16 %v123_v16, %v117_v14  ;;  %v6858_v16 = vld [vmem:[#allocation2 + $0x780] ss:$24 sps:$4 sm:$0xff]  }
  0xda   :  { %2481 = vmatprep.subr.bf16.mxu1 %v6785_v22  ;;  %2099 = vmatprep.mubr.bf16.mxu0 %v7791_v25  ;;  %v130_v21 = vld [vmem:[%s8877_s0 + $0xd8] sm:$0xff]  ;;  %v136_v22 = vld [vmem:[%s8877_s0 + $0x108] sm:$0xff] }
  0xdb   :  { %2438 = vmatprep.mubr.bf16.mxu1 %v7791_v25  ;;  %v6863_v14 = vld [vmem:[#allocation2 + $0x78c] ss:$24 sps:$4 sm:$0xff]  }
  0xdc   :  { %2143 = vmatpush1.bf16.msra.mxu0 %v6780_v24  ;;  %v6822_v24 = vld [vmem:[#allocation2 + $0x660] ss:$24 sps:$4 sm:$0xff]  }
  0xdd   :  { %2482 = vmatpush1.bf16.msra.mxu1 %v6783_v26  ;;  %2144 = vmatprep.subr.bf16.mxu0 %v6788_v30  ;;  %v6825_v26 = vld [vmem:[#allocation2 + $0x668] ss:$24 sps:$4 sm:$0xff]  }
  0xde   :  { %2483 = vmatprep.subr.bf16.mxu1 %v6791_v31  ;;  %v6828_v30 = vld [vmem:[#allocation2 + $0x690] ss:$24 sps:$4 sm:$0xff]  }
  0xdf   :  { %2100 = vmatmul.mubr.bf16.gmra.mrb[24].mxu0 %v7803_v34  ;;  %v6831_v31 = vld [vmem:[#allocation2 + $0x698] ss:$24 sps:$4 sm:$0xff]  }
  0xe0   :  { %2439 = vmatmul.mubr.bf16.gmra.mrb[24].mxu1 %v7803_v34  ;;  %2145 = vmatpush1.bf16.msra.mxu0 %v6786_v32  ;;  %v7871_v32 = vpack.c.bf16 %v136_v22, %v130_v21  ;;  %v172_v21 = vld [vmem:[%s8877_s0 + $0x228] sm:$0xff] }
  0xe1   :  { %2484 = vmatpush1.bf16.msra.mxu1 %v6789_v33  ;;  %2146 = vmatprep.subr.bf16.mxu0 %v6794_v38  ;;  %v129_v33 = vld [vmem:[%s8877_s0 + $0xd0] sm:$0xff]  ;;  %v6839_v38 = vld [vmem:[#allocation2 + $0x6cc] ss:$24 sps:$4 sm:$0xff]   ;;  %v6861_v22 = vld [vmem:[#allocation2 + $0x788] ss:$24 sps:$4 sm:$0xff]  }
  0xe2   :  { %2485 = vmatprep.subr.bf16.mxu1 %v6797_v39  ;;  %2109 = vmatprep.mubr.bf16.mxu0 %v7811_v40  ;;  %v6834_v39 = vld [vmem:[#allocation2 + $0x6c0] ss:$24 sps:$4 sm:$0xff]  }
  0xe3   :  { %2448 = vmatprep.mubr.bf16.mxu1 %v7811_v40 }
  0xe4   :  { %2147 = vmatpush1.bf16.msra.mxu0 %v6792_v41  ;;  %v7883_v41 = vpack.c.bf16 %v135_v35, %v129_v33  ;;  %v171_v33 = vld [vmem:[%s8877_s0 + $0x220] sm:$0xff] }
  0xe5   :  { %2486 = vmatpush1.bf16.msra.mxu1 %v6795_v42  ;;  %2148 = vmatprep.subr.bf16.mxu0 %v6800_v46  ;;  %v6837_v42 = vld [vmem:[#allocation2 + $0x6c8] ss:$24 sps:$4 sm:$0xff]   ;;  %v6842_v46 = vld [vmem:[#allocation2 + $0x6f4] ss:$24 sps:$4 sm:$0xff]   ;;  %v6872_v35 = vld [vmem:[#allocation2 + $0x7e4] ss:$24 sps:$4 sm:$0xff]  }
  0xe6   :  { %2487 = vmatprep.subr.bf16.mxu1 %v6803_v47  ;;  %v6845_v47 = vld [vmem:[#allocation2 + $0x6fc] ss:$24 sps:$4 sm:$0xff]  }
  0xe7   :  { %2110 = vmatmul.mubr.bf16.gmra.mrb[28].mxu0 %v7823_v52 }
  0xe8   :  { %2449 = vmatmul.mubr.bf16.gmra.mrb[28].mxu1 %v7823_v52  ;;  %2149 = vmatpush1.bf16.msra.mxu0 %v6798_v48  ;;  %v6840_v48 = vld [vmem:[#allocation2 + $0x6f0] ss:$24 sps:$4 sm:$0xff]  }
  0xe9   :  { %2488 = vmatpush1.bf16.msra.mxu1 %v6801_v49  ;;  %2150 = vmatprep.subr.bf16.mxu0 %v6806_v55  ;;  %v7891_v49 = vpack.c.bf16 %v148_v45, %v142_v44  ;;  %v147_v55 = vld [vmem:[%s8877_s0 + $0x160] sm:$0xff]  ;;  %v184_v44 = vld [vmem:[%s8877_s0 + $0x288] sm:$0xff] }
  0xea   :  { %2489 = vmatprep.subr.bf16.mxu1 %v6809_v56  ;;  %2152 = vmatprep.mubr.bf16.mxu0 %v7831_v58  ;;  %v6848_v56 = vld [vmem:[#allocation2 + $0x724] ss:$24 sps:$4 sm:$0xff]   ;;  %v7903_v61 = vpack.c.bf16 %v147_v55, %v141_v54  ;;  %v6873_v45 = vld [vmem:[#allocation2 + $0x7e8] ss:$24 sps:$4 sm:$0xff]   ;;  %v6879_v54 = vld [vmem:[#allocation2 + $0x818] ss:$24 sps:$4 sm:$0xff]  }
  0xeb   :  { %2491 = vmatprep.mubr.bf16.mxu1 %v7831_v58  ;;  %v177_v55 = vld [vmem:[%s8877_s0 + $0x250] sm:$0xff] }
  0xec   :  { %2151 = vmatpush1.bf16.msra.mxu0 %v6804_v57  ;;  %v6851_v57 = vld [vmem:[#allocation2 + $0x72c] ss:$24 sps:$4 sm:$0xff]  }
  0xed   :  { %2490 = vmatpush1.bf16.msra.mxu1 %v6807_v60  ;;  %2233 = vmatprep.subr.bf16.mxu0 %v6812_v63  ;;  %v6846_v60 = vld [vmem:[#allocation2 + $0x720] ss:$24 sps:$4 sm:$0xff]   ;;  %v160_v63 = vld [vmem:[%s8877_s0 + $0x1c8] sm:$0xff] }
  0xee   :  { %2572 = vmatprep.subr.bf16.mxu1 %v6815_v1  ;;  %v6849_v1 = vld [vmem:[#allocation2 + $0x728] ss:$24 sps:$4 sm:$0xff]  }
  0xef   :  { %2153 = vmatmul.mubr.bf16.vlgmr.msra.gmra.mrb[0].mxu0 %v7843_v3 }
  0xf0   :  { %2492 = vmatmul.mubr.bf16.vlgmr.msra.gmra.mrb[0].mxu1 %v7843_v3  ;;  %2234 = vmatpush1.bf16.msra.mxu0 %v6810_v2  ;;  %v6854_v2 = vld [vmem:[#allocation2 + $0x754] ss:$24 sps:$4 sm:$0xff]  }
  0xf1   :  { %2573 = vmatpush1.bf16.msra.mxu1 %v6813_v6  ;;  %2235 = vmatprep.subr.bf16.mxu0 %v6818_v7  ;;  %v7911_v6 = vpack.c.bf16 %v160_v63, %v154_v62  ;;  %v6855_v7 = vld [vmem:[#allocation2 + $0x758] ss:$24 sps:$4 sm:$0xff]  }
  0xf2   :  { %2574 = vmatprep.subr.bf16.mxu1 %v6821_v9  ;;  %2162 = vmatprep.mubr.bf16.mxu0 %v7851_v13  ;;  %v153_v9 = vld [vmem:[%s8877_s0 + $0x190] sm:$0xff]  ;;  %v6882_v62 = vld [vmem:[#allocation2 + $0x840] ss:$24 sps:$4 sm:$0xff]  }
  0xf3   :  { %2501 = vmatprep.mubr.bf16.mxu1 %v7851_v13 }
  0xf4   :  { %2236 = vmatpush1.bf16.msra.mxu0 %v6816_v11  ;;  %v159_v11 = vld [vmem:[%s8877_s0 + $0x1c0] sm:$0xff] }
  0xf5   :  { %2575 = vmatpush1.bf16.msra.mxu1 %v6819_v12  ;;  %2237 = vmatprep.subr.bf16.mxu0 %v6824_v18  ;;  %v6860_v12 = vld [vmem:[#allocation2 + $0x784] ss:$24 sps:$4 sm:$0xff]   ;;  %v7923_v18 = vpack.c.bf16 %v159_v11, %v153_v9  ;;  %v6888_v9 = vld [vmem:[#allocation2 + $0x870] ss:$24 sps:$4 sm:$0xff]  }
  0xf6   :  { %2576 = vmatprep.subr.bf16.mxu1 %v6827_v19  ;;  %v166_v19 = vld [vmem:[%s8877_s0 + $0x1f8] sm:$0xff] }
  0xf7   :  { %2163 = vmatmul.mubr.bf16.gmra.mrb[4].mxu0 %v7863_v20  ;;  %v6891_v11 = vld [vmem:[#allocation2 + $0x878] ss:$24 sps:$4 sm:$0xff]  }
  0xf8   :  { %2502 = vmatmul.mubr.bf16.gmra.mrb[4].mxu1 %v7863_v20  ;;  %2238 = vmatpush1.bf16.msra.mxu0 %v6822_v24  ;;  %v6866_v24 = vld [vmem:[#allocation2 + $0x7b4] ss:$24 sps:$4 sm:$0xff]  }
  0xf9   :  { %2577 = vmatpush1.bf16.msra.mxu1 %v6825_v26  ;;  %2239 = vmatprep.subr.bf16.mxu0 %v6830_v27  ;;  %v6869_v26 = vld [vmem:[#allocation2 + $0x7bc] ss:$24 sps:$4 sm:$0xff]   ;;  %v6864_v27 = vld [vmem:[#allocation2 + $0x7b0] ss:$24 sps:$4 sm:$0xff]  }
  0xfa   :  { %2578 = vmatprep.subr.bf16.mxu1 %v6833_v29  ;;  %2172 = vmatprep.mubr.bf16.mxu0 %v7871_v32  ;;  %v7931_v29 = vpack.c.bf16 %v172_v21, %v166_v19  ;;  %v6896_v19 = vld [vmem:[#allocation2 + $0x8a4] ss:$24 sps:$4 sm:$0xff]  }
  0xfb   :  { %2511 = vmatprep.mubr.bf16.mxu1 %v7871_v32  ;;  %v6899_v21 = vld [vmem:[#allocation2 + $0x8ac] ss:$24 sps:$4 sm:$0xff]  }
  0xfc   :  { %2240 = vmatpush1.bf16.msra.mxu0 %v6828_v30  ;;  %v6867_v30 = vld [vmem:[#allocation2 + $0x7b8] ss:$24 sps:$4 sm:$0xff]  }
  0xfd   :  { %2579 = vmatpush1.bf16.msra.mxu1 %v6831_v31  ;;  %2241 = vmatprep.subr.bf16.mxu0 %v6836_v36  ;;  %v165_v31 = vld [vmem:[%s8877_s0 + $0x1f0] sm:$0xff]  ;;  %v6875_v36 = vld [vmem:[#allocation2 + $0x7ec] ss:$24 sps:$4 sm:$0xff]  }
  0xfe   :  { %2580 = vmatprep.subr.bf16.mxu1 %v6839_v38  ;;  %v6870_v38 = vld [vmem:[#allocation2 + $0x7e0] ss:$24 sps:$4 sm:$0xff]  }
  0xff   :  { %2173 = vmatmul.mubr.bf16.gmra.mrb[8].mxu0 %v7883_v41 }
 0x100   :  { %2512 = vmatmul.mubr.bf16.gmra.mrb[8].mxu1 %v7883_v41  ;;  %2242 = vmatpush1.bf16.msra.mxu0 %v6834_v39  ;;  %v7943_v39 = vpack.c.bf16 %v171_v33, %v165_v31  ;;  %v6902_v31 = vld [vmem:[#allocation2 + $0x8d4] ss:$24 sps:$4 sm:$0xff]  }
 0x101   :  { %2581 = vmatpush1.bf16.msra.mxu1 %v6837_v42  ;;  %2243 = vmatprep.subr.bf16.mxu0 %v6842_v46  ;;  %v178_v42 = vld [vmem:[%s8877_s0 + $0x258] sm:$0xff]  ;;  %v6878_v46 = vld [vmem:[#allocation2 + $0x814] ss:$24 sps:$4 sm:$0xff]  }
 0x102   :  { %2582 = vmatprep.subr.bf16.mxu1 %v6845_v47  ;;  %2182 = vmatprep.mubr.bf16.mxu0 %v7891_v49  ;;  %v6881_v47 = vld [vmem:[#allocation2 + $0x81c] ss:$24 sps:$4 sm:$0xff]  }
 0x103   :  { %2521 = vmatprep.mubr.bf16.mxu1 %v7891_v49  ;;  %v6905_v33 = vld [vmem:[#allocation2 + $0x8dc] ss:$24 sps:$4 sm:$0xff]  }
 0x104   :  { %2244 = vmatpush1.bf16.msra.mxu0 %v6840_v48  ;;  %v6876_v48 = vld [vmem:[#allocation2 + $0x810] ss:$24 sps:$4 sm:$0xff]  }
 0x105   :  { %2583 = vmatpush1.bf16.msra.mxu1 %v6843_v53  ;;  %2245 = vmatprep.subr.bf16.mxu0 %v6848_v56  ;;  %v7951_v53 = vpack.c.bf16 %v184_v44, %v178_v42  ;;  %v183_v56 = vld [vmem:[%s8877_s0 + $0x280] sm:$0xff]  ;;  %v113_v44 = vld [vmem:[%s8877_s0 + $0x50] sm:$0xff] }
 0x106   :  { %2584 = vmatprep.subr.bf16.mxu1 %v6851_v57  ;;  %v6884_v57 = vld [vmem:[#allocation2 + $0x844] ss:$24 sps:$4 sm:$0xff]   ;;  %v7963_v63 = vpack.c.bf16 %v183_v56, %v177_v55 }
 0x107   :  { %2183 = vmatmul.mubr.bf16.gmra.mrb[12].mxu0 %v7903_v61  ;;  %v107_v42 = vld [vmem:[%s8877_s0 + $0x20] sm:$0xff] }
 0x108   :  { %2522 = vmatmul.mubr.bf16.gmra.mrb[12].mxu1 %v7903_v61  ;;  %2246 = vmatpush1.bf16.msra.mxu0 %v6846_v60  ;;  %v6887_v60 = vld [vmem:[#allocation2 + $0x84c] ss:$24 sps:$4 sm:$0xff]  }
 0x109   :  { %2585 = vmatpush1.bf16.msra.mxu1 %v6849_v1  ;;  %2247 = vmatprep.subr.bf16.mxu0 %v6854_v2  ;;  %v190_v1 = vld [vmem:[%s8877_s0 + $0x2b8] sm:$0xff]  ;;  %v196_v2 = vld [vmem:[%s8877_s0 + $0x2e8] sm:$0xff] }
 0x10a   :  { %2586 = vmatprep.subr.bf16.mxu1 %v6857_v4  ;;  %2192 = vmatprep.mubr.bf16.mxu0 %v7911_v6  ;;  %v6885_v4 = vld [vmem:[#allocation2 + $0x848] ss:$24 sps:$4 sm:$0xff]   ;;  %v6911_v56 = vld [vmem:[#allocation2 + $0x44] ss:$24 sps:$4 sm:$0xff]  }
 0x10b   :  { %2531 = vmatprep.mubr.bf16.mxu1 %v7911_v6 }
 0x10c   :  { %2248 = vmatpush1.bf16.msra.mxu0 %v6852_v5  ;;  %v6890_v5 = vld [vmem:[#allocation2 + $0x874] ss:$24 sps:$4 sm:$0xff]  }
 0x10d   :  { %2587 = vmatpush1.bf16.msra.mxu1 %v6855_v7  ;;  %2249 = vmatprep.subr.bf16.mxu0 %v6860_v12  ;;  %v6893_v7 = vld [vmem:[#allocation2 + $0x87c] ss:$24 sps:$4 sm:$0xff]   ;;  %v7971_v12 = vpack.c.bf16 %v196_v2, %v190_v1  ;;  %v132_v2 = vld [vmem:[%s8877_s0 + $0xe8] sm:$0xff] }
 0x10e   :  { %2588 = vmatprep.subr.bf16.mxu1 %v6863_v14  ;;  %v189_v14 = vld [vmem:[%s8877_s0 + $0x2b0] sm:$0xff] }
 0x10f   :  { %2193 = vmatmul.mubr.bf16.gmra.mrb[16].mxu0 %v7923_v18  ;;  %v6914_v1 = vld [vmem:[#allocation2 + $0x74] ss:$24 sps:$4 sm:$0xff]  }
 0x110   :  { %2532 = vmatmul.mubr.bf16.gmra.mrb[16].mxu1 %v7923_v18  ;;  %2250 = vmatpush1.bf16.msra.mxu0 %v6858_v16  ;;  %v195_v16 = vld [vmem:[%s8877_s0 + $0x2e0] sm:$0xff] }
 0x111   :  { %2589 = vmatpush1.bf16.msra.mxu1 %v6861_v22  ;;  %2251 = vmatprep.subr.bf16.mxu0 %v6866_v24  ;;  %v6894_v22 = vld [vmem:[#allocation2 + $0x8a0] ss:$24 sps:$4 sm:$0xff]  }
 0x112   :  { %2590 = vmatprep.subr.bf16.mxu1 %v6869_v26  ;;  %2202 = vmatprep.mubr.bf16.mxu0 %v7931_v29  ;;  %v6897_v24 = vld [vmem:[#allocation2 + $0x8a8] ss:$24 sps:$4 sm:$0xff]   ;;  %v7983_v26 = vpack.c.bf16 %v195_v16, %v189_v14 }
 0x113   :  { %2541 = vmatprep.mubr.bf16.mxu1 %v7931_v29  ;;  %v6915_v14 = vld [vmem:[#allocation2 + $0xa0] ss:$24 sps:$4 sm:$0xff]  }
 0x114   :  { %2252 = vmatpush1.bf16.msra.mxu0 %v6864_v27  ;;  %v108_v27 = vld [vmem:[%s8877_s0 + $0x28] sm:$0xff]  ;;  %v131_v16 = vld [vmem:[%s8877_s0 + $0xe0] sm:$0xff] }
 0x115   :  { %2591 = vmatpush1.bf16.msra.mxu1 %v6867_v30  ;;  %2253 = vmatprep.subr.bf16.mxu0 %v6872_v35  ;;  %v114_v30 = vld [vmem:[%s8877_s0 + $0x58] sm:$0xff]  ;;  %v6900_v35 = vld [vmem:[#allocation2 + $0x8d0] ss:$24 sps:$4 sm:$0xff]  }
 0x116   :  { %2592 = vmatprep.subr.bf16.mxu1 %v6875_v36  ;;  %v6903_v36 = vld [vmem:[#allocation2 + $0x8d8] ss:$24 sps:$4 sm:$0xff]  }
 0x117   :  { %2203 = vmatmul.mubr.bf16.gmra.mrb[20].mxu0 %v7943_v39 }
 0x118   :  { %2542 = vmatmul.mubr.bf16.gmra.mrb[20].mxu1 %v7943_v39  ;;  %2254 = vmatpush1.bf16.msra.mxu0 %v6870_v38  ;;  %v7991_v38 = vpack.c.bf16 %v114_v30, %v108_v27  ;;  %v6918_v30 = vld [vmem:[#allocation2 + $0xd0] ss:$24 sps:$4 sm:$0xff]  }
 0x119   :  { %2593 = vmatpush1.bf16.msra.mxu1 %v6873_v45  ;;  %2255 = vmatprep.subr.bf16.mxu0 %v6878_v46  ;;  %v6908_v45 = vld [vmem:[#allocation2 + $0x14] ss:$24 sps:$4 sm:$0xff]  }
 0x11a   :  { %2594 = vmatprep.subr.bf16.mxu1 %v6881_v47  ;;  %2212 = vmatprep.mubr.bf16.mxu0 %v7951_v53  ;;  %v120_v46 = vld [vmem:[%s8877_s0 + $0x88] sm:$0xff]  ;;  %v126_v47 = vld [vmem:[%s8877_s0 + $0xb8] sm:$0xff] }
 0x11b   :  { %2551 = vmatprep.mubr.bf16.mxu1 %v7951_v53  ;;  %v8011_v55 = vpack.c.bf16 %v126_v47, %v120_v46  ;;  %v162_v46 = vld [vmem:[%s8877_s0 + $0x1d8] sm:$0xff]  ;;  %v6924_v47 = vld [vmem:[#allocation2 + $0x130] ss:$24 sps:$4 sm:$0xff]  }
 0x11c   :  { %2256 = vmatpush1.bf16.msra.mxu0 %v6876_v48  ;;  %v8009_v48 = vpack.c.bf16 %v113_v44, %v107_v42  ;;  %v149_v42 = vld [vmem:[%s8877_s0 + $0x170] sm:$0xff] }
 0x11d   :  { %2595 = vmatpush1.bf16.msra.mxu1 %v6879_v54  ;;  %2257 = vmatprep.subr.bf16.mxu0 %v6884_v57  ;;  %v6906_v54 = vld [vmem:[#allocation2 + $0x10] ss:$24 sps:$4 sm:$0xff]   ;;  %v6909_v57 = vld [vmem:[#allocation2 + $0x40] ss:$24 sps:$4 sm:$0xff]   ;;  %v6926_v44 = vld [vmem:[#allocation2 + $0x134] ss:$24 sps:$4 sm:$0xff]  }
 0x11e   :  { %2596 = vmatprep.subr.bf16.mxu1 %v6887_v60  ;;  %v119_v60 = vld [vmem:[%s8877_s0 + $0x80] sm:$0xff] }
 0x11f   :  { %2213 = vmatmul.mubr.bf16.gmra.mrb[24].mxu0 %v7963_v63 }
 0x120   :  { %2552 = vmatmul.mubr.bf16.gmra.mrb[24].mxu1 %v7963_v63  ;;  %2258 = vmatpush1.bf16.msra.mxu0 %v6882_v62  ;;  %v125_v62 = vld [vmem:[%s8877_s0 + $0xb0] sm:$0xff] }
 0x121   :  { %2597 = vmatpush1.bf16.msra.mxu1 %v6885_v4  ;;  %2259 = vmatprep.subr.bf16.mxu0 %v6890_v5  ;;  %v138_v4 = vld [vmem:[%s8877_s0 + $0x118] sm:$0xff]  ;;  %v8029_v5 = vpack.c.bf16 %v125_v62, %v119_v60  ;;  %v155_v62 = vld [vmem:[%s8877_s0 + $0x1a0] sm:$0xff] }
 0x122   :  { %2598 = vmatprep.subr.bf16.mxu1 %v6893_v7  ;;  %2222 = vmatprep.mubr.bf16.mxu0 %v7971_v12  ;;  %v6912_v7 = vld [vmem:[#allocation2 + $0x70] ss:$24 sps:$4 sm:$0xff]   ;;  %v6927_v60 = vld [vmem:[#allocation2 + $0x160] ss:$24 sps:$4 sm:$0xff]  }
 0x123   :  { %2561 = vmatprep.mubr.bf16.mxu1 %v7971_v12 }
 0x124   :  { %2260 = vmatpush1.bf16.msra.mxu0 %v6888_v9  ;;  %v8031_v9 = vpack.c.bf16 %v138_v4, %v132_v2  ;;  %v6932_v2 = vld [vmem:[#allocation2 + $0x194] ss:$24 sps:$4 sm:$0xff]  }
 0x125   :  { %2599 = vmatpush1.bf16.msra.mxu1 %v6891_v11  ;;  %2261 = vmatprep.subr.bf16.mxu0 %v6896_v19  ;;  %v6917_v11 = vld [vmem:[#allocation2 + $0xa4] ss:$24 sps:$4 sm:$0xff]   ;;  %v137_v19 = vld [vmem:[%s8877_s0 + $0x110] sm:$0xff]  ;;  %v168_v4 = vld [vmem:[%s8877_s0 + $0x208] sm:$0xff] }
 0x126   :  { %2600 = vmatprep.subr.bf16.mxu1 %v6899_v21  ;;  %v6920_v21 = vld [vmem:[#allocation2 + $0xd4] ss:$24 sps:$4 sm:$0xff]   ;;  %v8049_v27 = vpack.c.bf16 %v137_v19, %v131_v16  ;;  %v6930_v16 = vld [vmem:[#allocation2 + $0x190] ss:$24 sps:$4 sm:$0xff]  }
 0x127   :  { %2223 = vmatmul.mubr.bf16.gmra.mrb[28].mxu0 %v7983_v26 }
 0x128   :  { %2562 = vmatmul.mubr.bf16.gmra.mrb[28].mxu1 %v7983_v26  ;;  %2262 = vmatpush1.bf16.msra.mxu0 %v6894_v22  ;;  %v144_v22 = vld [vmem:[%s8877_s0 + $0x148] sm:$0xff] }
 0x129   :  { %2601 = vmatpush1.bf16.msra.mxu1 %v6897_v24  ;;  %2263 = vmatprep.subr.bf16.mxu0 %v6902_v31  ;;  %v150_v24 = vld [vmem:[%s8877_s0 + $0x178] sm:$0xff] }
 0x12a   :  { %2602 = vmatprep.subr.bf16.mxu1 %v6905_v33  ;;  %2265 = vmatprep.mubr.bf16.mxu0 %v7991_v38  ;;  %v8051_v31 = vpack.c.bf16 %v150_v24, %v144_v22  ;;  %v6923_v33 = vld [vmem:[#allocation2 + $0x104] ss:$24 sps:$4 sm:$0xff]   ;;  %v6933_v24 = vld [vmem:[#allocation2 + $0x1c0] ss:$24 sps:$4 sm:$0xff]  }
 0x12b   :  { %2604 = vmatprep.mubr.bf16.mxu1 %v7991_v38  ;;  %v6935_v22 = vld [vmem:[#allocation2 + $0x1c4] ss:$24 sps:$4 sm:$0xff]  }
 0x12c   :  { %2264 = vmatpush1.bf16.msra.mxu0 %v6900_v35  ;;  %v6921_v35 = vld [vmem:[#allocation2 + $0x100] ss:$24 sps:$4 sm:$0xff]  }
 0x12d   :  { %2603 = vmatpush1.bf16.msra.mxu1 %v6903_v36  ;;  %2685 = vmatprep.subr.bf16.mxu0 %v6908_v45  ;;  %v143_v36 = vld [vmem:[%s8877_s0 + $0x140] sm:$0xff]  ;;  %v156_v45 = vld [vmem:[%s8877_s0 + $0x1a8] sm:$0xff] }
 0x12f   :  { %2266 = vmatmul.mubr.bf16.vlgmr.msra.gmra.mrb[0].mxu0 %v8009_v48 }
 0x130   :  { %2605 = vmatmul.mubr.bf16.vlgmr.msra.gmra.mrb[0].mxu1 %v8009_v48  ;;  %2686 = vmatpush1.bf16.msra.mxu0 %v6906_v54  ;;  %v8069_v54 = vpack.c.bf16 %v149_v42, %v143_v36  ;;  %v7034_v36 = vld [vmem:[#allocation6 + $0x24] ss:$16 sps:$4 sm:$0xff]  }
 0x131   :  { %2275 = vmatprep.mubr.bf16.mxu0 %v8011_v55  ;;  %2687 = vmatprep.subr.bf16.mxu0 %v6911_v56  ;;  %v8071_v56 = vpack.c.bf16 %v162_v46, %v156_v45  ;;  %v6938_v42 = vld [vmem:[#allocation2 + $0x1f4] ss:$24 sps:$4 sm:$0xff]   ;;  %v186_v45 = vld [vmem:[%s8877_s0 + $0x298] sm:$0xff] }
 0x132   :  { %2614 = vmatprep.mubr.bf16.mxu1 %v8011_v55  ;;  %v7040_v46 = vld [vmem:[#allocation6 + $0x44] ss:$16 sps:$4 sm:$0xff]  }
 0x134   :  { %2688 = vmatpush1.bf16.msra.mxu0 %v6909_v57  ;;  %v6929_v57 = vld [vmem:[#allocation2 + $0x164] ss:$24 sps:$4 sm:$0xff]  }
 0x135   :  { %2689 = vmatprep.subr.bf16.mxu0 %v6914_v1  ;;  %v161_v1 = vld [vmem:[%s8877_s0 + $0x1d0] sm:$0xff] }
 0x136   :  { %v8089_v19 = vpack.c.bf16 %v161_v1, %v155_v62  ;;  %v6941_v62 = vld [vmem:[#allocation2 + $0x224] ss:$24 sps:$4 sm:$0xff]   ;;  %v6939_v1 = vld [vmem:[#allocation2 + $0x220] ss:$24 sps:$4 sm:$0xff]  }
 0x137   :  { %2276 = vmatmul.mubr.bf16.gmra.mrb[4].mxu0 %v8029_v5 }
 0x138   :  { %2615 = vmatmul.mubr.bf16.gmra.mrb[4].mxu1 %v8029_v5  ;;  %2690 = vmatpush1.bf16.msra.mxu0 %v6912_v7  ;;  %v174_v7 = vld [vmem:[%s8877_s0 + $0x238] sm:$0xff] }
 0x139   :  { %2285 = vmatprep.mubr.bf16.mxu0 %v8031_v9  ;;  %2691 = vmatprep.subr.bf16.mxu0 %v6917_v11  ;;  %v7026_v11 = vld [vmem:[#allocation6] ss:$16 sps:$4 sm:$0xff]  }
 0x13a   :  { %2624 = vmatprep.mubr.bf16.mxu1 %v8031_v9 }
 0x13c   :  { %2692 = vmatpush1.bf16.msra.mxu0 %v6915_v14  ;;  %v7028_v14 = vld [vmem:[#allocation6 + $0x4] ss:$16 sps:$4 sm:$0xff]  }
 0x13d   :  { %2693 = vmatprep.subr.bf16.mxu0 %v6920_v21  ;;  %4246 = vmatprep.subr.bf16.mxu1 %v7028_v14  ;;  %v8091_v21 = vpack.c.bf16 %v174_v7, %v168_v4  ;;  %v185_v4 = vld [vmem:[%s8877_s0 + $0x290] sm:$0xff] }
 0x13e   :  { %4247 = vmatpush1.bf16.msra.mxu1 %v7026_v11  ;;  %v7038_v7 = vld [vmem:[#allocation6 + $0x40] ss:$16 sps:$4 sm:$0xff]   ;;  %v7046_v11 = vld [vmem:[#allocation6 + $0x64] ss:$16 sps:$4 sm:$0xff]  }
 0x13f   :  { %2286 = vmatmul.mubr.bf16.gmra.mrb[8].mxu0 %v8049_v27  ;;  %4248 = vmatprep.subr.bf16.mxu1 %v7034_v36  ;;  %v6944_v14 = vld [vmem:[#allocation2 + $0x254] ss:$24 sps:$4 sm:$0xff]   ;;  %v6947_v36 = vld [vmem:[#allocation2 + $0x284] ss:$24 sps:$4 sm:$0xff]  }
 0x140   :  { %2625 = vmatmul.mubr.bf16.gmra.mrb[8].mxu1 %v8049_v27  ;;  %2694 = vmatpush1.bf16.msra.mxu0 %v6918_v30  ;;  %v167_v30 = vld [vmem:[%s8877_s0 + $0x200] sm:$0xff] }
 0x141   :  { %2295 = vmatprep.mubr.bf16.mxu0 %v8051_v31  ;;  %2695 = vmatprep.subr.bf16.mxu0 %v6923_v33  ;;  %v173_v33 = vld [vmem:[%s8877_s0 + $0x230] sm:$0xff] }
 0x142   :  { %2634 = vmatprep.mubr.bf16.mxu1 %v8051_v31 }
 0x144   :  { %2696 = vmatpush1.bf16.msra.mxu0 %v6921_v35  ;;  %v7032_v35 = vld [vmem:[#allocation6 + $0x20] ss:$16 sps:$4 sm:$0xff]  }
 0x145   :  { %2697 = vmatprep.subr.bf16.mxu0 %v6926_v44  ;;  %v180_v44 = vld [vmem:[%s8877_s0 + $0x268] sm:$0xff]  ;;  %4249 = vmatpush1.bf16.msra.mxu1 %v7032_v35 }
 0x146   :  { %4250 = vmatprep.subr.bf16.mxu1 %v7040_v46  ;;  %v7052_v46 = vld [vmem:[#allocation6 + $0x84] ss:$16 sps:$4 sm:$0xff]  }
 0x147   :  { %2296 = vmatmul.mubr.bf16.gmra.mrb[12].mxu0 %v8069_v54 }
 0x148   :  { %2635 = vmatmul.mubr.bf16.gmra.mrb[12].mxu1 %v8069_v54  ;;  %2698 = vmatpush1.bf16.msra.mxu0 %v6924_v47  ;;  %v6936_v47 = vld [vmem:[#allocation2 + $0x1f0] ss:$24 sps:$4 sm:$0xff]  }
 0x149   :  { %2305 = vmatprep.mubr.bf16.mxu0 %v8071_v56  ;;  %2699 = vmatprep.subr.bf16.mxu0 %v6929_v57  ;;  %v8109_v57 = vpack.c.bf16 %v173_v33, %v167_v30  ;;  %v6942_v30 = vld [vmem:[#allocation2 + $0x250] ss:$24 sps:$4 sm:$0xff]  }
 0x14a   :  { %2644 = vmatprep.mubr.bf16.mxu1 %v8071_v56  ;;  %4251 = vmatpush1.bf16.msra.mxu1 %v7038_v7  ;;  %v6953_v7 = vld [vmem:[#allocation2 + $0x2e4] ss:$24 sps:$4 sm:$0xff]  }
 0x14b   :  { %4252 = vmatprep.subr.bf16.mxu1 %v7046_v11  ;;  %v7056_v11 = vld [vmem:[#allocation6 + $0xa0] ss:$16 sps:$4 sm:$0xff]  }
 0x14c   :  { %2700 = vmatpush1.bf16.msra.mxu0 %v6927_v60  ;;  %v8111_v60 = vpack.c.bf16 %v186_v45, %v180_v44  ;;  %v191_v44 = vld [vmem:[%s8877_s0 + $0x2c0] sm:$0xff] }
 0x14d   :  { %2701 = vmatprep.subr.bf16.mxu0 %v6932_v2  ;;  %v179_v2 = vld [vmem:[%s8877_s0 + $0x260] sm:$0xff] }
 0x14e   :  { %v8129_v33 = vpack.c.bf16 %v185_v4, %v179_v2  ;;  %v7050_v45 = vld [vmem:[#allocation6 + $0x80] ss:$16 sps:$4 sm:$0xff]  }
 0x14f   :  { %2306 = vmatmul.mubr.bf16.gmra.mrb[16].mxu0 %v8089_v19  ;;  %v6948_v2 = vld [vmem:[#allocation2 + $0x2b0] ss:$24 sps:$4 sm:$0xff]  }
 0x150   :  { %2645 = vmatmul.mubr.bf16.gmra.mrb[16].mxu1 %v8089_v19  ;;  %2702 = vmatpush1.bf16.msra.mxu0 %v6930_v16  ;;  %v192_v16 = vld [vmem:[%s8877_s0 + $0x2c8] sm:$0xff] }
 0x151   :  { %2315 = vmatprep.mubr.bf16.mxu0 %v8091_v21  ;;  %2703 = vmatprep.subr.bf16.mxu0 %v6935_v22  ;;  %v198_v22 = vld [vmem:[%s8877_s0 + $0x2f8] sm:$0xff] }
 0x152   :  { %2654 = vmatprep.mubr.bf16.mxu1 %v8091_v21  ;;  %v8131_v35 = vpack.c.bf16 %v198_v22, %v192_v16  ;;  %v6951_v16 = vld [vmem:[#allocation2 + $0x2e0] ss:$24 sps:$4 sm:$0xff]   ;;  %v6956_v22 = vld [vmem:[#allocation2 + $0x314] ss:$24 sps:$4 sm:$0xff]  }
 0x154   :  { %2704 = vmatpush1.bf16.msra.mxu0 %v6933_v24  ;;  %v7044_v24 = vld [vmem:[#allocation6 + $0x60] ss:$16 sps:$4 sm:$0xff]  }
 0x155   :  { %2705 = vmatprep.subr.bf16.mxu0 %v6938_v42  ;;  %v6945_v42 = vld [vmem:[#allocation2 + $0x280] ss:$24 sps:$4 sm:$0xff]   ;;  %4253 = vmatpush1.bf16.msra.mxu1 %v7044_v24 }
 0x156   :  { %4254 = vmatprep.subr.bf16.mxu1 %v7052_v46  ;;  %v7062_v24 = vld [vmem:[#allocation6 + $0xc0] ss:$16 sps:$4 sm:$0xff]  }
 0x157   :  { %2316 = vmatmul.mubr.bf16.gmra.mrb[20].mxu0 %v8109_v57  ;;  %v6957_v46 = vld [vmem:[#allocation2 + $0x340] ss:$24 sps:$4 sm:$0xff]  }
 0x158   :  { %2655 = vmatmul.mubr.bf16.gmra.mrb[20].mxu1 %v8109_v57  ;;  %2706 = vmatpush1.bf16.msra.mxu0 %v6936_v47  ;;  %v197_v47 = vld [vmem:[%s8877_s0 + $0x2f0] sm:$0xff] }
 0x159   :  { %2325 = vmatprep.mubr.bf16.mxu0 %v8111_v60  ;;  %2707 = vmatprep.subr.bf16.mxu0 %v6941_v62  ;;  %v7058_v62 = vld [vmem:[#allocation6 + $0xa4] ss:$16 sps:$4 sm:$0xff]   ;;  %v8143_v4 = vpack.c.bf16 %v197_v47, %v191_v44  ;;  %v7068_v44 = vld [vmem:[#allocation6 + $0xe0] ss:$16 sps:$4 sm:$0xff]  }
 0x15a   :  { %2664 = vmatprep.mubr.bf16.mxu1 %v8111_v60  ;;  %4255 = vmatpush1.bf16.msra.mxu1 %v7050_v45  ;;  %v7076_v45 = vld [vmem:[#allocation6 + $0x104] ss:$16 sps:$4 sm:$0xff]   ;;  %v7074_v47 = vld [vmem:[#allocation6 + $0x100] ss:$16 sps:$4 sm:$0xff]  }
 0x15b   :  { %4256 = vmatprep.subr.bf16.mxu1 %v7058_v62  ;;  %v7079_v62 = vld [vmem:[#allocation6 + $0x124] ss:$16 sps:$4 sm:$0xff]  }
 0x15c   :  { %2708 = vmatpush1.bf16.msra.mxu0 %v6939_v1  ;;  %v6950_v1 = vld [vmem:[#allocation2 + $0x2b4] ss:$24 sps:$4 sm:$0xff]  }
 0x15d   :  { %2709 = vmatprep.subr.bf16.mxu0 %v6944_v14  ;;  %v7064_v14 = vld [vmem:[#allocation6 + $0xc4] ss:$16 sps:$4 sm:$0xff]  }
 0x15e   :  { %4257 = vmatpush1.bf16.msra.mxu1 %v7056_v11  ;;  %v7085_v11 = vld [vmem:[#allocation6 + $0x144] ss:$16 sps:$4 sm:$0xff]  }
 0x15f   :  { %2326 = vmatmul.mubr.bf16.gmra.mrb[24].mxu0 %v8129_v33  ;;  %4258 = vmatprep.subr.bf16.mxu1 %v7064_v14  ;;  %v7083_v14 = vld [vmem:[#allocation6 + $0x140] ss:$16 sps:$4 sm:$0xff]  }
 0x160   :  { %2665 = vmatmul.mubr.bf16.gmra.mrb[24].mxu1 %v8129_v33  ;;  %2710 = vmatpush1.bf16.msra.mxu0 %v6942_v30  ;;  %v7070_v30 = vld [vmem:[#allocation6 + $0xe4] ss:$16 sps:$4 sm:$0xff]  }
 0x161   :  { %2335 = vmatprep.mubr.bf16.mxu0 %v8131_v35  ;;  %2711 = vmatprep.subr.bf16.mxu0 %v6947_v36  ;;  %v6954_v36 = vld [vmem:[#allocation2 + $0x310] ss:$24 sps:$4 sm:$0xff]  }
 0x162   :  { %2674 = vmatprep.mubr.bf16.mxu1 %v8131_v35  ;;  %4259 = vmatpush1.bf16.msra.mxu1 %v7062_v24  ;;  %v6971_v24 = vld [vmem:[#allocation2 + $0x404] ss:$24 sps:$4 sm:$0xff]  }
 0x163   :  { %4260 = vmatprep.subr.bf16.mxu1 %v7070_v30  ;;  %v7089_v30 = vld [vmem:[#allocation6 + $0x160] ss:$16 sps:$4 sm:$0xff]  }
 0x164   :  { %2712 = vmatpush1.bf16.msra.mxu0 %v6945_v42  ;;  %v6959_v42 = vld [vmem:[#allocation2 + $0x344] ss:$24 sps:$4 sm:$0xff]  }
 0x165   :  { %2713 = vmatprep.subr.bf16.mxu0 %v6950_v1  ;;  %v6960_v1 = vld [vmem:[#allocation2 + $0x370] ss:$24 sps:$4 sm:$0xff]  }
 0x166   :  { %4261 = vmatpush1.bf16.msra.mxu1 %v7068_v44  ;;  %v6972_v44 = vld [vmem:[#allocation2 + $0x430] ss:$24 sps:$4 sm:$0xff]  }
 0x167   :  { %2336 = vmatmul.mubr.bf16.gmra.mrb[28].mxu0 %v8143_v4  ;;  %4262 = vmatprep.subr.bf16.mxu1 %v7076_v45  ;;  %v7103_v45 = vld [vmem:[#allocation6 + $0x1a4] ss:$16 sps:$4 sm:$0xff]  }
 0x168   :  { %2675 = vmatmul.mubr.bf16.gmra.mrb[28].mxu1 %v8143_v4  ;;  %2714 = vmatpush1.bf16.msra.mxu0 %v6948_v2  ;;  %v6965_v2 = vld [vmem:[#allocation2 + $0x3a4] ss:$24 sps:$4 sm:$0xff]  }
 0x169   :  { %2717 = vmatprep.mubr.bf16.mxu0 %v7673_v51  ;;  %2715 = vmatprep.subr.bf16.mxu0 %v6953_v7  ;;  %v6962_v51 = vld [vmem:[#allocation2 + $0x374] ss:$24 sps:$4 sm:$0xff]  }
 0x16a   :  { %4263 = vmatpush1.bf16.msra.mxu1 %v7074_v47  ;;  %v7077_v7 = vld [vmem:[#allocation6 + $0x120] ss:$16 sps:$4 sm:$0xff]  }
 0x16b   :  { %4264 = vmatprep.subr.bf16.mxu1 %v7079_v62  ;;  %v6975_v47 = vld [vmem:[#allocation2 + $0x460] ss:$24 sps:$4 sm:$0xff]  }
 0x16c   :  { %2716 = vmatpush1.bf16.msra.mxu0 %v6951_v16  ;;  %v7091_v16 = vld [vmem:[#allocation6 + $0x164] ss:$16 sps:$4 sm:$0xff]  }
 0x16d   :  { %2798 = vmatprep.subr.bf16.mxu0 %v6956_v22  ;;  %v6966_v22 = vld [vmem:[#allocation2 + $0x3d0] ss:$24 sps:$4 sm:$0xff]  }
 0x16e   :  { %4265 = vmatpush1.bf16.msra.mxu1 %v7077_v7  ;;  %v7109_v62 = vld [vmem:[#allocation6 + $0x1c4] ss:$16 sps:$4 sm:$0xff]  }
 0x16f   :  { %2718 = vmatmul.mubr.bf16.vlgmr.msra.gmra.mrb[32].mxu0 %v7683_v8  ;;  %v6963_v8 = vld [vmem:[#allocation2 + $0x3a0] ss:$24 sps:$4 sm:$0xff]   ;;  %4266 = vmatprep.subr.bf16.mxu1 %v7085_v11  ;;  %v6983_v7 = vld [vmem:[#allocation2 + $0x4c4] ss:$24 sps:$4 sm:$0xff]  }
 0x170   :  { %2799 = vmatpush1.bf16.msra.mxu0 %v6954_v36  ;;  %2727 = vmatprep.mubr.bf16.mxu0 %v7691_v15  ;;  %v6968_v15 = vld [vmem:[#allocation2 + $0x3d4] ss:$24 sps:$4 sm:$0xff]  }
 0x171   :  { %2800 = vmatprep.subr.bf16.mxu0 %v6959_v42  ;;  %v7097_v36 = vld [vmem:[#allocation6 + $0x184] ss:$16 sps:$4 sm:$0xff]   ;;  %v7095_v42 = vld [vmem:[#allocation6 + $0x180] ss:$16 sps:$4 sm:$0xff]  }
 0x172   :  { %4267 = vmatpush1.bf16.msra.mxu1 %v7083_v14  ;;  %v7113_v11 = vld [vmem:[#allocation6 + $0x1e0] ss:$16 sps:$4 sm:$0xff]  }
 0x173   :  { %4268 = vmatprep.subr.bf16.mxu1 %v7091_v16  ;;  %v6989_v14 = vld [vmem:[#allocation2 + $0x524] ss:$24 sps:$4 sm:$0xff]   ;;  %v6987_v16 = vld [vmem:[#allocation2 + $0x520] ss:$24 sps:$4 sm:$0xff]  }
 0x174   :  { %2801 = vmatpush1.bf16.msra.mxu0 %v6957_v46  ;;  %v6977_v46 = vld [vmem:[#allocation2 + $0x464] ss:$24 sps:$4 sm:$0xff]  }
 0x175   :  { %2802 = vmatprep.subr.bf16.mxu0 %v6962_v51  ;;  %v7101_v51 = vld [vmem:[#allocation6 + $0x1a0] ss:$16 sps:$4 sm:$0xff]  }
 0x176   :  { %4269 = vmatpush1.bf16.msra.mxu1 %v7089_v30  ;;  %v6998_v30 = vld [vmem:[#allocation2 + $0x5b4] ss:$24 sps:$4 sm:$0xff]  }
 0x177   :  { %2728 = vmatmul.mubr.bf16.gmra.mrb[36].mxu0 %v7703_v23  ;;  %v6969_v23 = vld [vmem:[#allocation2 + $0x400] ss:$24 sps:$4 sm:$0xff]   ;;  %4270 = vmatprep.subr.bf16.mxu1 %v7097_v36  ;;  %v6996_v36 = vld [vmem:[#allocation2 + $0x5b0] ss:$24 sps:$4 sm:$0xff]  }
 0x178   :  { %2803 = vmatpush1.bf16.msra.mxu0 %v6960_v1  ;;  %2737 = vmatprep.mubr.bf16.mxu0 %v7711_v28  ;;  %v6974_v28 = vld [vmem:[#allocation2 + $0x434] ss:$24 sps:$4 sm:$0xff]   ;;  %v6978_v1 = vld [vmem:[#allocation2 + $0x490] ss:$24 sps:$4 sm:$0xff]  }
 0x179   :  { %2804 = vmatprep.subr.bf16.mxu0 %v6965_v2  ;;  %v7115_v2 = vld [vmem:[#allocation6 + $0x1e4] ss:$16 sps:$4 sm:$0xff]  }
 0x17a   :  { %4271 = vmatpush1.bf16.msra.mxu1 %v7095_v42  ;;  %v7007_v42 = vld [vmem:[#allocation2 + $0x644] ss:$24 sps:$4 sm:$0xff]  }
 0x17b   :  { %4272 = vmatprep.subr.bf16.mxu1 %v7103_v45  ;;  %v7013_v45 = vld [vmem:[#allocation2 + $0x6a4] ss:$24 sps:$4 sm:$0xff]  }
 0x17c   :  { %2805 = vmatpush1.bf16.msra.mxu0 %v6963_v8  ;;  %v6981_v8 = vld [vmem:[#allocation2 + $0x4c0] ss:$24 sps:$4 sm:$0xff]  }
 0x17d   :  { %2806 = vmatprep.subr.bf16.mxu0 %v6968_v15  ;;  %v7121_v15 = vld [vmem:[#allocation6 + $0x204] ss:$16 sps:$4 sm:$0xff]  }
 0x17e   :  { %4273 = vmatpush1.bf16.msra.mxu1 %v7101_v51  ;;  %v7022_v51 = vld [vmem:[#allocation2 + $0x734] ss:$24 sps:$4 sm:$0xff]  }
 0x17f   :  { %2738 = vmatmul.mubr.bf16.gmra.mrb[40].mxu0 %v7723_v37  ;;  %v6980_v37 = vld [vmem:[#allocation2 + $0x494] ss:$24 sps:$4 sm:$0xff]   ;;  %4274 = vmatprep.subr.bf16.mxu1 %v7109_v62 }
 0x180   :  { %2807 = vmatpush1.bf16.msra.mxu0 %v6966_v22  ;;  %2747 = vmatprep.mubr.bf16.mxu0 %v7731_v43  ;;  %v7107_v43 = vld [vmem:[#allocation6 + $0x1c0] ss:$16 sps:$4 sm:$0xff]  }
 0x181   :  { %2808 = vmatprep.subr.bf16.mxu0 %v6971_v24  ;;  %v6992_v22 = vld [vmem:[#allocation2 + $0x554] ss:$24 sps:$4 sm:$0xff]   ;;  %v6993_v24 = vld [vmem:[#allocation2 + $0x580] ss:$24 sps:$4 sm:$0xff]  }
 0x182   :  { %4275 = vmatpush1.bf16.msra.mxu1 %v7107_v43  ;;  %v7031_v62 = vld [vmem:[#allocation2 + $0x794] ss:$24 sps:$4 sm:$0xff]  }
 0x183   :  { %4276 = vmatprep.subr.bf16.mxu1 %v7115_v2  ;;  %v7043_v43 = vld [vmem:[#allocation2 + $0x7f4] ss:$24 sps:$4 sm:$0xff]  }
 0x184   :  { %2809 = vmatpush1.bf16.msra.mxu0 %v6969_v23  ;;  %v6999_v23 = vld [vmem:[#allocation2 + $0x5e0] ss:$24 sps:$4 sm:$0xff]   ;;  %v7055_v2 = vld [vmem:[#allocation2 + $0x854] ss:$24 sps:$4 sm:$0xff]  }
 0x185   :  { %2810 = vmatprep.subr.bf16.mxu0 %v6974_v28  ;;  %v7002_v28 = vld [vmem:[#allocation2 + $0x610] ss:$24 sps:$4 sm:$0xff]  }
 0x186   :  { %4277 = vmatpush1.bf16.msra.mxu1 %v7113_v11  ;;  %v7067_v11 = vld [vmem:[#allocation2 + $0x8b4] ss:$24 sps:$4 sm:$0xff]  }
 0x187   :  { %2748 = vmatmul.mubr.bf16.gmra.mrb[44].mxu0 %v7743_v50  ;;  %v6986_v50 = vld [vmem:[#allocation2 + $0x4f4] ss:$24 sps:$4 sm:$0xff]   ;;  %4359 = vmatprep.subr.bf16.mxu1 %v7121_v15 }
 0x188   :  { %2811 = vmatpush1.bf16.msra.mxu0 %v6972_v44  ;;  %2757 = vmatprep.mubr.bf16.mxu0 %v7751_v59  ;;  %v6984_v59 = vld [vmem:[#allocation2 + $0x4f0] ss:$24 sps:$4 sm:$0xff]  }
 0x189   :  { %2812 = vmatprep.subr.bf16.mxu0 %v6977_v46  ;;  %v7008_v44 = vld [vmem:[#allocation2 + $0x670] ss:$24 sps:$4 sm:$0xff]  }
 0x18a   :  { %v7014_v46 = vld [vmem:[#allocation2 + $0x6d0] ss:$24 sps:$4 sm:$0xff]  }
 0x18b   :  { %v7082_v15 = vld [vmem:[#allocation6 + $0xc] ss:$16 sps:$4 sm:$0xff]  }
 0x18c   :  { %2813 = vmatpush1.bf16.msra.mxu0 %v6975_v47  ;;  %v7020_v47 = vld [vmem:[#allocation2 + $0x730] ss:$24 sps:$4 sm:$0xff]  }
 0x18d   :  { %2814 = vmatprep.subr.bf16.mxu0 %v6980_v37  ;;  %v7037_v37 = vld [vmem:[#allocation2 + $0x7c4] ss:$24 sps:$4 sm:$0xff]  }
 0x18f   :  { %2758 = vmatmul.mubr.bf16.gmra.mrb[48].mxu0 %v7763_v0  ;;  %v6990_v0 = vld [vmem:[#allocation2 + $0x550] ss:$24 sps:$4 sm:$0xff]  }
 0x190   :  { %2815 = vmatpush1.bf16.msra.mxu0 %v6978_v1  ;;  %2767 = vmatprep.mubr.bf16.mxu0 %v7771_v10  ;;  %v6995_v10 = vld [vmem:[#allocation2 + $0x584] ss:$24 sps:$4 sm:$0xff]  }
 0x191   :  { %2816 = vmatprep.subr.bf16.mxu0 %v6983_v7  ;;  %v7049_v1 = vld [vmem:[#allocation2 + $0x824] ss:$24 sps:$4 sm:$0xff]  }
 0x192   :  { %v7061_v7 = vld [vmem:[#allocation2 + $0x884] ss:$24 sps:$4 sm:$0xff]  }
 0x194   :  { %2817 = vmatpush1.bf16.msra.mxu0 %v6981_v8  ;;  %v7073_v8 = vld [vmem:[#allocation2 + $0x8e4] ss:$24 sps:$4 sm:$0xff]  }
 0x195   :  { %2818 = vmatprep.subr.bf16.mxu0 %v6986_v50  ;;  %v7088_v50 = vld [vmem:[#allocation6 + $0x2c] ss:$16 sps:$4 sm:$0xff]  }
 0x197   :  { %2768 = vmatmul.mubr.bf16.gmra.mrb[52].mxu0 %v7783_v17  ;;  %v7001_v17 = vld [vmem:[#allocation2 + $0x5e4] ss:$24 sps:$4 sm:$0xff]  }
 0x198   :  { %2819 = vmatpush1.bf16.msra.mxu0 %v6984_v59  ;;  %2777 = vmatprep.mubr.bf16.mxu0 %v7791_v25  ;;  %v7004_v25 = vld [vmem:[#allocation2 + $0x614] ss:$24 sps:$4 sm:$0xff]  }
 0x199   :  { %2820 = vmatprep.subr.bf16.mxu0 %v6989_v14  ;;  %v7094_v59 = vld [vmem:[#allocation6 + $0x4c] ss:$16 sps:$4 sm:$0xff]  }
 0x19a   :  { %v7100_v14 = vld [vmem:[#allocation6 + $0x6c] ss:$16 sps:$4 sm:$0xff]  }
 0x19c   :  { %2821 = vmatpush1.bf16.msra.mxu0 %v6987_v16  ;;  %v537_v16 = vlaneseq }
 0x19d   :  { %2822 = vmatprep.subr.bf16.mxu0 %v6992_v22  ;;  %v7106_v22 = vld [vmem:[#allocation6 + $0x8c] ss:$16 sps:$4 sm:$0xff]  }
 0x19f   :  { %2778 = vmatmul.mubr.bf16.gmra.mrb[56].mxu0 %v7803_v34  ;;  %v7005_v34 = vld [vmem:[#allocation2 + $0x640] ss:$24 sps:$4 sm:$0xff]  }
 0x1a0   :  { %2823 = vmatpush1.bf16.msra.mxu0 %v6990_v0  ;;  %2787 = vmatprep.mubr.bf16.mxu0 %v7811_v40  ;;  %v7010_v40 = vld [vmem:[#allocation2 + $0x674] ss:$24 sps:$4 sm:$0xff]  }
 0x1a1   :  { %2824 = vmatprep.subr.bf16.mxu0 %v6995_v10  ;;  %v7104_v0 = vld [vmem:[#allocation6 + $0x88] ss:$16 sps:$4 sm:$0xff]  }
 0x1a4   :  { %2825 = vmatpush1.bf16.msra.mxu0 %v6993_v24  ;;  %v7112_v24 = vld [vmem:[#allocation6 + $0xac] ss:$16 sps:$4 sm:$0xff]  }
 0x1a5   :  { %2826 = vmatprep.subr.bf16.mxu0 %v6998_v30  ;;  %v535_v30 = vld [vmem:[#allocation4] sm:$0x3f] }
 0x1a7   :  { %2788 = vmatmul.mubr.bf16.gmra.mrb[60].mxu0 %v7823_v52  ;;  %v7011_v52 = vld [vmem:[#allocation2 + $0x6a0] ss:$24 sps:$4 sm:$0xff]  }
 0x1a8   :  { %2827 = vmatpush1.bf16.msra.mxu0 %v6996_v36  ;;  %2830 = vmatprep.mubr.bf16.mxu0 %v7831_v58  ;;  %v7016_v58 = vld [vmem:[#allocation2 + $0x6d4] ss:$24 sps:$4 sm:$0xff]  }
 0x1a9   :  { %2828 = vmatprep.subr.bf16.mxu0 %v7001_v17 }
 0x1ac   :  { %2829 = vmatpush1.bf16.msra.mxu0 %v6999_v23 }
 0x1ad   :  { %2911 = vmatprep.subr.bf16.mxu0 %v7004_v25  ;;  %v7118_v25 = vld [vmem:[#allocation6 + $0xcc] ss:$16 sps:$4 sm:$0xff]  }
 0x1af   :  { %2831 = vmatmul.mubr.bf16.vlgmr.msra.gmra.mrb[32].mxu0 %v7843_v3  ;;  %v7019_v3 = vld [vmem:[#allocation2 + $0x704] ss:$24 sps:$4 sm:$0xff]  }
 0x1b0   :  { %2912 = vmatpush1.bf16.msra.mxu0 %v7002_v28  ;;  %2840 = vmatprep.mubr.bf16.mxu0 %v7851_v13  ;;  %v7017_v13 = vld [vmem:[#allocation2 + $0x700] ss:$24 sps:$4 sm:$0xff]  }
 0x1b1   :  { %2913 = vmatprep.subr.bf16.mxu0 %v7007_v42 }
 0x1b4   :  { %2914 = vmatpush1.bf16.msra.mxu0 %v7005_v34 }
 0x1b5   :  { %2915 = vmatprep.subr.bf16.mxu0 %v7010_v40 }
 0x1b7   :  { %2841 = vmatmul.mubr.bf16.gmra.mrb[36].mxu0 %v7863_v20  ;;  %v7025_v20 = vld [vmem:[#allocation2 + $0x764] ss:$24 sps:$4 sm:$0xff]  }
 0x1b8   :  { %2916 = vmatpush1.bf16.msra.mxu0 %v7008_v44  ;;  %2850 = vmatprep.mubr.bf16.mxu0 %v7871_v32  ;;  %v7023_v32 = vld [vmem:[#allocation2 + $0x760] ss:$24 sps:$4 sm:$0xff]  }
 0x1b9   :  { %2917 = vmatprep.subr.bf16.mxu0 %v7013_v45 }
 0x1bc   :  { %2918 = vmatpush1.bf16.msra.mxu0 %v7011_v52  ;;  %v7116_v52 = vld [vmem:[#allocation6 + $0xc8] ss:$16 sps:$4 sm:$0xff]  }
 0x1bd   :  { %2919 = vmatprep.subr.bf16.mxu0 %v7016_v58 }
 0x1bf   :  { %2851 = vmatmul.mubr.bf16.gmra.mrb[40].mxu0 %v7883_v41  ;;  %v7029_v41 = vld [vmem:[#allocation2 + $0x790] ss:$24 sps:$4 sm:$0xff]  }
 0x1c0   :  { %2920 = vmatpush1.bf16.msra.mxu0 %v7014_v46  ;;  %2860 = vmatprep.mubr.bf16.mxu0 %v7891_v49  ;;  %v7035_v49 = vld [vmem:[#allocation2 + $0x7c0] ss:$24 sps:$4 sm:$0xff]  }
 0x1c1   :  { %2921 = vmatprep.subr.bf16.mxu0 %v7019_v3 }
 0x1c4   :  { %2922 = vmatpush1.bf16.msra.mxu0 %v7017_v13 }
 0x1c5   :  { %2923 = vmatprep.subr.bf16.mxu0 %v7022_v51 }
 0x1c7   :  { %2861 = vmatmul.mubr.bf16.gmra.mrb[44].mxu0 %v7903_v61  ;;  %v7041_v61 = vld [vmem:[#allocation2 + $0x7f0] ss:$24 sps:$4 sm:$0xff]  }
 0x1c8   :  { %2924 = vmatpush1.bf16.msra.mxu0 %v7020_v47  ;;  %2870 = vmatprep.mubr.bf16.mxu0 %v7911_v6  ;;  %v7047_v6 = vld [vmem:[#allocation2 + $0x820] ss:$24 sps:$4 sm:$0xff]  }
 0x1c9   :  { %2925 = vmatprep.subr.bf16.mxu0 %v7025_v20  ;;  %v7124_v20 = vld [vmem:[#allocation6 + $0xec] ss:$16 sps:$4 sm:$0xff]  }
 0x1cc   :  { %2926 = vmatpush1.bf16.msra.mxu0 %v7023_v32 }
 0x1cd   :  { %2927 = vmatprep.subr.bf16.mxu0 %v7031_v62 }
 0x1cf   :  { %2871 = vmatmul.mubr.bf16.gmra.mrb[48].mxu0 %v7923_v18  ;;  %v7053_v18 = vld [vmem:[#allocation2 + $0x850] ss:$24 sps:$4 sm:$0xff]  }
 0x1d0   :  { %2928 = vmatpush1.bf16.msra.mxu0 %v7029_v41  ;;  %2880 = vmatprep.mubr.bf16.mxu0 %v7931_v29  ;;  %v7059_v29 = vld [vmem:[#allocation2 + $0x880] ss:$24 sps:$4 sm:$0xff]  }
 0x1d1   :  { %2929 = vmatprep.subr.bf16.mxu0 %v7037_v37 }
 0x1d4   :  { %2930 = vmatpush1.bf16.msra.mxu0 %v7035_v49 }
 0x1d5   :  { %2931 = vmatprep.subr.bf16.mxu0 %v7043_v43 }
 0x1d7   :  { %2881 = vmatmul.mubr.bf16.gmra.mrb[52].mxu0 %v7943_v39  ;;  %v7065_v39 = vld [vmem:[#allocation2 + $0x8b0] ss:$24 sps:$4 sm:$0xff]  }
 0x1d8   :  { %2932 = vmatpush1.bf16.msra.mxu0 %v7041_v61  ;;  %2890 = vmatprep.mubr.bf16.mxu0 %v7951_v53  ;;  %v7071_v53 = vld [vmem:[#allocation2 + $0x8e0] ss:$24 sps:$4 sm:$0xff]  }
 0x1d9   :  { %2933 = vmatprep.subr.bf16.mxu0 %v7049_v1 }
 0x1dc   :  { %2934 = vmatpush1.bf16.msra.mxu0 %v7047_v6  ;;  %v7119_v6 = vld [vmem:[#allocation6 + $0x200] ss:$16 sps:$4 sm:$0xff]  }
 0x1dd   :  { %2935 = vmatprep.subr.bf16.mxu0 %v7055_v2  ;;  %v7122_v2 = vld [vmem:[#allocation6 + $0xe8] ss:$16 sps:$4 sm:$0xff]  }
 0x1df   :  { %2891 = vmatmul.mubr.bf16.gmra.mrb[56].mxu0 %v7963_v63  ;;  %v7080_v63 = vld [vmem:[#allocation6 + $0x8] ss:$16 sps:$4 sm:$0xff]  }
 0x1e0   :  { %2936 = vmatpush1.bf16.msra.mxu0 %v7053_v18  ;;  %2900 = vmatprep.mubr.bf16.mxu0 %v7971_v12  ;;  %v7086_v12 = vld [vmem:[#allocation6 + $0x28] ss:$16 sps:$4 sm:$0xff]   ;;  %v7127_v18 = vld [vmem:[#allocation6 + $0x224] ss:$16 sps:$4 sm:$0xff]  }
 0x1e1   :  { %2937 = vmatprep.subr.bf16.mxu0 %v7061_v7  ;;  %v7130_v7 = vld [vmem:[#allocation6 + $0x10c] ss:$16 sps:$4 sm:$0xff]  }
 0x1e4   :  { %2938 = vmatpush1.bf16.msra.mxu0 %v7059_v29 }
 0x1e5   :  { %2939 = vmatprep.subr.bf16.mxu0 %v7067_v11 }
 0x1e7   :  { %2901 = vmatmul.mubr.bf16.gmra.mrb[60].mxu0 %v7983_v26  ;;  %v7092_v26 = vld [vmem:[#allocation6 + $0x48] ss:$16 sps:$4 sm:$0xff]  }
 0x1e8   :  { %2940 = vmatpush1.bf16.msra.mxu0 %v7065_v39  ;;  %2943 = vmatprep.mubr.bf16.mxu0 %v7991_v38  ;;  %v7098_v38 = vld [vmem:[#allocation6 + $0x68] ss:$16 sps:$4 sm:$0xff]  }
 0x1e9   :  { %2941 = vmatprep.subr.bf16.mxu0 %v7073_v8 }
 0x1ec   :  { %2942 = vmatpush1.bf16.msra.mxu0 %v7071_v53 }
 0x1ed   :  { %4585 = vmatprep.subr.bf16.mxu0 %v7082_v15 }
 0x1ef   :  { %2944 = vmatmul.mubr.bf16.vlgmr.msra.gmra.mrb[32].mxu0 %v8009_v48  ;;  %v8184_v48 = vshrl.u32 %v537_v16, 7  ;;  %v7133_v16 = vld [vmem:[#allocation6 + $0x244] ss:$16 sps:$4 sm:$0xff]  }
 0x1f0   :  { %4586 = vmatpush1.bf16.msra.mxu0 %v7080_v63  ;;  %2953 = vmatprep.mubr.bf16.mxu0 %v8011_v55  ;;  %v7125_v63 = vld [vmem:[#allocation6 + $0x220] ss:$16 sps:$4 sm:$0xff]  }
 0x1f1   :  { %4587 = vmatprep.subr.bf16.mxu0 %v7088_v50  ;;  %v539_v55 = vsub.s32 0, %v8184_v48  ;;  %v547_v10 = vsub.s32 2, %v8184_v48  ;;  %v543_v36 = vsub.s32 1, %v8184_v48  ;;  %v7128_v50 = vld [vmem:[#allocation6 + $0x108] ss:$16 sps:$4 sm:$0xff]  }
 0x1f3   :  { %v8194_v17 = vrot.slane %v535_v30, %v539_v55  ;;  %v8198_v23 = vrot.slane %v535_v30, %v547_v10  ;;  %v8202_v34 = vrot.slane %v535_v30, %v543_v36 }
 0x1f4   :  { %4588 = vmatpush1.bf16.msra.mxu0 %v7086_v12 }
 0x1f5   :  { %4589 = vmatprep.subr.bf16.mxu0 %v7094_v59 }
 0x1f7   :  { %2954 = vmatmul.mubr.bf16.gmra.mrb[36].mxu0 %v8029_v5  ;;  %v551_v5 = vsub.s32 3, %v8184_v48 }
 0x1f8   :  { %4590 = vmatpush1.bf16.msra.mxu0 %v7092_v26  ;;  %2963 = vmatprep.mubr.bf16.mxu0 %v8031_v9  ;;  %v7110_v9 = vld [vmem:[#allocation6 + $0xa8] ss:$16 sps:$4 sm:$0xff]  }
 0x1f9   :  { %4591 = vmatprep.subr.bf16.mxu0 %v7100_v14 }
 0x1fc   :  { %4592 = vmatpush1.bf16.msra.mxu0 %v7098_v38  ;;  %v7136_v38 = vld [vmem:[#allocation6 + $0x12c] ss:$16 sps:$4 sm:$0xff]  }
 0x1fd   :  { %4593 = vmatprep.subr.bf16.mxu0 %v7106_v22 }
 0x1ff   :  { %2964 = vmatmul.mubr.bf16.gmra.mrb[40].mxu0 %v8049_v27  ;;  %v8206_v27 = vrot.slane %v535_v30, %v551_v5 }
 0x200   :  { %4594 = vmatpush1.bf16.msra.mxu0 %v7104_v0  ;;  %2973 = vmatprep.mubr.bf16.mxu0 %v8051_v31 }
 0x201   :  { %4595 = vmatprep.subr.bf16.mxu0 %v7112_v24 }
 0x202   :  { %v2267_v28 = vpop.f32.mrb[0].mxu0 }
 0x203   :  { %v2606_v42 = vpop.f32.mrb[0].mxu1  ;;  %v2269_v31 = vpop.f32.mrb[1].mxu0  ;;  %v6126_v58 = vadd.f32 %v2267_v28, %v8194_v17 }
 0x204   :  { %v2608_v40 = vpop.f32.mrb[1].mxu1  ;;  %v2271_v44 = vpop.f32.mrb[2].mxu0  ;;  %4596 = vmatpush1.bf16.msra.mxu0 %v7110_v9  ;;  %v6158_v46 = vadd.f32 %v2606_v42, %v8198_v23  ;;  %v6127_v32 = vadd.f32 %v2269_v31, %v8202_v34  ;;  %v7131_v31 = vld [vmem:[#allocation6 + $0x240] ss:$16 sps:$4 sm:$0xff]  }
 0x205   :  { %v2610_v45 = vpop.f32.mrb[2].mxu1  ;;  %v6128_v3 = vadd.f32 %v2271_v44, %v8194_v17  ;;  %v2273_v51 = vpop.f32.mrb[3].mxu0  ;;  %4597 = vmatprep.subr.bf16.mxu0 %v7118_v25  ;;  %v6159_v62 = vadd.f32 %v2608_v40, %v8206_v27  ;;  %v7134_v40 = vld [vmem:[#allocation6 + $0x128] ss:$16 sps:$4 sm:$0xff]   ;;  %v7139_v44 = vld [vmem:[#allocation6 + $0x264] ss:$16 sps:$4 sm:$0xff]  }
 0x206   :  { %v6160_v13 = vadd.f32 %v2610_v45, %v8198_v23  ;;  %v2612_v47 = vpop.f32.mrb[3].mxu1  ;;  %v6129_v41 = vadd.f32 %v2273_v51, %v8202_v34  ;;  %v7142_v45 = vld [vmem:[#allocation6 + $0x14c] ss:$16 sps:$4 sm:$0xff]  }
 0x207   :  { %v6161_v37 = vadd.f32 %v2612_v47, %v8206_v27  ;;  %v8216_v49 = vpack.c.bf16 %v6128_v3, %v6126_v58  ;;  %2974 = vmatmul.mubr.bf16.gmra.mrb[44].mxu0 %v8069_v54  ;;  %v7137_v47 = vld [vmem:[#allocation6 + $0x260] ss:$16 sps:$4 sm:$0xff]  }
 0x208   :  { %v8218_v43 = vpack.c.bf16 %v6160_v13, %v6158_v46  ;;  %v8221_v61 = vpack.c.bf16 %v6129_v41, %v6127_v32  ;;  %4598 = vmatpush1.bf16.msra.mxu0 %v7116_v52  ;;  %2983 = vmatprep.mubr.bf16.mxu0 %v8071_v56 }
 0x209   :  { %v8223_v1 = vpack.c.bf16 %v6161_v37, %v6159_v62  ;;  %4599 = vmatprep.subr.bf16.mxu0 %v7124_v20  ;;  %v7140_v20 = vld [vmem:[#allocation6 + $0x148] ss:$16 sps:$4 sm:$0xff]  }
 0x20a   :  { %v2277_v29 = vpop.f32.mrb[4].mxu0  ;;  %4278 = vmatprep.mubr.bf16.mxu1 %v8221_v61 }
 0x20b   :  { %v2616_v11 = vpop.f32.mrb[4].mxu1  ;;  %v2279_v39 = vpop.f32.mrb[5].mxu0  ;;  %4279 = vmatmul.mubr.bf16.vlgmr.msra.gmra.mrb[32].mxu1 %v8216_v49  ;;  %v6130_v54 = vadd.f32 %v2277_v29, %v8194_v17 }
 0x20c   :  { %v2618_v8 = vpop.f32.mrb[5].mxu1  ;;  %v2281_v53 = vpop.f32.mrb[6].mxu0  ;;  %4360 = vmatpush1.bf16.msra.mxu1 %v7119_v6  ;;  %4600 = vmatpush1.bf16.msra.mxu0 %v7122_v2  ;;  %v6162_v56 = vadd.f32 %v2616_v11, %v8198_v23  ;;  %v6131_v22 = vadd.f32 %v2279_v39, %v8202_v34  ;;  %v7145_v6 = vld [vmem:[#allocation6 + $0x284] ss:$16 sps:$4 sm:$0xff]   ;;  %v7148_v2 = vld [vmem:[#allocation6 + $0x16c] ss:$16 sps:$4 sm:$0xff]  }
 0x20d   :  { %v2620_v15 = vpop.f32.mrb[6].mxu1  ;;  %v6132_v12 = vadd.f32 %v2281_v53, %v8194_v17  ;;  %v2283_v26 = vpop.f32.mrb[7].mxu0  ;;  %4361 = vmatprep.subr.bf16.mxu1 %v7127_v18  ;;  %4601 = vmatprep.subr.bf16.mxu0 %v7130_v7  ;;  %v6163_v0 = vadd.f32 %v2618_v8, %v8206_v27 }
 0x20e   :  { %v6164_v59 = vadd.f32 %v2620_v15, %v8198_v23  ;;  %v2622_v14 = vpop.f32.mrb[7].mxu1  ;;  %v6133_v24 = vadd.f32 %v2283_v26, %v8202_v34  ;;  %v7143_v15 = vld [vmem:[#allocation6 + $0x280] ss:$16 sps:$4 sm:$0xff]  }
 0x20f   :  { %v6165_v30 = vadd.f32 %v2622_v14, %v8206_v27  ;;  %v8236_v9 = vpack.c.bf16 %v6132_v12, %v6130_v54  ;;  %2984 = vmatmul.mubr.bf16.gmra.mrb[48].mxu0 %v8089_v19 }
 0x210   :  { %v8238_v25 = vpack.c.bf16 %v6164_v59, %v6162_v56  ;;  %v8241_v28 = vpack.c.bf16 %v6133_v24, %v6131_v22  ;;  %4362 = vmatpush1.bf16.msra.mxu1 %v7125_v63  ;;  %4602 = vmatpush1.bf16.msra.mxu0 %v7128_v50  ;;  %v7146_v63 = vld [vmem:[#allocation6 + $0x168] ss:$16 sps:$4 sm:$0xff]   ;;  %v7151_v50 = vld [vmem:[#allocation6 + $0x2a4] ss:$16 sps:$4 sm:$0xff]   ;;  %v7154_v56 = vld [vmem:[#allocation6 + $0x18c] ss:$16 sps:$4 sm:$0xff]  }
 0x211   :  { %v8243_v42 = vpack.c.bf16 %v6165_v30, %v6163_v0  ;;  %4363 = vmatprep.subr.bf16.mxu1 %v7133_v16  ;;  %4603 = vmatprep.subr.bf16.mxu0 %v7136_v38  ;;  %v7149_v22 = vld [vmem:[#allocation6 + $0x2a0] ss:$16 sps:$4 sm:$0xff]   ;;  %v7152_v0 = vld [vmem:[#allocation6 + $0x188] ss:$16 sps:$4 sm:$0xff]  }
 0x212   :  { %v2287_v52 = vpop.f32.mrb[8].mxu0  ;;  %4288 = vmatprep.mubr.bf16.mxu1 %v8241_v28  ;;  %2993 = vmatprep.mubr.bf16.mxu0 %v8091_v21 }
 0x213   :  { %v2626_v58 = vpop.f32.mrb[8].mxu1  ;;  %v2289_v46 = vpop.f32.mrb[9].mxu0  ;;  %4289 = vmatmul.mubr.bf16.gmra.mrb[36].mxu1 %v8236_v9  ;;  %v6134_v3 = vadd.f32 %v2287_v52, %v8194_v17 }
 0x214   :  { %v2628_v19 = vpop.f32.mrb[9].mxu1  ;;  %v2291_v13 = vpop.f32.mrb[10].mxu0  ;;  %4364 = vmatpush1.bf16.msra.mxu1 %v7131_v31  ;;  %4604 = vmatpush1.bf16.msra.mxu0 %v7134_v40  ;;  %v6166_v32 = vadd.f32 %v2626_v58, %v8198_v23  ;;  %v6135_v18 = vadd.f32 %v2289_v46, %v8202_v34 }
 0x215   :  { %v2630_v51 = vpop.f32.mrb[10].mxu1  ;;  %v6136_v62 = vadd.f32 %v2291_v13, %v8194_v17  ;;  %v2293_v37 = vpop.f32.mrb[11].mxu0  ;;  %4365 = vmatprep.subr.bf16.mxu1 %v7139_v44  ;;  %4605 = vmatprep.subr.bf16.mxu0 %v7142_v45  ;;  %v6167_v7 = vadd.f32 %v2628_v19, %v8206_v27  ;;  %v7157_v44 = vld [vmem:[#allocation6 + $0x2c4] ss:$16 sps:$4 sm:$0xff]   ;;  %v7160_v45 = vld [vmem:[#allocation6 + $0x1ac] ss:$16 sps:$4 sm:$0xff]  }
 0x216   :  { %v6168_v41 = vadd.f32 %v2630_v51, %v8198_v23  ;;  %v2632_v21 = vpop.f32.mrb[11].mxu1  ;;  %v6137_v29 = vadd.f32 %v2293_v37, %v8202_v34 }
 0x217   :  { %v6169_v11 = vadd.f32 %v2632_v21, %v8206_v27  ;;  %v8256_v39 = vpack.c.bf16 %v6136_v62, %v6134_v3  ;;  %2994 = vmatmul.mubr.bf16.gmra.mrb[52].mxu0 %v8109_v57  ;;  %v7163_v62 = vld [vmem:[#allocation6 + $0x2e4] ss:$16 sps:$4 sm:$0xff]  }
 0x218   :  { %v8258_v8 = vpack.c.bf16 %v6168_v41, %v6166_v32  ;;  %v8261_v54 = vpack.c.bf16 %v6137_v29, %v6135_v18  ;;  %4366 = vmatpush1.bf16.msra.mxu1 %v7137_v47  ;;  %4606 = vmatpush1.bf16.msra.mxu0 %v7140_v20  ;;  %v7155_v20 = vld [vmem:[#allocation6 + $0x2c0] ss:$16 sps:$4 sm:$0xff]   ;;  %v7158_v32 = vld [vmem:[#allocation6 + $0x1a8] ss:$16 sps:$4 sm:$0xff]   ;;  %v7166_v41 = vld [vmem:[#allocation6 + $0x1cc] ss:$16 sps:$4 sm:$0xff]  }
 0x219   :  { %v8263_v53 = vpack.c.bf16 %v6169_v11, %v6167_v7  ;;  %4367 = vmatprep.subr.bf16.mxu1 %v7145_v6  ;;  %4607 = vmatprep.subr.bf16.mxu0 %v7148_v2  ;;  %v7161_v29 = vld [vmem:[#allocation6 + $0x2e0] ss:$16 sps:$4 sm:$0xff]   ;;  %v7164_v11 = vld [vmem:[#allocation6 + $0x1c8] ss:$16 sps:$4 sm:$0xff]  }
 0x21a   :  { %v2297_v12 = vpop.f32.mrb[12].mxu0  ;;  %4298 = vmatprep.mubr.bf16.mxu1 %v8261_v54  ;;  %3003 = vmatprep.mubr.bf16.mxu0 %v8111_v60 }
 0x21b   :  { %v2636_v59 = vpop.f32.mrb[12].mxu1  ;;  %v2299_v26 = vpop.f32.mrb[13].mxu0  ;;  %4299 = vmatmul.mubr.bf16.gmra.mrb[40].mxu1 %v8256_v39  ;;  %v6138_v14 = vadd.f32 %v2297_v12, %v8194_v17  ;;  %v7169_v12 = vld [vmem:[#allocation6 + $0x304] ss:$16 sps:$4 sm:$0xff]  }
 0x21c   :  { %v2638_v57 = vpop.f32.mrb[13].mxu1  ;;  %v2301_v16 = vpop.f32.mrb[14].mxu0  ;;  %4368 = vmatpush1.bf16.msra.mxu1 %v7143_v15  ;;  %4608 = vmatpush1.bf16.msra.mxu0 %v7146_v63  ;;  %v6170_v24 = vadd.f32 %v2636_v59, %v8198_v23  ;;  %v6139_v52 = vadd.f32 %v2299_v26, %v8202_v34 }
 0x21d   :  { %v2640_v38 = vpop.f32.mrb[14].mxu1  ;;  %v6140_v30 = vadd.f32 %v2301_v16, %v8194_v17  ;;  %v2303_v40 = vpop.f32.mrb[15].mxu0  ;;  %4369 = vmatprep.subr.bf16.mxu1 %v7151_v50  ;;  %4609 = vmatprep.subr.bf16.mxu0 %v7154_v56  ;;  %v6171_v58 = vadd.f32 %v2638_v57, %v8206_v27  ;;  %v7172_v16 = vld [vmem:[#allocation6 + $0x1ec] ss:$16 sps:$4 sm:$0xff]  }
 0x21e   :  { %v6172_v31 = vadd.f32 %v2640_v38, %v8198_v23  ;;  %v2642_v60 = vpop.f32.mrb[15].mxu1  ;;  %v6141_v46 = vadd.f32 %v2303_v40, %v8202_v34  ;;  %v7175_v40 = vld [vmem:[#allocation6 + $0x324] ss:$16 sps:$4 sm:$0xff]  }
 0x21f   :  { %v6173_v19 = vadd.f32 %v2642_v60, %v8206_v27  ;;  %v8276_v3 = vpack.c.bf16 %v6140_v30, %v6138_v14  ;;  %3004 = vmatmul.mubr.bf16.gmra.mrb[56].mxu0 %v8129_v33  ;;  %v7167_v30 = vld [vmem:[#allocation6 + $0x300] ss:$16 sps:$4 sm:$0xff]   ;;  %v7178_v60 = vld [vmem:[#allocation6 + $0x20c] ss:$16 sps:$4 sm:$0xff]  }
 0x220   :  { %v8278_v13 = vpack.c.bf16 %v6172_v31, %v6170_v24  ;;  %v8281_v51 = vpack.c.bf16 %v6141_v46, %v6139_v52  ;;  %4370 = vmatpush1.bf16.msra.mxu1 %v7149_v22  ;;  %4610 = vmatpush1.bf16.msra.mxu0 %v7152_v0  ;;  %v7170_v31 = vld [vmem:[#allocation6 + $0x1e8] ss:$16 sps:$4 sm:$0xff]  }
 0x221   :  { %v8283_v47 = vpack.c.bf16 %v6173_v19, %v6171_v58  ;;  %4371 = vmatprep.subr.bf16.mxu1 %v7157_v44  ;;  %4611 = vmatprep.subr.bf16.mxu0 %v7160_v45 }
 0x222   :  { %v2307_v37 = vpop.f32.mrb[16].mxu0  ;;  %4308 = vmatprep.mubr.bf16.mxu1 %v8281_v51  ;;  %3013 = vmatprep.mubr.bf16.mxu0 %v8131_v35 }
 0x223   :  { %v2646_v21 = vpop.f32.mrb[16].mxu1  ;;  %v2309_v6 = vpop.f32.mrb[17].mxu0  ;;  %4309 = vmatmul.mubr.bf16.gmra.mrb[44].mxu1 %v8276_v3  ;;  %v6142_v2 = vadd.f32 %v2307_v37, %v8194_v17 }
 0x224   :  { %v2648_v33 = vpop.f32.mrb[17].mxu1  ;;  %v2311_v18 = vpop.f32.mrb[18].mxu0  ;;  %4372 = vmatpush1.bf16.msra.mxu1 %v7155_v20  ;;  %4612 = vmatpush1.bf16.msra.mxu0 %v7158_v32  ;;  %v6174_v15 = vadd.f32 %v2646_v21, %v8198_v23  ;;  %v6143_v59 = vadd.f32 %v2309_v6, %v8202_v34  ;;  %v7173_v20 = vld [vmem:[#allocation6 + $0x320] ss:$16 sps:$4 sm:$0xff]   ;;  %v7176_v21 = vld [vmem:[#allocation6 + $0x208] ss:$16 sps:$4 sm:$0xff]  }
 0x225   :  { %v2650_v7 = vpop.f32.mrb[18].mxu1  ;;  %v6144_v63 = vadd.f32 %v2311_v18, %v8194_v17  ;;  %v2313_v56 = vpop.f32.mrb[19].mxu0  ;;  %4373 = vmatprep.subr.bf16.mxu1 %v7163_v62  ;;  %4613 = vmatprep.subr.bf16.mxu0 %v7166_v41  ;;  %v6175_v26 = vadd.f32 %v2648_v33, %v8206_v27  ;;  %v7181_v6 = vld [vmem:[#allocation6 + $0x344] ss:$16 sps:$4 sm:$0xff]  }
 0x226   :  { %v6176_v50 = vadd.f32 %v2650_v7, %v8198_v23  ;;  %v2652_v35 = vpop.f32.mrb[19].mxu1  ;;  %v6145_v57 = vadd.f32 %v2313_v56, %v8202_v34  ;;  %v7179_v56 = vld [vmem:[#allocation6 + $0x340] ss:$16 sps:$4 sm:$0xff]  }
 0x227   :  { %v6177_v14 = vadd.f32 %v2652_v35, %v8206_v27  ;;  %v8296_v38 = vpack.c.bf16 %v6144_v63, %v6142_v2  ;;  %3014 = vmatmul.mubr.bf16.gmra.mrb[60].mxu0 %v8143_v4  ;;  %v7182_v35 = vld [vmem:[#allocation6 + $0x228] ss:$16 sps:$4 sm:$0xff]  }
 0x228   :  { %v8298_v22 = vpack.c.bf16 %v6176_v50, %v6174_v15  ;;  %v8301_v0 = vpack.c.bf16 %v6145_v57, %v6143_v59  ;;  %4374 = vmatpush1.bf16.msra.mxu1 %v7161_v29  ;;  %4614 = vmatpush1.bf16.msra.mxu0 %v7164_v11  ;;  %v7184_v29 = vld [vmem:[#allocation6 + $0x22c] ss:$16 sps:$4 sm:$0xff]  }
 0x229   :  { %v8303_v24 = vpack.c.bf16 %v6177_v14, %v6175_v26  ;;  %4617 = vmatprep.mubr.bf16.mxu0 %v8221_v61  ;;  %4375 = vmatprep.subr.bf16.mxu1 %v7169_v12  ;;  %v7187_v12 = vld [vmem:[#allocation6 + $0x364] ss:$16 sps:$4 sm:$0xff]   ;;  %v7190_v57 = vld [vmem:[#allocation6 + $0x24c] ss:$16 sps:$4 sm:$0xff]  }
 0x22a   :  { %v2317_v44 = vpop.f32.mrb[20].mxu0  ;;  %4318 = vmatprep.mubr.bf16.mxu1 %v8301_v0  ;;  %4615 = vmatprep.subr.bf16.mxu0 %v7172_v16 }
 0x22b   :  { %v2656_v45 = vpop.f32.mrb[20].mxu1  ;;  %v2319_v52 = vpop.f32.mrb[21].mxu0  ;;  %4319 = vmatmul.mubr.bf16.gmra.mrb[48].mxu1 %v8296_v38  ;;  %v6146_v58 = vadd.f32 %v2317_v44, %v8194_v17 }
 0x22c   :  { %v2658_v4 = vpop.f32.mrb[21].mxu1  ;;  %v2321_v46 = vpop.f32.mrb[22].mxu0  ;;  %4376 = vmatpush1.bf16.msra.mxu1 %v7167_v30  ;;  %4616 = vmatpush1.bf16.msra.mxu0 %v7170_v31  ;;  %v6178_v61 = vadd.f32 %v2656_v45, %v8198_v23  ;;  %v6147_v33 = vadd.f32 %v2319_v52, %v8202_v34 }
 0x22d   :  { %v2660_v19 = vpop.f32.mrb[22].mxu1  ;;  %v6148_v32 = vadd.f32 %v2321_v46, %v8194_v17  ;;  %v2323_v41 = vpop.f32.mrb[23].mxu0  ;;  %4377 = vmatprep.subr.bf16.mxu1 %v7175_v40  ;;  %4698 = vmatprep.subr.bf16.mxu0 %v7178_v60  ;;  %v6179_v2 = vadd.f32 %v2658_v4, %v8206_v27  ;;  %v7188_v4 = vld [vmem:[#allocation6 + $0x248] ss:$16 sps:$4 sm:$0xff]  }
 0x22e   :  { %v6180_v62 = vadd.f32 %v2660_v19, %v8198_v23  ;;  %v2662_v37 = vpop.f32.mrb[23].mxu1  ;;  %v6149_v18 = vadd.f32 %v2323_v41, %v8202_v34 }
 0x22f   :  { %v6181_v7 = vadd.f32 %v2662_v37, %v8206_v27  ;;  %v8316_v11 = vpack.c.bf16 %v6148_v32, %v6146_v58  ;;  %4618 = vmatmul.mubr.bf16.vlgmr.msra.gmra.mrb[64].mxu0 %v8216_v49  ;;  %v7193_v58 = vld [vmem:[#allocation6 + $0x384] ss:$16 sps:$4 sm:$0xff]   ;;  %v7196_v32 = vld [vmem:[#allocation6 + $0x26c] ss:$16 sps:$4 sm:$0xff]  }
 0x230   :  { %v8318_v15 = vpack.c.bf16 %v6180_v62, %v6178_v61  ;;  %v8321_v63 = vpack.c.bf16 %v6149_v18, %v6147_v33  ;;  %4378 = vmatpush1.bf16.msra.mxu1 %v7173_v20  ;;  %4627 = vmatprep.mubr.bf16.mxu0 %v8241_v28  ;;  %v7185_v28 = vld [vmem:[#allocation6 + $0x360] ss:$16 sps:$4 sm:$0xff]   ;;  %v7194_v33 = vld [vmem:[#allocation6 + $0x268] ss:$16 sps:$4 sm:$0xff]  }
 0x231   :  { %v8323_v50 = vpack.c.bf16 %v6181_v7, %v6179_v2  ;;  %4699 = vmatpush1.bf16.msra.mxu0 %v7176_v21  ;;  %4379 = vmatprep.subr.bf16.mxu1 %v7181_v6  ;;  %v7191_v6 = vld [vmem:[#allocation6 + $0x380] ss:$16 sps:$4 sm:$0xff]   ;;  %v7199_v2 = vld [vmem:[#allocation6 + $0x3a4] ss:$16 sps:$4 sm:$0xff]  }
 0x232   :  { %v2327_v59 = vpop.f32.mrb[24].mxu0  ;;  %4328 = vmatprep.mubr.bf16.mxu1 %v8321_v63  ;;  %4700 = vmatprep.subr.bf16.mxu0 %v7184_v29  ;;  %v7202_v29 = vld [vmem:[#allocation6 + $0x28c] ss:$16 sps:$4 sm:$0xff]  }
 0x233   :  { %v2666_v26 = vpop.f32.mrb[24].mxu1  ;;  %v2329_v14 = vpop.f32.mrb[25].mxu0  ;;  %4329 = vmatmul.mubr.bf16.gmra.mrb[52].mxu1 %v8316_v11  ;;  %v6150_v16 = vadd.f32 %v2327_v59, %v8194_v17 }
 0x234   :  { %v2668_v49 = vpop.f32.mrb[25].mxu1  ;;  %v2331_v30 = vpop.f32.mrb[26].mxu0  ;;  %4380 = vmatpush1.bf16.msra.mxu1 %v7179_v56  ;;  %v6182_v40 = vadd.f32 %v2666_v26, %v8198_v23  ;;  %v6151_v46 = vadd.f32 %v2329_v14, %v8202_v34 }
 0x235   :  { %v2670_v31 = vpop.f32.mrb[26].mxu1  ;;  %v6152_v60 = vadd.f32 %v2331_v30, %v8194_v17  ;;  %4701 = vmatpush1.bf16.msra.mxu0 %v7182_v35  ;;  %v2333_v45 = vpop.f32.mrb[27].mxu0  ;;  %4381 = vmatprep.subr.bf16.mxu1 %v7187_v12  ;;  %v6183_v19 = vadd.f32 %v2668_v49, %v8206_v27  ;;  %v7200_v30 = vld [vmem:[#allocation6 + $0x288] ss:$16 sps:$4 sm:$0xff]  }
 0x236   :  { %v6184_v44 = vadd.f32 %v2670_v31, %v8198_v23  ;;  %v2672_v52 = vpop.f32.mrb[27].mxu1  ;;  %v6153_v20 = vadd.f32 %v2333_v45, %v8202_v34  ;;  %4702 = vmatprep.subr.bf16.mxu0 %v7190_v57  ;;  %v7205_v31 = vld [vmem:[#allocation6 + $0x3c4] ss:$16 sps:$4 sm:$0xff]   ;;  %v7208_v45 = vld [vmem:[#allocation6 + $0x2ac] ss:$16 sps:$4 sm:$0xff]  }
 0x237   :  { %v6185_v61 = vadd.f32 %v2672_v52, %v8206_v27  ;;  %v8336_v62 = vpack.c.bf16 %v6152_v60, %v6150_v16  ;;  %4628 = vmatmul.mubr.bf16.gmra.mrb[68].mxu0 %v8236_v9 }
 0x238   :  { %v8338_v41 = vpack.c.bf16 %v6184_v44, %v6182_v40  ;;  %v8341_v37 = vpack.c.bf16 %v6153_v20, %v6151_v46  ;;  %4382 = vmatpush1.bf16.msra.mxu1 %v7185_v28  ;;  %4637 = vmatprep.mubr.bf16.mxu0 %v8261_v54  ;;  %v7197_v54 = vld [vmem:[#allocation6 + $0x3a0] ss:$16 sps:$4 sm:$0xff]   ;;  %v7214_v46 = vld [vmem:[#allocation6 + $0x2cc] ss:$16 sps:$4 sm:$0xff]   ;;  %v7244_v20 = vld [vmem:[#allocation6 + $0x404] ss:$16 sps:$4 sm:$0xff]  }
 0x239   :  { %v8343_v21 = vpack.c.bf16 %v6185_v61, %v6183_v19  ;;  %4703 = vmatpush1.bf16.msra.mxu0 %v7188_v4  ;;  %4383 = vmatprep.subr.bf16.mxu1 %v7193_v58  ;;  %v7203_v58 = vld [vmem:[#allocation6 + $0x3c0] ss:$16 sps:$4 sm:$0xff]   ;;  %v7212_v19 = vld [vmem:[#allocation6 + $0x2c8] ss:$16 sps:$4 sm:$0xff]  }
 0x23a   :  { %v2337_v18 = vpop.f32.mrb[28].mxu0  ;;  %4338 = vmatprep.mubr.bf16.mxu1 %v8341_v37  ;;  %4704 = vmatprep.subr.bf16.mxu0 %v7196_v32  ;;  %v7242_v61 = vld [vmem:[#allocation6 + $0x400] ss:$16 sps:$4 sm:$0xff]   ;;  %v7215_v32 = vld [vmem:[#allocation6 + $0x2e8] ss:$16 sps:$4 sm:$0xff]  }
 0x23b   :  { %v2676_v7 = vpop.f32.mrb[28].mxu1  ;;  %v2339_v56 = vpop.f32.mrb[29].mxu0  ;;  %4339 = vmatmul.mubr.bf16.gmra.mrb[56].mxu1 %v8336_v62  ;;  %v6154_v35 = vadd.f32 %v2337_v18, %v8194_v17  ;;  %v7218_v18 = vld [vmem:[#allocation6 + $0x308] ss:$16 sps:$4 sm:$0xff]  }
 0x23c   :  { %v2678_v9 = vpop.f32.mrb[29].mxu1  ;;  %v2341_v12 = vpop.f32.mrb[30].mxu0  ;;  %4384 = vmatpush1.bf16.msra.mxu1 %v7191_v6  ;;  %v6186_v26 = vadd.f32 %v2676_v7, %v8198_v23  ;;  %v6155_v28 = vadd.f32 %v2339_v56, %v8202_v34  ;;  %v7250_v6 = vld [vmem:[#allocation6 + $0x424] ss:$16 sps:$4 sm:$0xff]   ;;  %v7223_v7 = vld [vmem:[#allocation6 + $0x32c] ss:$16 sps:$4 sm:$0xff]  }
 0x23d   :  { %v2680_v59 = vpop.f32.mrb[30].mxu1  ;;  %v6156_v57 = vadd.f32 %v2341_v12, %v8194_v17  ;;  %4705 = vmatpush1.bf16.msra.mxu0 %v7194_v33  ;;  %v2343_v49 = vpop.f32.mrb[31].mxu0  ;;  %4385 = vmatprep.subr.bf16.mxu1 %v7199_v2  ;;  %v6187_v40 = vadd.f32 %v2678_v9, %v8206_v27  ;;  %v7220_v33 = vld [vmem:[#allocation6 + $0x30c] ss:$16 sps:$4 sm:$0xff]   ;;  %v7248_v2 = vld [vmem:[#allocation6 + $0x420] ss:$16 sps:$4 sm:$0xff]  }
 0x23e   :  { %v6188_v14 = vadd.f32 %v2680_v59, %v8198_v23  ;;  %v2682_v16 = vpop.f32.mrb[31].mxu1  ;;  %v6157_v60 = vadd.f32 %v2343_v49, %v8202_v34  ;;  %4706 = vmatprep.subr.bf16.mxu0 %v7202_v29  ;;  %v7206_v34 = vld [vmem:[#allocation6 + $0x2a8] ss:$16 sps:$4 sm:$0xff]   ;;  %v7262_v56 = vld [vmem:[#allocation6 + $0x464] ss:$16 sps:$4 sm:$0xff]  }
 0x23f   :  { %v6189_v44 = vadd.f32 %v2682_v16, %v8206_v27  ;;  %v8356_v52 = vpack.c.bf16 %v6156_v57, %v6154_v35  ;;  %4638 = vmatmul.mubr.bf16.gmra.mrb[72].mxu0 %v8256_v39  ;;  %v7211_v27 = vld [vmem:[#allocation6 + $0x3e4] ss:$16 sps:$4 sm:$0xff]   ;;  %v7209_v39 = vld [vmem:[#allocation6 + $0x3e0] ss:$16 sps:$4 sm:$0xff]   ;;  %v7221_v29 = vld [vmem:[#allocation6 + $0x328] ss:$16 sps:$4 sm:$0xff]  }
 0x240   :  { %v8358_v17 = vpack.c.bf16 %v6188_v14, %v6186_v26  ;;  %v8361_v23 = vpack.c.bf16 %v6157_v60, %v6155_v28  ;;  %4386 = vmatpush1.bf16.msra.mxu1 %v7197_v54  ;;  %4647 = vmatprep.mubr.bf16.mxu0 %v8281_v51  ;;  %v7217_v51 = vld [vmem:[#allocation6 + $0x2ec] ss:$16 sps:$4 sm:$0xff]   ;;  %v7260_v35 = vld [vmem:[#allocation6 + $0x460] ss:$16 sps:$4 sm:$0xff]   ;;  %v7224_v12 = vld [vmem:[#allocation6 + $0x348] ss:$16 sps:$4 sm:$0xff]  }
 0x241   :  { %v8363_v4 = vpack.c.bf16 %v6189_v44, %v6187_v40  ;;  %4707 = vmatpush1.bf16.msra.mxu0 %v7200_v30  ;;  %4387 = vmatprep.subr.bf16.mxu1 %v7205_v31  ;;  %v7226_v9 = vld [vmem:[#allocation6 + $0x34c] ss:$16 sps:$4 sm:$0xff]   ;;  %v7266_v59 = vld [vmem:[#allocation6 + $0x480] ss:$16 sps:$4 sm:$0xff]   ;;  %v7227_v54 = vld [vmem:[#allocation6 + $0x368] ss:$16 sps:$4 sm:$0xff]  }
 0x242   :  { %4348 = vmatprep.mubr.bf16.mxu1 %v8361_v23  ;;  %4708 = vmatprep.subr.bf16.mxu0 %v7208_v45  ;;  %v7274_v26 = vld [vmem:[#allocation6 + $0x4a4] ss:$16 sps:$4 sm:$0xff]   ;;  %v7232_v57 = vld [vmem:[#allocation6 + $0x38c] ss:$16 sps:$4 sm:$0xff]   ;;  %v7272_v14 = vld [vmem:[#allocation6 + $0x4a0] ss:$16 sps:$4 sm:$0xff]  }
 0x243   :  { %4349 = vmatmul.mubr.bf16.gmra.mrb[60].mxu1 %v8356_v52  ;;  %v7230_v49 = vld [vmem:[#allocation6 + $0x388] ss:$16 sps:$4 sm:$0xff]   ;;  %v7278_v16 = vld [vmem:[#allocation6 + $0x4c0] ss:$16 sps:$4 sm:$0xff]   ;;  %v7286_v31 = vld [vmem:[#allocation6 + $0x4e4] ss:$16 sps:$4 sm:$0xff]  }
 0x244   :  { %4388 = vmatpush1.bf16.msra.mxu1 %v7203_v58  ;;  %4391 = vmatprep.mubr.bf16.mxu1 %v8223_v1  ;;  %v7233_v30 = vld [vmem:[#allocation6 + $0x3a8] ss:$16 sps:$4 sm:$0xff]   ;;  %v7238_v28 = vld [vmem:[#allocation6 + $0x3cc] ss:$16 sps:$4 sm:$0xff]   ;;  %v7284_v40 = vld [vmem:[#allocation6 + $0x4e0] ss:$16 sps:$4 sm:$0xff]  }
 0x245   :  { %4709 = vmatpush1.bf16.msra.mxu0 %v7206_v34  ;;  %4389 = vmatprep.subr.bf16.mxu1 %v7211_v27  ;;  %v7236_v60 = vld [vmem:[#allocation6 + $0x3c8] ss:$16 sps:$4 sm:$0xff]   ;;  %v7241_v44 = vld [vmem:[#allocation6 + $0x3ec] ss:$16 sps:$4 sm:$0xff]   ;;  %v7290_v45 = vld [vmem:[#allocation6 + $0x500] ss:$16 sps:$4 sm:$0xff]  }
 0x246   :  { %4710 = vmatprep.subr.bf16.mxu0 %v7214_v46  ;;  %v7298_v58 = vld [vmem:[#allocation6 + $0x524] ss:$16 sps:$4 sm:$0xff]   ;;  %v8387_v34 = vld [vmem:[#allocation6 + $0x40c] ss:$16 sps:$4 sm:$0xff]   ;;  %v7296_v27 = vld [vmem:[#allocation6 + $0x520] ss:$16 sps:$4 sm:$0xff]  }
 0x247   :  { %4648 = vmatmul.mubr.bf16.gmra.mrb[76].mxu0 %v8276_v3  ;;  %v7256_v3 = vld [vmem:[#allocation6 + $0x444] ss:$16 sps:$4 sm:$0xff]   ;;  %v8391_v46 = vld [vmem:[#allocation6 + $0x408] ss:$16 sps:$4 sm:$0xff]  }
 0x248   :  { %4390 = vmatpush1.bf16.msra.mxu1 %v7209_v39  ;;  %4657 = vmatprep.mubr.bf16.mxu0 %v8301_v0  ;;  %v7254_v0 = vld [vmem:[#allocation6 + $0x440] ss:$16 sps:$4 sm:$0xff]  }
 0x249   :  { %4711 = vmatpush1.bf16.msra.mxu0 %v7212_v19  ;;  %4472 = vmatprep.subr.bf16.mxu1 %v7244_v20  ;;  %v7302_v39 = vld [vmem:[#allocation6 + $0x540] ss:$16 sps:$4 sm:$0xff]   ;;  %v8399_v19 = vld [vmem:[#allocation6 + $0x428] ss:$16 sps:$4 sm:$0xff]   ;;  %v7310_v20 = vld [vmem:[#allocation6 + $0x564] ss:$16 sps:$4 sm:$0xff]  }
 0x24a   :  { %4712 = vmatprep.subr.bf16.mxu0 %v7217_v51  ;;  %v8402_v51 = vld [vmem:[#allocation6 + $0x44c] ss:$16 sps:$4 sm:$0xff]  }
 0x24b   :  { %4392 = vmatmul.mubr.bf16.vlgmr.msra.gmra.mrb[32].mxu1 %v8218_v43 }
 0x24c   :  { %4401 = vmatprep.mubr.bf16.mxu1 %v8243_v42  ;;  %4473 = vmatpush1.bf16.msra.mxu1 %v7242_v61  ;;  %v8407_v61 = vld [vmem:[#allocation6 + $0x448] ss:$16 sps:$4 sm:$0xff]  }
 0x24d   :  { %4713 = vmatpush1.bf16.msra.mxu0 %v7215_v32  ;;  %4474 = vmatprep.subr.bf16.mxu1 %v7250_v6  ;;  %v7316_v32 = vld [vmem:[#allocation6 + $0x584] ss:$16 sps:$4 sm:$0xff]   ;;  %v7314_v6 = vld [vmem:[#allocation6 + $0x580] ss:$16 sps:$4 sm:$0xff]  }
 0x24e   :  { %4714 = vmatprep.subr.bf16.mxu0 %v7220_v33  ;;  %v8415_v33 = vld [vmem:[#allocation6 + $0x468] ss:$16 sps:$4 sm:$0xff]  }
 0x24f   :  { %4658 = vmatmul.mubr.bf16.gmra.mrb[80].mxu0 %v8296_v38  ;;  %v7268_v38 = vld [vmem:[#allocation6 + $0x484] ss:$16 sps:$4 sm:$0xff]  }
 0x250   :  { %4667 = vmatprep.mubr.bf16.mxu0 %v8321_v63  ;;  %4475 = vmatpush1.bf16.msra.mxu1 %v7248_v2  ;;  %v7229_v63 = vld [vmem:[#allocation6 + $0x36c] ss:$16 sps:$4 sm:$0xff]   ;;  %v7322_v2 = vld [vmem:[#allocation6 + $0x5a4] ss:$16 sps:$4 sm:$0xff]  }
 0x251   :  { %4715 = vmatpush1.bf16.msra.mxu0 %v7218_v18  ;;  %4476 = vmatprep.subr.bf16.mxu1 %v7256_v3  ;;  %v8418_v18 = vld [vmem:[#allocation6 + $0x48c] ss:$16 sps:$4 sm:$0xff]   ;;  %v8423_v3 = vld [vmem:[#allocation6 + $0x488] ss:$16 sps:$4 sm:$0xff]  }
 0x252   :  { %4716 = vmatprep.subr.bf16.mxu0 %v7223_v7  ;;  %v7328_v7 = vld [vmem:[#allocation6 + $0x5c4] ss:$16 sps:$4 sm:$0xff]  }
 0x253   :  { %4402 = vmatmul.mubr.bf16.gmra.mrb[36].mxu1 %v8238_v25 }
 0x254   :  { %4411 = vmatprep.mubr.bf16.mxu1 %v8263_v53  ;;  %4477 = vmatpush1.bf16.msra.mxu1 %v7254_v0  ;;  %v7326_v0 = vld [vmem:[#allocation6 + $0x5c0] ss:$16 sps:$4 sm:$0xff]  }
 0x255   :  { %4717 = vmatpush1.bf16.msra.mxu0 %v7221_v29  ;;  %4478 = vmatprep.subr.bf16.mxu1 %v7262_v56  ;;  %v8431_v29 = vld [vmem:[#allocation6 + $0x4a8] ss:$16 sps:$4 sm:$0xff]   ;;  %v7334_v56 = vld [vmem:[#allocation6 + $0x5e4] ss:$16 sps:$4 sm:$0xff]  }
 0x256   :  { %4718 = vmatprep.subr.bf16.mxu0 %v7226_v9  ;;  %v8434_v9 = vld [vmem:[#allocation6 + $0x4cc] ss:$16 sps:$4 sm:$0xff]  }
 0x257   :  { %4668 = vmatmul.mubr.bf16.gmra.mrb[84].mxu0 %v8316_v11  ;;  %v7280_v11 = vld [vmem:[#allocation6 + $0x4c4] ss:$16 sps:$4 sm:$0xff]  }
 0x258   :  { %4677 = vmatprep.mubr.bf16.mxu0 %v8341_v37  ;;  %4479 = vmatpush1.bf16.msra.mxu1 %v7260_v35  ;;  %v7235_v37 = vld [vmem:[#allocation6 + $0x3ac] ss:$16 sps:$4 sm:$0xff]   ;;  %v7332_v35 = vld [vmem:[#allocation6 + $0x5e0] ss:$16 sps:$4 sm:$0xff]  }
 0x259   :  { %4719 = vmatpush1.bf16.msra.mxu0 %v7224_v12  ;;  %4480 = vmatprep.subr.bf16.mxu1 %v7268_v38  ;;  %v8446_v12 = vld [vmem:[#allocation6 + $0x4e8] ss:$16 sps:$4 sm:$0xff]   ;;  %v8449_v38 = vld [vmem:[#allocation6 + $0x50c] ss:$16 sps:$4 sm:$0xff]  }
 0x25a   :  { %4720 = vmatprep.subr.bf16.mxu0 %v7229_v63  ;;  %v8453_v63 = vld [vmem:[#allocation6 + $0x508] ss:$16 sps:$4 sm:$0xff]  }
 0x25b   :  { %4412 = vmatmul.mubr.bf16.gmra.mrb[40].mxu1 %v8258_v8 }
 0x25c   :  { %4421 = vmatprep.mubr.bf16.mxu1 %v8283_v47  ;;  %4481 = vmatpush1.bf16.msra.mxu1 %v7266_v59  ;;  %v8464_v59 = vld [vmem:[#allocation6 + $0x54c] ss:$16 sps:$4 sm:$0xff]  }
 0x25d   :  { %4721 = vmatpush1.bf16.msra.mxu0 %v7227_v54  ;;  %4482 = vmatprep.subr.bf16.mxu1 %v7274_v26  ;;  %v8467_v54 = vld [vmem:[#allocation6 + $0x548] ss:$16 sps:$4 sm:$0xff]   ;;  %v8470_v26 = vld [vmem:[#allocation6 + $0x56c] ss:$16 sps:$4 sm:$0xff]  }
 0x25e   :  { %4722 = vmatprep.subr.bf16.mxu0 %v7232_v57  ;;  %v8481_v57 = vld [vmem:[#allocation6 + $0x588] ss:$16 sps:$4 sm:$0xff]  }
 0x25f   :  { %4678 = vmatmul.mubr.bf16.gmra.mrb[88].mxu0 %v8336_v62  ;;  %v7292_v62 = vld [vmem:[#allocation6 + $0x504] ss:$16 sps:$4 sm:$0xff]  }
 0x260   :  { %4687 = vmatprep.mubr.bf16.mxu0 %v8361_v23  ;;  %4483 = vmatpush1.bf16.msra.mxu1 %v7272_v14  ;;  %v7239_v23 = vld [vmem:[#allocation6 + $0x3e8] ss:$16 sps:$4 sm:$0xff]   ;;  %v8484_v14 = vld [vmem:[#allocation6 + $0x5ac] ss:$16 sps:$4 sm:$0xff]  }
 0x261   :  { %4723 = vmatpush1.bf16.msra.mxu0 %v7230_v49  ;;  %4484 = vmatprep.subr.bf16.mxu1 %v7280_v11  ;;  %v8495_v49 = vld [vmem:[#allocation6 + $0x5c8] ss:$16 sps:$4 sm:$0xff]   ;;  %v8498_v11 = vld [vmem:[#allocation6 + $0x5ec] ss:$16 sps:$4 sm:$0xff]  }
 0x262   :  { %4724 = vmatprep.subr.bf16.mxu0 %v7235_v37  ;;  %v559_v37 = vsub.s32 5, %v8184_v48 }
 0x263   :  { %4422 = vmatmul.mubr.bf16.gmra.mrb[44].mxu1 %v8278_v13 }
 0x264   :  { %4431 = vmatprep.mubr.bf16.mxu1 %v8303_v24  ;;  %4485 = vmatpush1.bf16.msra.mxu1 %v7278_v16  ;;  %v7402_v16 = vld [vmem:[#allocation4] sm:$0x3f] }
 0x265   :  { %4725 = vmatpush1.bf16.msra.mxu0 %v7233_v30  ;;  %4486 = vmatprep.subr.bf16.mxu1 %v7286_v31 }
 0x266   :  { %4726 = vmatprep.subr.bf16.mxu0 %v7238_v28  ;;  %v8510_v28 = vrot.slane %v7402_v16, %v559_v37 }
 0x267   :  { %4688 = vmatmul.mubr.bf16.gmra.mrb[92].mxu0 %v8356_v52  ;;  %v7304_v52 = vld [vmem:[#allocation6 + $0x544] ss:$16 sps:$4 sm:$0xff]  }
 0x268   :  { %4730 = vmatprep.mubr.bf16.mxu0 %v8223_v1  ;;  %4487 = vmatpush1.bf16.msra.mxu1 %v7284_v40  ;;  %v8394_v1 = vld [vmem:[#allocation6 + $0x42c] ss:$16 sps:$4 sm:$0xff]  }
 0x269   :  { %4727 = vmatpush1.bf16.msra.mxu0 %v7236_v60  ;;  %4488 = vmatprep.subr.bf16.mxu1 %v7292_v62 }
 0x26a   :  { %4728 = vmatprep.subr.bf16.mxu0 %v7241_v44 }
 0x26b   :  { %4432 = vmatmul.mubr.bf16.gmra.mrb[48].mxu1 %v8298_v22 }
 0x26c   :  { %4441 = vmatprep.mubr.bf16.mxu1 %v8323_v50  ;;  %4489 = vmatpush1.bf16.msra.mxu1 %v7290_v45 }
 0x26d   :  { %4729 = vmatpush1.bf16.msra.mxu0 %v7239_v23  ;;  %4490 = vmatprep.subr.bf16.mxu1 %v7298_v58 }
 0x26e   :  { %4811 = vmatprep.subr.bf16.mxu0 %v8387_v34 }
 0x270   :  { %4731 = vmatmul.mubr.bf16.vlgmr.msra.gmra.mrb[64].mxu0 %v8218_v43  ;;  %4491 = vmatpush1.bf16.msra.mxu1 %v7296_v27  ;;  %v7308_v43 = vld [vmem:[#allocation6 + $0x560] ss:$16 sps:$4 sm:$0xff]  }
 0x271   :  { %4740 = vmatprep.mubr.bf16.mxu0 %v8243_v42  ;;  %4812 = vmatpush1.bf16.msra.mxu0 %v8391_v46  ;;  %v8410_v42 = vld [vmem:[#allocation6 + $0x46c] ss:$16 sps:$4 sm:$0xff]  }
 0x272   :  { %4813 = vmatprep.subr.bf16.mxu0 %v8394_v1  ;;  %4492 = vmatprep.subr.bf16.mxu1 %v7304_v52 }
 0x273   :  { %4442 = vmatmul.mubr.bf16.gmra.mrb[52].mxu1 %v8318_v15 }
 0x274   :  { %4451 = vmatprep.mubr.bf16.mxu1 %v8343_v21  ;;  %4493 = vmatpush1.bf16.msra.mxu1 %v7302_v39 }
 0x275   :  { %4814 = vmatpush1.bf16.msra.mxu0 %v8399_v19  ;;  %4494 = vmatprep.subr.bf16.mxu1 %v7310_v20 }
 0x276   :  { %4815 = vmatprep.subr.bf16.mxu0 %v8402_v51 }
 0x278   :  { %4741 = vmatmul.mubr.bf16.gmra.mrb[68].mxu0 %v8238_v25  ;;  %4495 = vmatpush1.bf16.msra.mxu1 %v7308_v43  ;;  %v7320_v25 = vld [vmem:[#allocation6 + $0x5a0] ss:$16 sps:$4 sm:$0xff]  }
 0x279   :  { %4750 = vmatprep.mubr.bf16.mxu0 %v8263_v53  ;;  %4816 = vmatpush1.bf16.msra.mxu0 %v8407_v61  ;;  %v8426_v53 = vld [vmem:[#allocation6 + $0x4ac] ss:$16 sps:$4 sm:$0xff]  }
 0x27a   :  { %4817 = vmatprep.subr.bf16.mxu0 %v8410_v42  ;;  %4496 = vmatprep.subr.bf16.mxu1 %v7316_v32 }
 0x27b   :  { %4452 = vmatmul.mubr.bf16.gmra.mrb[56].mxu1 %v8338_v41 }
 0x27c   :  { %4461 = vmatprep.mubr.bf16.mxu1 %v8363_v4  ;;  %4497 = vmatpush1.bf16.msra.mxu1 %v7314_v6 }
 0x27d   :  { %4818 = vmatpush1.bf16.msra.mxu0 %v8415_v33  ;;  %4498 = vmatprep.subr.bf16.mxu1 %v7322_v2 }
 0x27e   :  { %4819 = vmatprep.subr.bf16.mxu0 %v8418_v18 }
 0x280   :  { %4751 = vmatmul.mubr.bf16.gmra.mrb[72].mxu0 %v8258_v8  ;;  %4499 = vmatpush1.bf16.msra.mxu1 %v7320_v25  ;;  %v8438_v8 = vld [vmem:[#allocation6 + $0x4c8] ss:$16 sps:$4 sm:$0xff]  }
 0x281   :  { %4760 = vmatprep.mubr.bf16.mxu0 %v8283_v47  ;;  %4820 = vmatpush1.bf16.msra.mxu0 %v8423_v3  ;;  %v8441_v47 = vld [vmem:[#allocation6 + $0x4ec] ss:$16 sps:$4 sm:$0xff]  }
 0x282   :  { %4821 = vmatprep.subr.bf16.mxu0 %v8426_v53  ;;  %4500 = vmatprep.subr.bf16.mxu1 %v7328_v7 }
 0x283   :  { %4462 = vmatmul.mubr.bf16.gmra.mrb[60].mxu1 %v8358_v17 }
 0x284   :  { %4501 = vmatpush1.bf16.msra.mxu1 %v7326_v0 }
 0x285   :  { %4822 = vmatpush1.bf16.msra.mxu0 %v8431_v29  ;;  %4502 = vmatprep.subr.bf16.mxu1 %v7334_v56 }
 0x286   :  { %4823 = vmatprep.subr.bf16.mxu0 %v8434_v9 }
 0x288   :  { %4761 = vmatmul.mubr.bf16.gmra.mrb[76].mxu0 %v8278_v13  ;;  %4503 = vmatpush1.bf16.msra.mxu1 %v7332_v35  ;;  %v8456_v13 = vld [vmem:[#allocation6 + $0x52c] ss:$16 sps:$4 sm:$0xff]  }
 0x289   :  { %4770 = vmatprep.mubr.bf16.mxu0 %v8303_v24  ;;  %4824 = vmatpush1.bf16.msra.mxu0 %v8438_v8  ;;  %v8461_v24 = vld [vmem:[#allocation6 + $0x528] ss:$16 sps:$4 sm:$0xff]  }
 0x28a   :  { %4825 = vmatprep.subr.bf16.mxu0 %v8441_v47  ;;  %6094 = vmatprep.subr.bf16.mxu1 %v8387_v34 }
 0x28d   :  { %4826 = vmatpush1.bf16.msra.mxu0 %v8446_v12 }
 0x28e   :  { %4827 = vmatprep.subr.bf16.mxu0 %v8449_v38 }
 0x290   :  { %4771 = vmatmul.mubr.bf16.gmra.mrb[80].mxu0 %v8298_v22  ;;  %v8475_v22 = vld [vmem:[#allocation6 + $0x568] ss:$16 sps:$4 sm:$0xff]  }
 0x291   :  { %4780 = vmatprep.mubr.bf16.mxu0 %v8323_v50  ;;  %4828 = vmatpush1.bf16.msra.mxu0 %v8453_v63  ;;  %v8478_v50 = vld [vmem:[#allocation6 + $0x58c] ss:$16 sps:$4 sm:$0xff]  }
 0x292   :  { %4829 = vmatprep.subr.bf16.mxu0 %v8456_v13 }
 0x295   :  { %4830 = vmatpush1.bf16.msra.mxu0 %v8461_v24 }
 0x296   :  { %4831 = vmatprep.subr.bf16.mxu0 %v8464_v59 }
 0x298   :  { %4781 = vmatmul.mubr.bf16.gmra.mrb[84].mxu0 %v8318_v15  ;;  %v8489_v15 = vld [vmem:[#allocation6 + $0x5a8] ss:$16 sps:$4 sm:$0xff]  }
 0x299   :  { %4790 = vmatprep.mubr.bf16.mxu0 %v8343_v21  ;;  %4832 = vmatpush1.bf16.msra.mxu0 %v8467_v54  ;;  %v8492_v21 = vld [vmem:[#allocation6 + $0x5cc] ss:$16 sps:$4 sm:$0xff]  }
 0x29a   :  { %4833 = vmatprep.subr.bf16.mxu0 %v8470_v26 }
 0x29d   :  { %4834 = vmatpush1.bf16.msra.mxu0 %v8475_v22 }
 0x29e   :  { %4835 = vmatprep.subr.bf16.mxu0 %v8478_v50 }
 0x2a0   :  { %4791 = vmatmul.mubr.bf16.gmra.mrb[88].mxu0 %v8338_v41  ;;  %v8502_v41 = vld [vmem:[#allocation6 + $0x5e8] ss:$16 sps:$4 sm:$0xff]  }
 0x2a1   :  { %4800 = vmatprep.mubr.bf16.mxu0 %v8363_v4  ;;  %4836 = vmatpush1.bf16.msra.mxu0 %v8481_v57  ;;  %v555_v4 = vsub.s32 4, %v8184_v48 }
 0x2a2   :  { %4837 = vmatprep.subr.bf16.mxu0 %v8484_v14 }
 0x2a3   :  { %v8508_v30 = vrot.slane %v7402_v16, %v555_v4 }
 0x2a5   :  { %4838 = vmatpush1.bf16.msra.mxu0 %v8489_v15 }
 0x2a6   :  { %4839 = vmatprep.subr.bf16.mxu0 %v8492_v21 }
 0x2a8   :  { %4801 = vmatmul.mubr.bf16.gmra.mrb[92].mxu0 %v8358_v17 }
 0x2a9   :  { %4840 = vmatpush1.bf16.msra.mxu0 %v8495_v49 }
 0x2aa   :  { %4841 = vmatprep.subr.bf16.mxu0 %v8498_v11 }
 0x2ad   :  { %4842 = vmatpush1.bf16.msra.mxu0 %v8502_v41 }
 0x2c2   :  { %v2945_v31 = vpop.f32.mrb[32].mxu0 }
 0x2c3   :  { %v2947_v40 = vpop.f32.mrb[33].mxu0  ;;  %v6190_v60 = vadd.f32 %v2945_v31, %v8508_v30 }
 0x2c4   :  { %v2949_v17 = vpop.f32.mrb[34].mxu0  ;;  %v6191_v45 = vadd.f32 %v2947_v40, %v8510_v28 }
 0x2c5   :  { %v6192_v62 = vadd.f32 %v2949_v17, %v8508_v30  ;;  %v2951_v44 = vpop.f32.mrb[35].mxu0 }
 0x2c6   :  { %v6193_v23 = vadd.f32 %v2951_v44, %v8510_v28 }
 0x2c7   :  { %v3028_v58 = vpack.c.bf16 %v6192_v62, %v6190_v60 }
 0x2c8   :  { %v3029_v34 = vpack.c.bf16 %v6193_v23, %v6191_v45 }
 0x2ca   :  { %v2955_v27 = vpop.f32.mrb[36].mxu0  ;;  %4504 = vmatprep.mubr.bf16.mxu1 %v3029_v34  ;;  %4843 = vmatprep.mubr.bf16.mxu0 %v3029_v34 }
 0x2cb   :  { %v2957_v52 = vpop.f32.mrb[37].mxu0  ;;  %4505 = vmatmul.mubr.bf16.vlgmr.msra.gmra.mrb[32].mxu1 %v3028_v58  ;;  %4844 = vmatmul.mubr.bf16.vlgmr.msra.gmra.mrb[64].mxu0 %v3028_v58  ;;  %v6194_v20 = vadd.f32 %v2955_v27, %v8508_v30 }
 0x2cc   :  { %v2959_v39 = vpop.f32.mrb[38].mxu0  ;;  %6110 = vmatpush1.bf16.msra.mxu1 %v8391_v46  ;;  %v6195_v6 = vadd.f32 %v2957_v52, %v8510_v28 }
 0x2cd   :  { %v6196_v43 = vadd.f32 %v2959_v39, %v8508_v30  ;;  %v2961_v32 = vpop.f32.mrb[39].mxu0  ;;  %6095 = vmatprep.subr.bf16.mxu1 %v8394_v1 }
 0x2ce   :  { %v6197_v2 = vadd.f32 %v2961_v32, %v8510_v28 }
 0x2cf   :  { %v3034_v25 = vpack.c.bf16 %v6196_v43, %v6194_v20 }
 0x2d0   :  { %v3035_v7 = vpack.c.bf16 %v6197_v2, %v6195_v6  ;;  %6111 = vmatpush1.bf16.msra.mxu1 %v8399_v19 }
 0x2d1   :  { %6096 = vmatprep.subr.bf16.mxu1 %v8402_v51 }
 0x2d2   :  { %v2965_v0 = vpop.f32.mrb[40].mxu0  ;;  %4514 = vmatprep.mubr.bf16.mxu1 %v3035_v7  ;;  %4853 = vmatprep.mubr.bf16.mxu0 %v3035_v7 }
 0x2d3   :  { %v2967_v46 = vpop.f32.mrb[41].mxu0  ;;  %4515 = vmatmul.mubr.bf16.gmra.mrb[36].mxu1 %v3034_v25  ;;  %4854 = vmatmul.mubr.bf16.gmra.mrb[68].mxu0 %v3034_v25  ;;  %v6198_v1 = vadd.f32 %v2965_v0, %v8508_v30 }
 0x2d4   :  { %v2969_v56 = vpop.f32.mrb[42].mxu0  ;;  %6112 = vmatpush1.bf16.msra.mxu1 %v8407_v61  ;;  %v6199_v19 = vadd.f32 %v2967_v46, %v8510_v28 }
 0x2d5   :  { %v6200_v35 = vadd.f32 %v2969_v56, %v8508_v30  ;;  %v2971_v4 = vpop.f32.mrb[43].mxu0  ;;  %6097 = vmatprep.subr.bf16.mxu1 %v8410_v42 }
 0x2d6   :  { %v6201_v51 = vadd.f32 %v2971_v4, %v8510_v28 }
 0x2d7   :  { %v3040_v37 = vpack.c.bf16 %v6200_v35, %v6198_v1 }
 0x2d8   :  { %v3041_v16 = vpack.c.bf16 %v6201_v51, %v6199_v19  ;;  %6113 = vmatpush1.bf16.msra.mxu1 %v8415_v33 }
 0x2d9   :  { %6098 = vmatprep.subr.bf16.mxu1 %v8418_v18 }
 0x2da   :  { %v2975_v31 = vpop.f32.mrb[44].mxu0  ;;  %4524 = vmatprep.mubr.bf16.mxu1 %v3041_v16  ;;  %4863 = vmatprep.mubr.bf16.mxu0 %v3041_v16 }
 0x2db   :  { %v2977_v61 = vpop.f32.mrb[45].mxu0  ;;  %4525 = vmatmul.mubr.bf16.gmra.mrb[40].mxu1 %v3040_v37  ;;  %4864 = vmatmul.mubr.bf16.gmra.mrb[72].mxu0 %v3040_v37  ;;  %v6202_v42 = vadd.f32 %v2975_v31, %v8508_v30  ;;  %v7344_v31 = vld [vmem:[#allocation9 + $0x58] sm:$0xff]  }
 0x2dc   :  { %v2979_v40 = vpop.f32.mrb[46].mxu0  ;;  %6114 = vmatpush1.bf16.msra.mxu1 %v8423_v3  ;;  %v6203_v33 = vadd.f32 %v2977_v61, %v8510_v28  ;;  %v7348_v61 = vld [vmem:[#allocation9 + $0x68] sm:$0xff]  }
 0x2dd   :  { %v6204_v17 = vadd.f32 %v2979_v40, %v8508_v30  ;;  %v2981_v60 = vpop.f32.mrb[47].mxu0  ;;  %6099 = vmatprep.subr.bf16.mxu1 %v8426_v53  ;;  %v7349_v40 = vld [vmem:[#allocation9 + $0x28] sm:$0xff]  }
 0x2de   :  { %v6205_v18 = vadd.f32 %v2981_v60, %v8510_v28  ;;  %v7352_v60 = vld [vmem:[#allocation9 + $0x78] sm:$0xff]  }
 0x2df   :  { %v3046_v62 = vpack.c.bf16 %v6204_v17, %v6202_v42  ;;  %v7350_v42 = vld [vmem:[#allocation9 + $0x70] sm:$0xff]  }
 0x2e0   :  { %v3047_v44 = vpack.c.bf16 %v6205_v18, %v6203_v33  ;;  %6115 = vmatpush1.bf16.msra.mxu1 %v8431_v29  ;;  %v7351_v17 = vld [vmem:[#allocation9 + $0x30] sm:$0xff]   ;;  %v7353_v33 = vld [vmem:[#allocation9 + $0x38] sm:$0xff]   ;;  %v7354_v18 = vld [vmem:[#allocation9 + $0xc0] sm:$0xff]  }
 0x2e1   :  { %6100 = vmatprep.subr.bf16.mxu1 %v8434_v9 }
 0x2e2   :  { %v2985_v45 = vpop.f32.mrb[48].mxu0  ;;  %4534 = vmatprep.mubr.bf16.mxu1 %v3047_v44  ;;  %4873 = vmatprep.mubr.bf16.mxu0 %v3047_v44 }
 0x2e3   :  { %v2987_v3 = vpop.f32.mrb[49].mxu0  ;;  %4535 = vmatmul.mubr.bf16.gmra.mrb[44].mxu1 %v3046_v62  ;;  %4874 = vmatmul.mubr.bf16.gmra.mrb[76].mxu0 %v3046_v62  ;;  %v6206_v53 = vadd.f32 %v2985_v45, %v8508_v30 }
 0x2e4   :  { %v2989_v23 = vpop.f32.mrb[50].mxu0  ;;  %6116 = vmatpush1.bf16.msra.mxu1 %v8438_v8  ;;  %v6207_v29 = vadd.f32 %v2987_v3, %v8510_v28 }
 0x2e5   :  { %v6208_v58 = vadd.f32 %v2989_v23, %v8508_v30  ;;  %v2991_v34 = vpop.f32.mrb[51].mxu0  ;;  %6101 = vmatprep.subr.bf16.mxu1 %v8441_v47 }
 0x2e6   :  { %v6209_v9 = vadd.f32 %v2991_v34, %v8510_v28 }
 0x2e7   :  { %v3052_v27 = vpack.c.bf16 %v6208_v58, %v6206_v53 }
 0x2e8   :  { %v3053_v52 = vpack.c.bf16 %v6209_v9, %v6207_v29  ;;  %6117 = vmatpush1.bf16.msra.mxu1 %v8446_v12 }
 0x2e9   :  { %6102 = vmatprep.subr.bf16.mxu1 %v8449_v38 }
 0x2ea   :  { %v2995_v39 = vpop.f32.mrb[52].mxu0  ;;  %4544 = vmatprep.mubr.bf16.mxu1 %v3053_v52 }
 0x2eb   :  { %v2997_v8 = vpop.f32.mrb[53].mxu0  ;;  %4545 = vmatmul.mubr.bf16.gmra.mrb[48].mxu1 %v3052_v27  ;;  %v6210_v43 = vadd.f32 %v2995_v39, %v8508_v30 }
 0x2ec   :  { %v2999_v20 = vpop.f32.mrb[54].mxu0  ;;  %6118 = vmatpush1.bf16.msra.mxu1 %v8453_v63  ;;  %v6211_v6 = vadd.f32 %v2997_v8, %v8510_v28 }
 0x2ed   :  { %v6212_v47 = vadd.f32 %v2999_v20, %v8508_v30  ;;  %v3001_v32 = vpop.f32.mrb[55].mxu0  ;;  %6103 = vmatprep.subr.bf16.mxu1 %v8456_v13 }
 0x2ee   :  { %v6213_v12 = vadd.f32 %v3001_v32, %v8510_v28 }
 0x2ef   :  { %v3058_v2 = vpack.c.bf16 %v6212_v47, %v6210_v43  ;;  %v3264_v47 = vld [vmem:[#allocation7] sm:$0xf] }
 0x2f0   :  { %v3059_v38 = vpack.c.bf16 %v6213_v12, %v6211_v6  ;;  %6119 = vmatpush1.bf16.msra.mxu1 %v8461_v24  ;;  %v8609_v32 = vrot.slane %v3264_v47, %v539_v55 }
 0x2f1   :  { %6104 = vmatprep.subr.bf16.mxu1 %v8464_v59 }
 0x2f2   :  { %v3005_v25 = vpop.f32.mrb[56].mxu0  ;;  %4554 = vmatprep.mubr.bf16.mxu1 %v3059_v38 }
 0x2f3   :  { %v3007_v63 = vpop.f32.mrb[57].mxu0  ;;  %4555 = vmatmul.mubr.bf16.gmra.mrb[52].mxu1 %v3058_v2  ;;  %v6214_v0 = vadd.f32 %v3005_v25, %v8508_v30 }
 0x2f4   :  { %v3009_v7 = vpop.f32.mrb[58].mxu0  ;;  %6120 = vmatpush1.bf16.msra.mxu1 %v8467_v54  ;;  %v6215_v56 = vadd.f32 %v3007_v63, %v8510_v28 }
 0x2f5   :  { %v6216_v13 = vadd.f32 %v3009_v7, %v8508_v30  ;;  %v3011_v46 = vpop.f32.mrb[59].mxu0  ;;  %6105 = vmatprep.subr.bf16.mxu1 %v8470_v26  ;;  %v8621_v7 = vrot.slane %v3264_v47, %v551_v5 }
 0x2f6   :  { %v6217_v24 = vadd.f32 %v3011_v46, %v8510_v28 }
 0x2f7   :  { %v3064_v1 = vpack.c.bf16 %v6216_v13, %v6214_v0 }
 0x2f8   :  { %v3065_v59 = vpack.c.bf16 %v6217_v24, %v6215_v56  ;;  %6121 = vmatpush1.bf16.msra.mxu1 %v8475_v22 }
 0x2f9   :  { %6106 = vmatprep.subr.bf16.mxu1 %v8478_v50 }
 0x2fa   :  { %v3015_v35 = vpop.f32.mrb[60].mxu0  ;;  %4564 = vmatprep.mubr.bf16.mxu1 %v3065_v59 }
 0x2fb   :  { %v3017_v54 = vpop.f32.mrb[61].mxu0  ;;  %4565 = vmatmul.mubr.bf16.gmra.mrb[56].mxu1 %v3064_v1  ;;  %v6218_v19 = vadd.f32 %v3015_v35, %v8508_v30 }
 0x2fc   :  { %v3019_v4 = vpop.f32.mrb[62].mxu0  ;;  %6122 = vmatpush1.bf16.msra.mxu1 %v8481_v57  ;;  %v6219_v37 = vadd.f32 %v3017_v54, %v8510_v28  ;;  %v7338_v57 = vld [vmem:[#allocation9 + $0x40] sm:$0xff]  }
 0x2fd   :  { %v6220_v26 = vadd.f32 %v3019_v4, %v8508_v30  ;;  %v3021_v51 = vpop.f32.mrb[63].mxu0  ;;  %6107 = vmatprep.subr.bf16.mxu1 %v8484_v14  ;;  %v7339_v14 = vld [vmem:[#allocation9] sm:$0xff]   ;;  %v7340_v30 = vld [vmem:[#allocation9 + $0x48] sm:$0xff]  }
 0x2fe   :  { %v6221_v22 = vadd.f32 %v3021_v51, %v8510_v28  ;;  %v7341_v28 = vld [vmem:[#allocation9 + $0x8] sm:$0xff]  }
 0x2ff   :  { %v3070_v16 = vpack.c.bf16 %v6220_v26, %v6218_v19  ;;  %v7355_v26 = vld [vmem:[#allocation9 + $0x80] sm:$0xff]   ;;  %v7356_v51 = vld [vmem:[#allocation9 + $0xc8] sm:$0xff]  }
 0x300   :  { %v3071_v50 = vpack.c.bf16 %v6221_v22, %v6219_v37  ;;  %6123 = vmatpush1.bf16.msra.mxu1 %v8489_v15  ;;  %v7342_v15 = vld [vmem:[#allocation9 + $0x50] sm:$0xff]  }
 0x301   :  { %6108 = vmatprep.subr.bf16.mxu1 %v8492_v21  ;;  %v7343_v21 = vld [vmem:[#allocation9 + $0x10] sm:$0xff]  }
 0x302   :  { %4574 = vmatprep.mubr.bf16.mxu1 %v3071_v50 }
 0x303   :  { %4575 = vmatmul.mubr.bf16.gmra.mrb[60].mxu1 %v3070_v16 }
 0x304   :  { %6124 = vmatpush1.bf16.msra.mxu1 %v8495_v49  ;;  %4883 = vmatprep.mubr.bf16.mxu1 %v3053_v52  ;;  %v7345_v49 = vld [vmem:[#allocation9 + $0x18] sm:$0xff]  }
 0x305   :  { %6109 = vmatprep.subr.bf16.mxu1 %v8498_v11  ;;  %v7346_v11 = vld [vmem:[#allocation9 + $0x60] sm:$0xff]  }
 0x308   :  { %6125 = vmatpush1.bf16.msra.mxu1 %v8502_v41  ;;  %v7347_v41 = vld [vmem:[#allocation9 + $0x20] sm:$0xff]  }
 0x309   :  { %5966 = vmatprep.subr.bf16.mxu1 %v7338_v57 }
 0x30b   :  { %4884 = vmatmul.mubr.bf16.vlgmr.msra.gmra.mrb[64].mxu1 %v3052_v27 }
 0x30c   :  { %4893 = vmatprep.mubr.bf16.mxu1 %v3059_v38  ;;  %5967 = vmatpush3.bf16.msra.mxu1 %v7339_v14  ;;  %v8617_v38 = vrot.slane %v3264_v47, %v547_v10 }
 0x30d   :  { %5968 = vmatprep.subr.bf16.mxu1 %v7340_v30  ;;  %v7357_v30 = vld [vmem:[#allocation9 + $0x88] sm:$0xff]  }
 0x310   :  { %5969 = vmatpush3.bf16.msra.mxu1 %v7341_v28 }
 0x311   :  { %5970 = vmatprep.subr.bf16.mxu1 %v7342_v15 }
 0x313   :  { %4894 = vmatmul.mubr.bf16.gmra.mrb[68].mxu1 %v3058_v2  ;;  %v8613_v2 = vrot.slane %v3264_v47, %v543_v36 }
 0x314   :  { %4903 = vmatprep.mubr.bf16.mxu1 %v3065_v59  ;;  %5971 = vmatpush3.bf16.msra.mxu1 %v7343_v21 }
 0x315   :  { %5972 = vmatprep.subr.bf16.mxu1 %v7344_v31 }
 0x318   :  { %5973 = vmatpush3.bf16.msra.mxu1 %v7345_v49 }
 0x319   :  { %5974 = vmatprep.subr.bf16.mxu1 %v7346_v11 }
 0x31b   :  { %4904 = vmatmul.mubr.bf16.gmra.mrb[72].mxu1 %v3064_v1 }
 0x31c   :  { %4913 = vmatprep.mubr.bf16.mxu1 %v3071_v50  ;;  %5975 = vmatpush3.bf16.msra.mxu1 %v7347_v41  ;;  %v7358_v41 = vld [vmem:[#allocation9 + $0xd0] sm:$0xff]  }
 0x31d   :  { %5976 = vmatprep.subr.bf16.mxu1 %v7348_v61 }
 0x320   :  { %5977 = vmatpush3.bf16.msra.mxu1 %v7349_v40 }
 0x321   :  { %5978 = vmatprep.subr.bf16.mxu1 %v7350_v42 }
 0x323   :  { %4914 = vmatmul.mubr.bf16.gmra.mrb[76].mxu1 %v3070_v16 }
 0x324   :  { %5979 = vmatpush3.bf16.msra.mxu1 %v7351_v17 }
 0x325   :  { %5980 = vmatprep.subr.bf16.mxu1 %v7352_v60 }
 0x328   :  { %5981 = vmatpush3.bf16.msra.mxu1 %v7353_v33 }
 0x329   :  { %6030 = vmatprep.subr.bf16.mxu1 %v7354_v18 }
 0x363   :  { %v8575_v62 = vpop.f32.mrb[80].mxu0 }
 0x364   :  { %v8577_v44 = vpop.f32.mrb[81].mxu0 }
 0x365   :  { %v8579_v45 = vpop.f32.mrb[82].mxu0 }
 0x366   :  { %v8581_v3 = vpop.f32.mrb[83].mxu0 }
 0x36b   :  { %v8583_v23 = vpop.f32.mrb[84].mxu0 }
 0x36c   :  { %v8585_v53 = vpop.f32.mrb[85].mxu0 }
 0x36d   :  { %v8587_v58 = vpop.f32.mrb[86].mxu0 }
 0x36e   :  { %v8589_v34 = vpop.f32.mrb[87].mxu0 }
 0x373   :  { %v8591_v29 = vpop.f32.mrb[88].mxu0 }
 0x374   :  { %v8593_v9 = vpop.f32.mrb[89].mxu0 }
 0x375   :  { %v8595_v27 = vpop.f32.mrb[90].mxu0 }
 0x376   :  { %v8597_v52 = vpop.f32.mrb[91].mxu0 }
 0x37b   :  { %v8599_v39 = vpop.f32.mrb[92].mxu0 }
 0x37c   :  { %v8601_v8 = vpop.f32.mrb[93].mxu0 }
 0x37d   :  { %v8603_v20 = vpop.f32.mrb[94].mxu0 }
 0x37e   :  { %v8605_v43 = vpop.f32.mrb[95].mxu0 }
 0x39e   :  { %v4506_v6 = vpop.f32.mrb[32].mxu1  ;;  %v4845_v12 = vpop.f32.mrb[64].mxu0 }
 0x39f   :  { %v4508_v25 = vpop.f32.mrb[33].mxu1  ;;  %v4847_v63 = vpop.f32.mrb[65].mxu0  ;;  %v6222_v55 = vadd.f32 %v4506_v6, %v8609_v32  ;;  %v8625_v46 = vadd.f32 %v4845_v12, %v8617_v38  ;;  %v7359_v6 = vld [vmem:[#allocation9 + $0x90] sm:$0xff]   ;;  %v7360_v12 = vld [vmem:[#allocation9 + $0xd8] sm:$0xff]  }
 0x3a0   :  { %v4510_v0 = vpop.f32.mrb[34].mxu1  ;;  %v4849_v13 = vpop.f32.mrb[66].mxu0  ;;  %v6223_v1 = vadd.f32 %v4508_v25, %v8613_v2  ;;  %v8633_v48 = vadd.f32 %v4847_v63, %v8621_v7 }
 0x3a1   :  { %v6224_v36 = vadd.f32 %v4510_v0, %v8609_v32  ;;  %v8629_v56 = vadd.f32 %v4849_v13, %v8617_v38  ;;  %v4512_v10 = vpop.f32.mrb[35].mxu1  ;;  %v4851_v24 = vpop.f32.mrb[67].mxu0 }
 0x3a2   :  { %v6225_v5 = vadd.f32 %v4512_v10, %v8613_v2  ;;  %v8637_v59 = vadd.f32 %v4851_v24, %v8621_v7  ;;  %v7361_v10 = vld [vmem:[#allocation9 + $0x98] sm:$0xff]  }
 0x3a3   :  { %v4924_v35 = vpack.c.bf16 %v6224_v36, %v6222_v55  ;;  %v4926_v54 = vpack.c.bf16 %v8629_v56, %v8625_v46  ;;  %v6288_v46 = vadd.f32 %v8593_v9, %v8621_v7 }
 0x3a4   :  { %v4925_v4 = vpack.c.bf16 %v6225_v5, %v6223_v1  ;;  %v4927_v19 = vpack.c.bf16 %v8637_v59, %v8633_v48  ;;  %v6284_v48 = vadd.f32 %v8589_v34, %v8621_v7  ;;  %v6290_v34 = vadd.f32 %v8595_v27, %v8617_v38 }
 0x3a6   :  { %v4516_v37 = vpop.f32.mrb[36].mxu1  ;;  %v4855_v22 = vpop.f32.mrb[68].mxu0  ;;  %5251 = vmatprep.mubr.bf16.mxu1 %v4925_v4 }
 0x3a7   :  { %v4518_v16 = vpop.f32.mrb[37].mxu1  ;;  %v4857_v50 = vpop.f32.mrb[69].mxu0  ;;  %5252 = vmatmul.mubr.bf16.vlgmr.msra.gmra.mrb[80].mxu1 %v4924_v35  ;;  %v6226_v28 = vadd.f32 %v4516_v37, %v8609_v32  ;;  %v8645_v15 = vadd.f32 %v4855_v22, %v8617_v38 }
 0x3a8   :  { %v4520_v57 = vpop.f32.mrb[38].mxu1  ;;  %v4859_v14 = vpop.f32.mrb[70].mxu0  ;;  %6031 = vmatpush3.bf16.msra.mxu1 %v7355_v26  ;;  %v6227_v61 = vadd.f32 %v4518_v16, %v8613_v2  ;;  %v8653_v40 = vadd.f32 %v4857_v50, %v8621_v7 }
 0x3a9   :  { %v6228_v21 = vadd.f32 %v4520_v57, %v8609_v32  ;;  %v8649_v31 = vadd.f32 %v4859_v14, %v8617_v38  ;;  %v4522_v49 = vpop.f32.mrb[39].mxu1  ;;  %v4861_v11 = vpop.f32.mrb[71].mxu0  ;;  %6032 = vmatprep.subr.bf16.mxu1 %v7356_v51  ;;  %v7362_v51 = vld [vmem:[#allocation9 + $0xe0] sm:$0xff]  }
 0x3aa   :  { %v6229_v42 = vadd.f32 %v4522_v49, %v8613_v2  ;;  %v8657_v17 = vadd.f32 %v4861_v11, %v8621_v7  ;;  %v7364_v49 = vld [vmem:[#allocation9 + $0xe8] sm:$0xff]  }
 0x3ab   :  { %v4928_v60 = vpack.c.bf16 %v6228_v21, %v6226_v28  ;;  %v4930_v33 = vpack.c.bf16 %v8649_v31, %v8645_v15  ;;  %v7363_v21 = vld [vmem:[#allocation9 + $0xa0] sm:$0xff]   ;;  %v6296_v15 = vadd.f32 %v8601_v8, %v8621_v7 }
 0x3ac   :  { %v4929_v18 = vpack.c.bf16 %v6229_v42, %v6227_v61  ;;  %v4931_v47 = vpack.c.bf16 %v8657_v17, %v8653_v40  ;;  %6033 = vmatpush3.bf16.msra.mxu1 %v7357_v30  ;;  %v6292_v40 = vadd.f32 %v8597_v52, %v8621_v7  ;;  %v6298_v52 = vadd.f32 %v8603_v20, %v8617_v38 }
 0x3ad   :  { %6034 = vmatprep.subr.bf16.mxu1 %v7358_v41 }
 0x3ae   :  { %v4526_v25 = vpop.f32.mrb[40].mxu1  ;;  %v4865_v63 = vpop.f32.mrb[72].mxu0  ;;  %5259 = vmatprep.mubr.bf16.mxu1 %v4929_v18 }
 0x3af   :  { %v4528_v0 = vpop.f32.mrb[41].mxu1  ;;  %v4867_v13 = vpop.f32.mrb[73].mxu0  ;;  %5260 = vmatmul.mubr.bf16.gmra.mrb[84].mxu1 %v4928_v60  ;;  %v6230_v24 = vadd.f32 %v4526_v25, %v8609_v32  ;;  %v8665_v1 = vadd.f32 %v4865_v63, %v8617_v38 }
 0x3b0   :  { %v4530_v55 = vpop.f32.mrb[42].mxu1  ;;  %v4869_v36 = vpop.f32.mrb[74].mxu0  ;;  %6035 = vmatpush3.bf16.msra.mxu1 %v7359_v6  ;;  %v6231_v37 = vadd.f32 %v4528_v0, %v8613_v2  ;;  %v8673_v22 = vadd.f32 %v4867_v13, %v8621_v7  ;;  %v7365_v6 = vld [vmem:[#allocation9 + $0xa8] sm:$0xff]  }
 0x3b1   :  { %v6232_v5 = vadd.f32 %v4530_v55, %v8609_v32  ;;  %v8669_v35 = vadd.f32 %v4869_v36, %v8617_v38  ;;  %v4532_v4 = vpop.f32.mrb[43].mxu1  ;;  %v4871_v26 = vpop.f32.mrb[75].mxu0  ;;  %6036 = vmatprep.subr.bf16.mxu1 %v7360_v12  ;;  %v7366_v36 = vld [vmem:[#allocation9 + $0xf0] sm:$0xff]  }
 0x3b2   :  { %v6233_v16 = vadd.f32 %v4532_v4, %v8613_v2  ;;  %v8677_v50 = vadd.f32 %v4871_v26, %v8621_v7 }
 0x3b3   :  { %v4932_v57 = vpack.c.bf16 %v6232_v5, %v6230_v24  ;;  %v4934_v14 = vpack.c.bf16 %v8669_v35, %v8665_v1 }
 0x3b4   :  { %v4933_v30 = vpack.c.bf16 %v6233_v16, %v6231_v37  ;;  %v4935_v28 = vpack.c.bf16 %v8677_v50, %v8673_v22  ;;  %6037 = vmatpush3.bf16.msra.mxu1 %v7361_v10  ;;  %v6300_v22 = vadd.f32 %v8605_v43, %v8621_v7 }
 0x3b5   :  { %6038 = vmatprep.subr.bf16.mxu1 %v7362_v51 }
 0x3b6   :  { %v4536_v11 = vpop.f32.mrb[44].mxu1  ;;  %v4875_v41 = vpop.f32.mrb[76].mxu0  ;;  %5267 = vmatprep.mubr.bf16.mxu1 %v4933_v30  ;;  %v7368_v30 = vld [vmem:[#allocation9 + $0xf8] sm:$0xff]  }
 0x3b7   :  { %v4538_v61 = vpop.f32.mrb[45].mxu1  ;;  %v4877_v42 = vpop.f32.mrb[77].mxu0  ;;  %5268 = vmatmul.mubr.bf16.gmra.mrb[88].mxu1 %v4932_v57  ;;  %v6234_v12 = vadd.f32 %v4536_v11, %v8609_v32  ;;  %v8685_v25 = vadd.f32 %v4875_v41, %v8617_v38  ;;  %v7367_v57 = vld [vmem:[#allocation9 + $0xb0] sm:$0xff]   ;;  %v7369_v41 = vld [vmem:[#allocation9 + $0xb8] sm:$0xff]  }
 0x3b8   :  { %v4540_v60 = vpop.f32.mrb[46].mxu1  ;;  %v4879_v18 = vpop.f32.mrb[78].mxu0  ;;  %6039 = vmatpush3.bf16.msra.mxu1 %v7363_v21  ;;  %v6235_v10 = vadd.f32 %v4538_v61, %v8613_v2  ;;  %v8693_v24 = vadd.f32 %v4877_v42, %v8621_v7 }
 0x3b9   :  { %v6236_v63 = vadd.f32 %v4540_v60, %v8609_v32  ;;  %v8689_v0 = vadd.f32 %v4879_v18, %v8617_v38  ;;  %v4542_v13 = vpop.f32.mrb[47].mxu1  ;;  %v4881_v55 = vpop.f32.mrb[79].mxu0  ;;  %6040 = vmatprep.subr.bf16.mxu1 %v7364_v49 }
 0x3ba   :  { %v6237_v5 = vadd.f32 %v4542_v13, %v8613_v2  ;;  %v8697_v4 = vadd.f32 %v4881_v55, %v8621_v7 }
 0x3bb   :  { %v4936_v26 = vpack.c.bf16 %v6236_v63, %v6234_v12  ;;  %v4938_v51 = vpack.c.bf16 %v8689_v0, %v8685_v25 }
 0x3bc   :  { %v4937_v37 = vpack.c.bf16 %v6237_v5, %v6235_v10  ;;  %v4939_v16 = vpack.c.bf16 %v8697_v4, %v8693_v24  ;;  %6041 = vmatpush3.bf16.msra.mxu1 %v7365_v6 }
 0x3bd   :  { %6042 = vmatprep.subr.bf16.mxu1 %v7366_v36 }
 0x3be   :  { %v4546_v21 = vpop.f32.mrb[48].mxu1  ;;  %5275 = vmatprep.mubr.bf16.mxu1 %v4937_v37 }
 0x3bf   :  { %v4548_v49 = vpop.f32.mrb[49].mxu1  ;;  %5276 = vmatmul.mubr.bf16.gmra.mrb[92].mxu1 %v4936_v26  ;;  %v6238_v61 = vadd.f32 %v4546_v21, %v8609_v32 }
 0x3c0   :  { %v4550_v11 = vpop.f32.mrb[50].mxu1  ;;  %6043 = vmatpush3.bf16.msra.mxu1 %v7367_v57  ;;  %v6239_v18 = vadd.f32 %v4548_v49, %v8613_v2 }
 0x3c1   :  { %v6240_v42 = vadd.f32 %v4550_v11, %v8609_v32  ;;  %v4552_v60 = vpop.f32.mrb[51].mxu1  ;;  %6044 = vmatprep.subr.bf16.mxu1 %v7368_v30 }
 0x3c2   :  { %v6241_v6 = vadd.f32 %v4552_v60, %v8613_v2 }
 0x3c3   :  { %v4940_v12 = vpack.c.bf16 %v6240_v42, %v6238_v61 }
 0x3c4   :  { %v4941_v63 = vpack.c.bf16 %v6241_v6, %v6239_v18  ;;  %6045 = vmatpush3.bf16.msra.mxu1 %v7369_v41 }
 0x3c6   :  { %v4556_v13 = vpop.f32.mrb[52].mxu1  ;;  %5283 = vmatprep.mubr.bf16.mxu1 %v4941_v63 }
 0x3c7   :  { %v4558_v55 = vpop.f32.mrb[53].mxu1  ;;  %5284 = vmatmul.mubr.bf16.gmra.mrb[96].mxu1 %v4940_v12  ;;  %v6242_v10 = vadd.f32 %v4556_v13, %v8609_v32 }
 0x3c8   :  { %v4560_v36 = vpop.f32.mrb[54].mxu1  ;;  %v6243_v37 = vadd.f32 %v4558_v55, %v8613_v2 }
 0x3c9   :  { %v6244_v5 = vadd.f32 %v4560_v36, %v8609_v32  ;;  %v4562_v26 = vpop.f32.mrb[55].mxu1 }
 0x3ca   :  { %v6245_v57 = vadd.f32 %v4562_v26, %v8613_v2 }
 0x3cb   :  { %v4944_v30 = vpack.c.bf16 %v6244_v5, %v6242_v10 }
 0x3cc   :  { %v4945_v21 = vpack.c.bf16 %v6245_v57, %v6243_v37 }
 0x3ce   :  { %v4566_v49 = vpop.f32.mrb[56].mxu1  ;;  %5291 = vmatprep.mubr.bf16.mxu1 %v4945_v21 }
 0x3cf   :  { %v4568_v11 = vpop.f32.mrb[57].mxu1  ;;  %5292 = vmatmul.mubr.bf16.gmra.mrb[100].mxu1 %v4944_v30  ;;  %v6246_v61 = vadd.f32 %v4566_v49, %v8609_v32  ;;  %v6270_v49 = vadd.f32 %v8575_v62, %v8617_v38 }
 0x3d0   :  { %v4570_v41 = vpop.f32.mrb[58].mxu1  ;;  %v6247_v18 = vadd.f32 %v4568_v11, %v8613_v2  ;;  %v6272_v11 = vadd.f32 %v8577_v44, %v8621_v7 }
 0x3d1   :  { %v6248_v42 = vadd.f32 %v4570_v41, %v8609_v32  ;;  %v4572_v60 = vpop.f32.mrb[59].mxu1 }
 0x3d2   :  { %v6249_v6 = vadd.f32 %v4572_v60, %v8613_v2  ;;  %v6276_v60 = vadd.f32 %v8581_v3, %v8621_v7  ;;  %v6282_v3 = vadd.f32 %v8587_v58, %v8617_v38 }
 0x3d3   :  { %v4948_v12 = vpack.c.bf16 %v6248_v42, %v6246_v61  ;;  %v6274_v61 = vadd.f32 %v8579_v45, %v8617_v38  ;;  %v6278_v45 = vadd.f32 %v8583_v23, %v8617_v38 }
 0x3d4   :  { %v4949_v63 = vpack.c.bf16 %v6249_v6, %v6247_v18 }
 0x3d6   :  { %v4576_v13 = vpop.f32.mrb[60].mxu1  ;;  %5299 = vmatprep.mubr.bf16.mxu1 %v4949_v63 }
 0x3d7   :  { %v4578_v55 = vpop.f32.mrb[61].mxu1  ;;  %5300 = vmatmul.mubr.bf16.gmra.mrb[104].mxu1 %v4948_v12  ;;  %v6250_v10 = vadd.f32 %v4576_v13, %v8609_v32  ;;  %v6280_v13 = vadd.f32 %v8585_v53, %v8621_v7 }
 0x3d8   :  { %v4580_v36 = vpop.f32.mrb[62].mxu1  ;;  %v6251_v37 = vadd.f32 %v4578_v55, %v8613_v2 }
 0x3d9   :  { %v6252_v5 = vadd.f32 %v4580_v36, %v8609_v32  ;;  %v4582_v26 = vpop.f32.mrb[63].mxu1 }
 0x3da   :  { %v6253_v57 = vadd.f32 %v4582_v26, %v8613_v2 }
 0x3db   :  { %v4952_v30 = vpack.c.bf16 %v6252_v5, %v6250_v10 }
 0x3dc   :  { %v4953_v21 = vpack.c.bf16 %v6253_v57, %v6251_v37  ;;  %v6286_v37 = vadd.f32 %v8591_v29, %v8617_v38 }
 0x3de   :  { %v4885_v41 = vpop.f32.mrb[64].mxu1  ;;  %5307 = vmatprep.mubr.bf16.mxu1 %v4953_v21 }
 0x3df   :  { %v6271_v42 = vadd.f32 %v6270_v49, %v4885_v41  ;;  %v4887_v32 = vpop.f32.mrb[65].mxu1  ;;  %5308 = vmatmul.mubr.bf16.gmra.mrb[108].mxu1 %v4952_v30  ;;  %v6294_v49 = vadd.f32 %v8599_v39, %v8617_v38 }
 0x3e0   :  { %v6273_v2 = vadd.f32 %v6272_v11, %v4887_v32  ;;  %v4889_v18 = vpop.f32.mrb[66].mxu1  ;;  %5348 = vmatprep.mubr.bf16.mxu1 %v4927_v19 }
 0x3e1   :  { %v6275_v62 = vadd.f32 %v6274_v61, %v4889_v18  ;;  %v4891_v6 = vpop.f32.mrb[67].mxu1 }
 0x3e2   :  { %v6277_v44 = vadd.f32 %v6276_v60, %v4891_v6 }
 0x3e3   :  { %v4942_v12 = vpack.c.bf16 %v6275_v62, %v6271_v42 }
 0x3e4   :  { %v4943_v63 = vpack.c.bf16 %v6277_v44, %v6273_v2 }
 0x3e6   :  { %v4895_v55 = vpop.f32.mrb[68].mxu1 }
 0x3e7   :  { %v6279_v36 = vadd.f32 %v6278_v45, %v4895_v55  ;;  %v4897_v10 = vpop.f32.mrb[69].mxu1  ;;  %5349 = vmatmul.mubr.bf16.vlgmr.msra.gmra.mrb[112].mxu1 %v4926_v54 }
 0x3e8   :  { %v6281_v59 = vadd.f32 %v6280_v13, %v4897_v10  ;;  %v4899_v19 = vpop.f32.mrb[70].mxu1  ;;  %5356 = vmatprep.mubr.bf16.mxu1 %v4931_v47 }
 0x3e9   :  { %v6283_v23 = vadd.f32 %v6282_v3, %v4899_v19  ;;  %v4901_v53 = vpop.f32.mrb[71].mxu1 }
 0x3ea   :  { %v6285_v5 = vadd.f32 %v6284_v48, %v4901_v53 }
 0x3eb   :  { %v4946_v26 = vpack.c.bf16 %v6283_v23, %v6279_v36 }
 0x3ec   :  { %v4947_v58 = vpack.c.bf16 %v6285_v5, %v6281_v59 }
 0x3ee   :  { %v4905_v56 = vpop.f32.mrb[72].mxu1 }
 0x3ef   :  { %v6287_v54 = vadd.f32 %v6286_v37, %v4905_v56  ;;  %v4907_v57 = vpop.f32.mrb[73].mxu1  ;;  %5357 = vmatmul.mubr.bf16.gmra.mrb[116].mxu1 %v4930_v33 }
 0x3f0   :  { %v6289_v17 = vadd.f32 %v6288_v46, %v4907_v57  ;;  %v4909_v47 = vpop.f32.mrb[74].mxu1  ;;  %5364 = vmatprep.mubr.bf16.mxu1 %v4935_v28 }
 0x3f1   :  { %v6291_v29 = vadd.f32 %v6290_v34, %v4909_v47  ;;  %v4911_v9 = vpop.f32.mrb[75].mxu1 }
 0x3f2   :  { %v6293_v30 = vadd.f32 %v6292_v40, %v4911_v9 }
 0x3f3   :  { %v4950_v21 = vpack.c.bf16 %v6291_v29, %v6287_v54 }
 0x3f4   :  { %v4951_v27 = vpack.c.bf16 %v6293_v30, %v6289_v17 }
 0x3f6   :  { %v4915_v31 = vpop.f32.mrb[76].mxu1 }
 0x3f7   :  { %v6295_v33 = vadd.f32 %v6294_v49, %v4915_v31  ;;  %v4917_v11 = vpop.f32.mrb[77].mxu1  ;;  %5365 = vmatmul.mubr.bf16.gmra.mrb[120].mxu1 %v4934_v14 }
 0x3f8   :  { %v6297_v50 = vadd.f32 %v6296_v15, %v4917_v11  ;;  %v4919_v28 = vpop.f32.mrb[78].mxu1  ;;  %5372 = vmatprep.mubr.bf16.mxu1 %v4939_v16 }
 0x3f9   :  { %v6299_v39 = vadd.f32 %v6298_v52, %v4919_v28  ;;  %v4921_v8 = vpop.f32.mrb[79].mxu1 }
 0x3fa   :  { %v6301_v41 = vadd.f32 %v6300_v22, %v4921_v8 }
 0x3fb   :  { %v4954_v61 = vpack.c.bf16 %v6299_v39, %v6295_v33 }
 0x3fc   :  { %v4955_v20 = vpack.c.bf16 %v6301_v41, %v6297_v50 }
 0x3ff   :  { %5373 = vmatmul.mubr.bf16.gmra.mrb[124].mxu1 %v4938_v51 }
 0x400   :  { %5380 = vmatprep.mubr.bf16.mxu1 %v4943_v63 }
 0x407   :  { %5381 = vmatmul.mubr.bf16.gmra.mrb[128].mxu1 %v4942_v12 }
 0x408   :  { %5388 = vmatprep.mubr.bf16.mxu1 %v4947_v58 }
 0x40f   :  { %5389 = vmatmul.mubr.bf16.gmra.mrb[132].mxu1 %v4946_v26 }
 0x410   :  { %5396 = vmatprep.mubr.bf16.mxu1 %v4951_v27 }
 0x417   :  { %5397 = vmatmul.mubr.bf16.gmra.mrb[136].mxu1 %v4950_v21  ;;  %v8799_v21 = vld [vmem:[#allocation10] ss:$0 sm:$0xff] }
 0x418   :  { %5404 = vmatprep.mubr.bf16.mxu1 %v4955_v20 }
 0x41f   :  { %5405 = vmatmul.mubr.bf16.gmra.mrb[140].mxu1 %v4954_v61 }
 0x47a   :  { %v5982_v43 = vpop.f32.mrb[80].mxu1 }
 0x47b   :  { %v5983_v38 = vpop.f32.mrb[81].mxu1 }
 0x47c   :  { %v5984_v7 = vadd.f32 %v5983_v38, %v5982_v43  ;;  %v5985_v1 = vpop.f32.mrb[82].mxu1 }
 0x47d   :  { %v5986_v35 = vpop.f32.mrb[83].mxu1 }
 0x47e   :  { %v5987_v14 = vadd.f32 %v5986_v35, %v5985_v1  ;;  %v5254_v15 = vadd.f32 %v5984_v7, %v8799_v21 }
 0x480   :  { %v5257_v11 = vadd.f32 %v5987_v14, %v8799_v21 }
 0x482   :  { %v5988_v24 = vpop.f32.mrb[84].mxu1 }
 0x483   :  { %v5989_v4 = vpop.f32.mrb[85].mxu1 }
 0x484   :  { %v5990_v16 = vadd.f32 %v5989_v4, %v5988_v24  ;;  %v5991_v42 = vpop.f32.mrb[86].mxu1 }
 0x485   :  { %v5992_v25 = vpop.f32.mrb[87].mxu1 }
 0x486   :  { %v5993_v0 = vadd.f32 %v5992_v25, %v5991_v42  ;;  %v5262_v41 = vadd.f32 %v5990_v16, %v8799_v21 }
 0x488   :  { %v5265_v38 = vadd.f32 %v5993_v0, %v8799_v21 }
 0x48a   :  { %v5994_v51 = vpop.f32.mrb[88].mxu1 }
 0x48b   :  { %v5995_v32 = vpop.f32.mrb[89].mxu1 }
 0x48c   :  { %v8775_v60 = vadd.f32 %v5995_v32, %v5994_v51  ;;  %v5997_v2 = vpop.f32.mrb[90].mxu1 }
 0x48d   :  { %v5998_v18 = vpop.f32.mrb[91].mxu1 }
 0x48e   :  { %v8777_v62 = vadd.f32 %v5998_v18, %v5997_v2  ;;  %v5270_v16 = vadd.f32 %v8775_v60, %v8799_v21 }
 0x490   :  { %v5273_v32 = vadd.f32 %v8777_v62, %v8799_v21 }
 0x492   :  { %v6000_v6 = vpop.f32.mrb[92].mxu1 }
 0x493   :  { %v6001_v44 = vpop.f32.mrb[93].mxu1 }
 0x494   :  { %v8779_v12 = vadd.f32 %v6001_v44, %v6000_v6  ;;  %v6003_v63 = vpop.f32.mrb[94].mxu1 }
 0x495   :  { %v6004_v45 = vpop.f32.mrb[95].mxu1 }
 0x496   :  { %v8781_v13 = vadd.f32 %v6004_v45, %v6003_v63 }
 0x49a   :  { %v6006_v55 = vpop.f32.mrb[96].mxu1 }
 0x49b   :  { %v6007_v3 = vpop.f32.mrb[97].mxu1 }
 0x49c   :  { %v8783_v36 = vadd.f32 %v6007_v3, %v6006_v55  ;;  %v6009_v10 = vpop.f32.mrb[98].mxu1  ;;  %v5278_v55 = vadd.f32 %v8779_v12, %v8799_v21 }
 0x49d   :  { %v6010_v48 = vpop.f32.mrb[99].mxu1 }
 0x49e   :  { %v8785_v59 = vadd.f32 %v6010_v48, %v6009_v10  ;;  %v5281_v48 = vadd.f32 %v8781_v13, %v8799_v21 }
 0x4a2   :  { %v6012_v19 = vpop.f32.mrb[100].mxu1 }
 0x4a3   :  { %v6013_v23 = vpop.f32.mrb[101].mxu1 }
 0x4a4   :  { %v8787_v53 = vadd.f32 %v6013_v23, %v6012_v19  ;;  %v6015_v5 = vpop.f32.mrb[102].mxu1 }
 0x4a5   :  { %v6016_v26 = vpop.f32.mrb[103].mxu1 }
 0x4a6   :  { %v8789_v58 = vadd.f32 %v6016_v26, %v6015_v5 }
 0x4aa   :  { %v6018_v37 = vpop.f32.mrb[104].mxu1 }
 0x4ab   :  { %v6019_v46 = vpop.f32.mrb[105].mxu1 }
 0x4ac   :  { %v8791_v56 = vadd.f32 %v6019_v46, %v6018_v37  ;;  %v6021_v34 = vpop.f32.mrb[106].mxu1 }
 0x4ad   :  { %v6022_v54 = vpop.f32.mrb[107].mxu1 }
 0x4ae   :  { %v8793_v57 = vadd.f32 %v6022_v54, %v6021_v34  ;;  %v5286_v34 = vadd.f32 %v8783_v36, %v8799_v21 }
 0x4b2   :  { %v6024_v40 = vpop.f32.mrb[108].mxu1 }
 0x4b3   :  { %v6025_v17 = vpop.f32.mrb[109].mxu1 }
 0x4b4   :  { %v8795_v47 = vadd.f32 %v6025_v17, %v6024_v40  ;;  %v6027_v29 = vpop.f32.mrb[110].mxu1  ;;  %v5289_v17 = vadd.f32 %v8785_v59, %v8799_v21 }
 0x4b5   :  { %v6028_v9 = vpop.f32.mrb[111].mxu1 }
 0x4b6   :  { %v8797_v30 = vadd.f32 %v6028_v9, %v6027_v29 }
 0x4ba   :  { %v6046_v27 = vpop.f32.mrb[112].mxu1 }
 0x4bb   :  { %v6047_v49 = vpop.f32.mrb[113].mxu1 }
 0x4bc   :  { %v6048_v31 = vadd.f32 %v6047_v49, %v6046_v27  ;;  %v6049_v52 = vpop.f32.mrb[114].mxu1 }
 0x4bd   :  { %v6050_v33 = vpop.f32.mrb[115].mxu1 }
 0x4be   :  { %v5351_v22 = vadd.f32 %v6048_v31, %v5254_v15  ;;  %v6051_v50 = vadd.f32 %v6050_v33, %v6049_v52  ;;  %v5294_v52 = vadd.f32 %v8787_v53, %v8799_v21 }
 0x4c0   :  { %7370 = vtanh.f32 %v5351_v22  ;;  %v5354_v28 = vadd.f32 %v6051_v50, %v5257_v11  ;;  %v5297_v22 = vadd.f32 %v8789_v58, %v8799_v21 }
 0x4c2   :  { %7372 = vtanh.f32 %v5354_v28  ;;  %v6052_v39 = vpop.f32.mrb[116].mxu1 }
 0x4c3   :  { %v6053_v8 = vpop.f32.mrb[117].mxu1 }
 0x4c4   :  { %v6054_v61 = vadd.f32 %v6053_v8, %v6052_v39  ;;  %v6055_v20 = vpop.f32.mrb[118].mxu1 }
 0x4c5   :  { %v6056_v43 = vpop.f32.mrb[119].mxu1 }
 0x4c6   :  { %v5359_v7 = vadd.f32 %v6054_v61, %v5262_v41  ;;  %v6057_v1 = vadd.f32 %v6056_v43, %v6055_v20  ;;  %v5302_v20 = vadd.f32 %v8791_v56, %v8799_v21 }
 0x4c8   :  { %7374 = vtanh.f32 %v5359_v7  ;;  %v5362_v35 = vadd.f32 %v6057_v1, %v5265_v38  ;;  %v5305_v7 = vadd.f32 %v8793_v57, %v8799_v21 }
 0x4ca   :  { %v7371_v24 = vpop.eup %7370  ;;  %7376 = vtanh.f32 %v5362_v35  ;;  %v6058_v14 = vpop.f32.mrb[120].mxu1 }
 0x4cb   :  { %5429 = vst [vmem:[%s8884_s7] sm:$0xff] %v7371_v24  ;;  %v6059_v4 = vpop.f32.mrb[121].mxu1 }
 0x4cc   :  { %v7373_v42 = vpop.eup %7372  ;;  %v6060_v25 = vadd.f32 %v6059_v4, %v6058_v14  ;;  %v6061_v51 = vpop.f32.mrb[122].mxu1 }
 0x4cd   :  { %5430 = vst [vmem:[%s8884_s7 + $0x8] sm:$0xff] %v7373_v42  ;;  %v6062_v0 = vpop.f32.mrb[123].mxu1 }
 0x4ce   :  { %v5367_v2 = vadd.f32 %v6060_v25, %v5270_v16  ;;  %v6063_v18 = vadd.f32 %v6062_v0, %v6061_v51  ;;  %v5310_v16 = vadd.f32 %v8795_v47, %v8799_v21  ;;  %v5313_v0 = vadd.f32 %v8797_v30, %v8799_v21 }
 0x4d0   :  { %7378 = vtanh.f32 %v5367_v2  ;;  %v5370_v6 = vadd.f32 %v6063_v18, %v5273_v32 }
 0x4d2   :  { %v7375_v44 = vpop.eup %7374  ;;  %7380 = vtanh.f32 %v5370_v6  ;;  %v6064_v63 = vpop.f32.mrb[124].mxu1 }
 0x4d3   :  { %5431 = vst [vmem:[%s8884_s7 + $0x10] sm:$0xff] %v7375_v44  ;;  %v6065_v60 = vpop.f32.mrb[125].mxu1 }
 0x4d4   :  { %v7377_v45 = vpop.eup %7376  ;;  %v6066_v3 = vadd.f32 %v6065_v60, %v6064_v63  ;;  %v6067_v10 = vpop.f32.mrb[126].mxu1 }
 0x4d5   :  { %5432 = vst [vmem:[%s8884_s7 + $0x18] sm:$0xff] %v7377_v45  ;;  %v6068_v62 = vpop.f32.mrb[127].mxu1 }
 0x4d6   :  { %v5375_v19 = vadd.f32 %v6066_v3, %v5278_v55  ;;  %v6069_v23 = vadd.f32 %v6068_v62, %v6067_v10 }
 0x4d8   :  { %7382 = vtanh.f32 %v5375_v19  ;;  %v5378_v5 = vadd.f32 %v6069_v23, %v5281_v48 }
 0x4da   :  { %v7379_v26 = vpop.eup %7378  ;;  %7384 = vtanh.f32 %v5378_v5  ;;  %v6070_v37 = vpop.f32.mrb[128].mxu1 }
 0x4db   :  { %5433 = vst [vmem:[%s8884_s7 + $0x20] sm:$0xff] %v7379_v26  ;;  %v6071_v12 = vpop.f32.mrb[129].mxu1 }
 0x4dc   :  { %v7381_v46 = vpop.eup %7380  ;;  %v6072_v54 = vadd.f32 %v6071_v12, %v6070_v37  ;;  %v6073_v40 = vpop.f32.mrb[130].mxu1 }
 0x4dd   :  { %5434 = vst [vmem:[%s8884_s7 + $0x28] sm:$0xff] %v7381_v46  ;;  %v6074_v13 = vpop.f32.mrb[131].mxu1 }
 0x4de   :  { %v5383_v29 = vadd.f32 %v6072_v54, %v5286_v34  ;;  %v6075_v9 = vadd.f32 %v6074_v13, %v6073_v40 }
 0x4e0   :  { %7386 = vtanh.f32 %v5383_v29  ;;  %v5386_v27 = vadd.f32 %v6075_v9, %v5289_v17 }
 0x4e2   :  { %v7383_v49 = vpop.eup %7382  ;;  %7388 = vtanh.f32 %v5386_v27  ;;  %v6076_v15 = vpop.f32.mrb[132].mxu1 }
 0x4e3   :  { %5435 = vst [vmem:[%s8884_s7 + $0x30] sm:$0xff] %v7383_v49  ;;  %v6077_v36 = vpop.f32.mrb[133].mxu1 }
 0x4e4   :  { %v7385_v31 = vpop.eup %7384  ;;  %v6078_v33 = vadd.f32 %v6077_v36, %v6076_v15  ;;  %v6079_v11 = vpop.f32.mrb[134].mxu1 }
 0x4e5   :  { %5436 = vst [vmem:[%s8884_s7 + $0x38] sm:$0xff] %v7385_v31  ;;  %v6080_v59 = vpop.f32.mrb[135].mxu1 }
 0x4e6   :  { %v5391_v50 = vadd.f32 %v6078_v33, %v5294_v52  ;;  %v6081_v28 = vadd.f32 %v6080_v59, %v6079_v11 }
 0x4e8   :  { %7390 = vtanh.f32 %v5391_v50  ;;  %v5394_v39 = vadd.f32 %v6081_v28, %v5297_v22 }
 0x4ea   :  { %v7387_v8 = vpop.eup %7386  ;;  %7392 = vtanh.f32 %v5394_v39  ;;  %v6082_v41 = vpop.f32.mrb[136].mxu1 }
 0x4eb   :  { %5437 = vst [vmem:[%s8884_s7 + $0x40] sm:$0xff] %v7387_v8  ;;  %v6083_v53 = vpop.f32.mrb[137].mxu1 }
 0x4ec   :  { %v7389_v61 = vpop.eup %7388  ;;  %v6084_v43 = vadd.f32 %v6083_v53, %v6082_v41  ;;  %v6085_v38 = vpop.f32.mrb[138].mxu1 }
 0x4ed   :  { %5438 = vst [vmem:[%s8884_s7 + $0x48] sm:$0xff] %v7389_v61  ;;  %v6086_v58 = vpop.f32.mrb[139].mxu1 }
 0x4ee   :  { %v5399_v1 = vadd.f32 %v6084_v43, %v5302_v20  ;;  %v6087_v35 = vadd.f32 %v6086_v58, %v6085_v38 }
 0x4f0   :  { %7394 = vtanh.f32 %v5399_v1  ;;  %v5402_v24 = vadd.f32 %v6087_v35, %v5305_v7 }
 0x4f2   :  { %v7391_v14 = vpop.eup %7390  ;;  %7396 = vtanh.f32 %v5402_v24  ;;  %v6088_v4 = vpop.f32.mrb[140].mxu1 }
 0x4f3   :  { %5439 = vst [vmem:[%s8884_s7 + $0x50] sm:$0xff] %v7391_v14  ;;  %v6089_v56 = vpop.f32.mrb[141].mxu1 }
 0x4f4   :  { %v7393_v42 = vpop.eup %7392  ;;  %v6090_v25 = vadd.f32 %v6089_v56, %v6088_v4  ;;  %v6091_v51 = vpop.f32.mrb[142].mxu1 }
 0x4f5   :  { %5440 = vst [vmem:[%s8884_s7 + $0x58] sm:$0xff] %v7393_v42  ;;  %v6092_v57 = vpop.f32.mrb[143].mxu1 }
 0x4f6   :  { %v5407_v32 = vadd.f32 %v6090_v25, %v5310_v16  ;;  %v6093_v2 = vadd.f32 %v6092_v57, %v6091_v51 }
 0x4f8   :  { %7398 = vtanh.f32 %v5407_v32  ;;  %v5410_v18 = vadd.f32 %v6093_v2, %v5313_v0 }
 0x4fa   :  { %v7395_v6 = vpop.eup %7394  ;;  %7400 = vtanh.f32 %v5410_v18 }
 0x4fb   :  { %5441 = vst [vmem:[%s8884_s7 + $0x60] sm:$0xff] %v7395_v6 }
 0x4fc   :  { %v7397_v47 = vpop.eup %7396 }
 0x4fd   :  { %5442 = vst [vmem:[%s8884_s7 + $0x68] sm:$0xff] %v7397_v47 }
 0x502   :  { %v7399_v44 = vpop.eup %7398 }
 0x503   :  { %5443 = vst [vmem:[%s8884_s7 + $0x70] sm:$0xff] %v7399_v44 }
 0x504   :  { %v7401_v30 = vpop.eup %7400 }
 0x505   :  { %5444 = vst [vmem:[%s8884_s7 + $0x78] sm:$0xff] %v7401_v30 }
 0x506   :  { %5449 = vsyncpa [#allocation3], 1 }
 0x507   :  { %5450 = vsyncpa [#allocation5], 1 }
 0x508   :  { %5451 = vsyncpa [#allocation8], 1 }
 0x509   :  { %5452 = vsyncpa [#allocation11], 1 }

</bundles_post_ra>
